<compile_context>
chip_gen: v7x
topology: tpu7x:2x2x1
jax: 0.10.0
libtpu: 0.0.40
codegen_flags: <defaults>
</compile_context>

<pallas_src>
import functools
import math

import jax
import jax.numpy as jnp
import numpy as np
from jax import lax
from jax.experimental import pallas as pl
from jax.experimental.pallas import tpu as pltpu


# --------------------------------------------------------------------------------------
# Kernel 1: fused QKV projection + RMSNorm + RoPE (pair rotation pre-folded into weights)
# --------------------------------------------------------------------------------------
def _qkv_rope_kernel(x_ref, w_ref, b_ref, cq_ref, sq_ref, ck_ref, sk_ref,
                     q_ref, k_ref, v_ref, *, dim, eps):
    x = x_ref[...]                                                       # (TL, dim)
    qkv = jnp.dot(x, w_ref[...], preferred_element_type=jnp.float32) + b_ref[...]
    q = qkv[:, 0 * dim:1 * dim]
    k = qkv[:, 1 * dim:2 * dim]
    v = qkv[:, 2 * dim:3 * dim]
    q_sw = qkv[:, 3 * dim:4 * dim]       # pair-swapped projection of q (for the rotation)
    k_sw = qkv[:, 4 * dim:5 * dim]       # pair-swapped projection of k

    # WanRMSNorm over the full model dim (gain already folded into cos/sin tables).
    rq = lax.rsqrt(jnp.mean(q * q, axis=-1, keepdims=True) + eps)
    rk = lax.rsqrt(jnp.mean(k * k, axis=-1, keepdims=True) + eps)

    q_ref[...] = ((q * cq_ref[...] + q_sw * sq_ref[...]) * rq).astype(q_ref.dtype)
    k_ref[...] = ((k * ck_ref[...] + k_sw * sk_ref[...]) * rk).astype(k_ref.dtype)
    v_ref[...] = v.astype(v_ref.dtype)


# --------------------------------------------------------------------------------------
# Kernel 2: flash attention with per-batch key-length masking (k_lens = seq_lens)
# --------------------------------------------------------------------------------------
def _flash_attn_kernel(lens_ref, q_ref, k_ref, v_ref, o_ref,
                       m_ref, l_ref, acc_ref, *, scale):
    b = pl.program_id(0)
    ki = pl.program_id(3)

    @pl.when(ki == 0)
    def _():
        m_ref[...] = jnp.full_like(m_ref, -1e30)
        l_ref[...] = jnp.zeros_like(l_ref)
        acc_ref[...] = jnp.zeros_like(acc_ref)

    q = q_ref[...]                                                       # (TQ, D)
    k = k_ref[...]                                                       # (TK, D)
    s = lax.dot_general(q, k, (((1,), (1,)), ((), ())),
                        preferred_element_type=jnp.float32) * scale      # (TQ, TK)

    blk_q, blk_k = s.shape
    key_pos = ki * blk_k + lax.broadcasted_iota(jnp.int32, (blk_q, blk_k), 1)
    mask = key_pos < lens_ref[b]
    s = jnp.where(mask, s, -1e30)

    m_prev = m_ref[...]
    m_new = jnp.maximum(m_prev, jnp.max(s, axis=-1, keepdims=True))
    alpha = jnp.exp(m_prev - m_new)
    p = jnp.where(mask, jnp.exp(s - m_new), 0.0)                         # masked keys -> 0
    l_ref[...] = alpha * l_ref[...] + jnp.sum(p, axis=-1, keepdims=True)
    acc_ref[...] = alpha * acc_ref[...] + jnp.dot(
        p, v_ref[...], preferred_element_type=jnp.float32)
    m_ref[...] = m_new

    @pl.when(ki == pl.num_programs(3) - 1)
    def _():
        o_ref[...] = (acc_ref[...] / l_ref[...]).astype(o_ref.dtype)


# --------------------------------------------------------------------------------------
# Kernel 3: output projection
# --------------------------------------------------------------------------------------
def _linear_kernel(x_ref, w_ref, b_ref, o_ref):
    o_ref[...] = (jnp.dot(x_ref[...], w_ref[...], preferred_element_type=jnp.float32)
                  + b_ref[...]).astype(o_ref.dtype)


# --------------------------------------------------------------------------------------
# Wrapper
# --------------------------------------------------------------------------------------
def _pair_swap_last(a):
    """Swap elements 2i <-> 2i+1 along the last axis (exact, host/XLA side)."""
    a2 = a.reshape(a.shape[:-1] + (a.shape[-1] // 2, 2))
    return a2[..., ::-1].reshape(a.shape)


def wan_self_attention(x, seq_lens, freqs, params, *, num_heads, eps=1e-6,
                       tl=None, tq=128, tk=128):
    """JAX/Pallas equivalent of WanSelfAttention.forward (f32, window_size=(-1,-1))."""
    B, L, dim = x.shape
    assert dim % num_heads == 0
    D = dim // num_heads
    assert D % 2 == 0
    assert D % 128 == 0, "head_dim must be a multiple of 128 for lane-aligned head blocks"
    if tl is None:
        tl = min(L, 256)
    tq = min(tq, L)
    tk = min(tk, L)
    assert L % tl == 0 and L % tq == 0 and L % tk == 0

    f32 = jnp.float32
    x = x.astype(f32)
    wq, wk, wv, wo = (params[n].astype(f32) for n in ("wq", "wk", "wv", "wo"))
    bq, bk, bv, bo = (params[n].astype(f32) for n in ("bq", "bk", "bv", "bo"))
    gq, gk = params["gq"].astype(f32), params["gk"].astype(f32)

    # --- host-side prep: fold the RoPE pair rotation into the weights -------------------
    #   rotate(t)[j] = sign(j) * t[j^1],  sign = -1 on even channels, +1 on odd channels,
    #   and t[j^1] = (x @ W_swapped + b_swapped)[j]   (output columns pair-swapped).
    w_all = jnp.concatenate(
        [wq, wk, wv, _pair_swap_last(wq), _pair_swap_last(wk)], axis=1)      # (dim, 5*dim)
    b_all = jnp.concatenate(
        [bq, bk, bv, _pair_swap_last(bq), _pair_swap_last(bk)], axis=0)[None, :]

    cos_h = freqs[:, :D].astype(f32)                                          # (L, D)
    sin_h = freqs[:, D:].astype(f32)
    cos_full = jnp.tile(cos_h, (1, num_heads))                                # (L, dim)
    sin_full = jnp.tile(sin_h, (1, num_heads))
    sign = jnp.where(jnp.arange(dim) % 2 == 0, -1.0, 1.0).astype(f32)         # (dim,)
    cos_q = cos_full * gq[None, :]
    cos_k = cos_full * gk[None, :]
    sin_q = sin_full * sign[None, :] * _pair_swap_last(gq)[None, :]
    sin_k = sin_full * sign[None, :] * _pair_swap_last(gk)[None, :]

    row_spec = pl.BlockSpec((None, tl, dim), lambda b, i: (b, i, 0))
    tab_spec = pl.BlockSpec((tl, dim), lambda b, i: (i, 0))

    # --- kernel 1: fused QKV projection + RMSNorm + RoPE --------------------------------
    q_r, k_r, v = pl.pallas_call(
        functools.partial(_qkv_rope_kernel, dim=dim, eps=eps),
        out_shape=(jax.ShapeDtypeStruct((B, L, dim), f32),) * 3,
        grid=(B, L // tl),
        in_specs=[
            row_spec,                                              # x
            pl.BlockSpec((dim, 5 * dim), lambda b, i: (0, 0)),     # [Wq|Wk|Wv|Wq_sw|Wk_sw]
            pl.BlockSpec((1, 5 * dim), lambda b, i: (0, 0)),       # biases
            tab_spec, tab_spec, tab_spec, tab_spec,                # cos_q, sin_q, cos_k, sin_k
        ],
        out_specs=(row_spec, row_spec, row_spec),
        compiler_params=pltpu.CompilerParams(
            dimension_semantics=("parallel", "parallel")),
    )(x, w_all, b_all, cos_q, sin_q, cos_k, sin_k)

    # --- kernel 2: flash attention (heads sliced from the lane axis, no transposes) -----
    scale = 1.0 / math.sqrt(D)
    head_q = pl.BlockSpec((None, tq, D), lambda b, h, qi, ki, lens: (b, qi, h))
    head_k = pl.BlockSpec((None, tk, D), lambda b, h, qi, ki, lens: (b, ki, h))
    attn = pl.pallas_call(
        functools.partial(_flash_attn_kernel, scale=scale),
        out_shape=jax.ShapeDtypeStruct((B, L, dim), f32),
        grid_spec=pltpu.PrefetchScalarGridSpec(
            num_scalar_prefetch=1,
            grid=(B, num_heads, L // tq, L // tk),
            in_specs=[head_q, head_k, head_k],
            out_specs=head_q,
            scratch_shapes=[pltpu.VMEM((tq, 1), f32),     # running max
                            pltpu.VMEM((tq, 1), f32),     # running denom
                            pltpu.VMEM((tq, D), f32)],    # accumulator
        ),
        compiler_params=pltpu.CompilerParams(
            dimension_semantics=("parallel", "parallel", "parallel", "arbitrary")),
    )(seq_lens.astype(jnp.int32), q_r, k_r, v)

    # --- kernel 3: output projection -----------------------------------------------------
    out = pl.pallas_call(
        _linear_kernel,
        out_shape=jax.ShapeDtypeStruct((B, L, dim), f32),
        grid=(B, L // tl),
        in_specs=[
            row_spec,
            pl.BlockSpec((dim, dim), lambda b, i: (0, 0)),
            pl.BlockSpec((1, dim), lambda b, i: (0, 0)),
        ],
        out_specs=row_spec,
        compiler_params=pltpu.CompilerParams(
            dimension_semantics=("parallel", "parallel")),
    )(attn, wo, bo[None, :])
    return out


# --------------------------------------------------------------------------------------
# Pure-JAX reference (direct transcription of the PyTorch forward) for correctness check
# --------------------------------------------------------------------------------------
def _apply_rotary_ref(x, freqs):
    # x: (B, L, N, D); freqs: (L, 2*D) = [cos | sin]
    D = x.shape[-1]
    cos = freqs[None, :, None, :D]
    sin = freqs[None, :, None, D:]
    xr = x.reshape(x.shape[:-1] + (D // 2, 2))
    x_real, x_imag = xr[..., 0], xr[..., 1]
    x_rot = jnp.stack([-x_imag, x_real], axis=-1).reshape(x.shape)
    return x * cos + x_rot * sin


def _reference(x, seq_lens, freqs, params, *, num_heads, eps=1e-6):
    B, L, dim = x.shape
    D = dim // num_heads

    def linear(t, w, b):
        return t @ w + b

    def rmsnorm(t, g):
        return t * lax.rsqrt(jnp.mean(t * t, axis=-1, keepdims=True) + eps) * g

    q = rmsnorm(linear(x, params["wq"], params["bq"]), params["gq"])
    k = rmsnorm(linear(x, params["wk"], params["bk"]), params["gk"])
    v = linear(x, params["wv"], params["bv"])
    q = _apply_rotary_ref(q.reshape(B, L, num_heads, D), freqs)
    k = _apply_rotary_ref(k.reshape(B, L, num_heads, D), freqs)
    v = v.reshape(B, L, num_heads, D)

    logits = jnp.einsum("blhd,bmhd->bhlm", q, k) / math.sqrt(D)
    kmask = (jnp.arange(L)[None, :] < seq_lens[:, None])[:, None, None, :]
    logits = jnp.where(kmask, logits, -jnp.inf)
    probs = jax.nn.softmax(logits, axis=-1)
    o = jnp.einsum("bhlm,bmhd->blhd", probs, v).reshape(B, L, dim)
    return linear(o, params["wo"], params["bo"])


if __name__ == "__main__":
    B, L = 2, 128
    num_heads, head_dim = 2, 128
    dim = num_heads * head_dim
    eps = 1e-6

    key = jax.random.PRNGKey(0)
    ks = jax.random.split(key, 12)
    wscale = dim ** -0.5
    params = {
        "wq": jax.random.normal(ks[0], (dim, dim), jnp.float32) * wscale,
        "wk": jax.random.normal(ks[1], (dim, dim), jnp.float32) * wscale,
        "wv": jax.random.normal(ks[2], (dim, dim), jnp.float32) * wscale,
        "wo": jax.random.normal(ks[3], (dim, dim), jnp.float32) * wscale,
        "bq": jax.random.normal(ks[4], (dim,), jnp.float32) * 0.02,
        "bk": jax.random.normal(ks[5], (dim,), jnp.float32) * 0.02,
        "bv": jax.random.normal(ks[6], (dim,), jnp.float32) * 0.02,
        "bo": jax.random.normal(ks[7], (dim,), jnp.float32) * 0.02,
        "gq": 1.0 + 0.1 * jax.random.normal(ks[8], (dim,), jnp.float32),
        "gk": 1.0 + 0.1 * jax.random.normal(ks[9], (dim,), jnp.float32),
    }
    x = jax.random.normal(ks[10], (B, L, dim), jnp.float32)
    seq_lens = jnp.array([L, L - 41], dtype=jnp.int32)       # ragged key lengths

    # RoPE table, shape (L, 2*head_dim): [cos | sin], frequencies repeat-interleaved by 2.
    pos = jnp.arange(L, dtype=jnp.float32)
    inv = 1.0 / (10000.0 ** (jnp.arange(0, head_dim, 2, dtype=jnp.float32) / head_dim))
    ang = jnp.repeat(pos[:, None] * inv[None, :], 2, axis=1)             # (L, head_dim)
    freqs = jnp.concatenate([jnp.cos(ang), jnp.sin(ang)], axis=1)        # (L, 2*head_dim)

    out = wan_self_attention(x, seq_lens, freqs, params, num_heads=num_heads, eps=eps)
    out = jax.block_until_ready(out)
    assert out.shape == (B, L, dim), out.shape
    assert out.dtype == jnp.float32

    ref = jax.block_until_ready(
        _reference(x, seq_lens, freqs, params, num_heads=num_heads, eps=eps))
    np.testing.assert_allclose(np.asarray(out), np.asarray(ref), rtol=3e-3, atol=3e-3)

    print("KERNEL_OK")
</pallas_src>

<mosaic_0001>
module attributes {stable_mosaic.version = 11 : i64} {
  func.func @_qkv_rope_kernel(%arg0: i32, %arg1: i32, %arg2: memref<1x128x256xf32, #tpu.memory_space<vmem>>, %arg3: memref<256x1280xf32, #tpu.memory_space<vmem>>, %arg4: memref<1x1280xf32, #tpu.memory_space<vmem>>, %arg5: memref<128x256xf32, #tpu.memory_space<vmem>>, %arg6: memref<128x256xf32, #tpu.memory_space<vmem>>, %arg7: memref<128x256xf32, #tpu.memory_space<vmem>>, %arg8: memref<128x256xf32, #tpu.memory_space<vmem>>, %arg9: memref<1x128x256xf32, #tpu.memory_space<vmem>>, %arg10: memref<1x128x256xf32, #tpu.memory_space<vmem>>, %arg11: memref<1x128x256xf32, #tpu.memory_space<vmem>>) attributes {dimension_semantics = [#tpu.dimension_semantics<parallel>, #tpu.dimension_semantics<parallel>], iteration_bounds = array<i64: 2, 1>, scalar_prefetch = 0 : i64, scratch_operands = 0 : i64, tpu.core_type = #tpu.core_type<tc>, window_params = [{transform_indices = @transform_0, window_bounds = array<i64: 1, 128, 256>}, {pipeline_mode = #tpu.pipeline_mode<synchronous>, transform_indices = @transform_1, window_bounds = array<i64: 256, 1280>}, {pipeline_mode = #tpu.pipeline_mode<synchronous>, transform_indices = @transform_2, window_bounds = array<i64: 1, 1280>}, {transform_indices = @transform_3, window_bounds = array<i64: 128, 256>}, {transform_indices = @transform_4, window_bounds = array<i64: 128, 256>}, {transform_indices = @transform_5, window_bounds = array<i64: 128, 256>}, {transform_indices = @transform_6, window_bounds = array<i64: 128, 256>}, {transform_indices = @transform_7, window_bounds = array<i64: 1, 128, 256>}, {transform_indices = @transform_8, window_bounds = array<i64: 1, 128, 256>}, {transform_indices = @transform_9, window_bounds = array<i64: 1, 128, 256>}]} {
    %c0 = arith.constant 0 : index
    %c0_0 = arith.constant 0 : index
    %c0_1 = arith.constant 0 : index
    %0 = vector.load %arg2[%c0, %c0_0, %c0_1] : memref<1x128x256xf32, #tpu.memory_space<vmem>>, vector<1x128x256xf32>
    %1 = vector.shape_cast %0 : vector<1x128x256xf32> to vector<128x256xf32>
    %c0_2 = arith.constant 0 : index
    %c0_3 = arith.constant 0 : index
    %2 = vector.load %arg3[%c0_2, %c0_3] : memref<256x1280xf32, #tpu.memory_space<vmem>>, vector<256x1280xf32>
    %cst = arith.constant dense<0.000000e+00> : vector<128x1280xf32>
    %3 = tpu.matmul %1, %2, %cst {dimension_numbers = #tpu.dot_dimension_numbers<[1], [0], [0], [1], [0, 0, 1, 1], [], []>} : vector<128x256xf32>, vector<256x1280xf32>, vector<128x1280xf32> -> vector<128x1280xf32>
    %c0_4 = arith.constant 0 : index
    %c0_5 = arith.constant 0 : index
    %4 = vector.load %arg4[%c0_4, %c0_5] : memref<1x1280xf32, #tpu.memory_space<vmem>>, vector<1x1280xf32>
    %5 = vector.broadcast %4 : vector<1x1280xf32> to vector<128x1280xf32>
    %6 = arith.addf %3, %5 : vector<128x1280xf32>
    %7 = vector.extract_strided_slice %6 {offsets = [0, 0], sizes = [128, 256], strides = [1, 1]} : vector<128x1280xf32> to vector<128x256xf32>
    %8 = vector.extract_strided_slice %6 {offsets = [0, 256], sizes = [128, 256], strides = [1, 1]} : vector<128x1280xf32> to vector<128x256xf32>
    %9 = vector.extract_strided_slice %6 {offsets = [0, 512], sizes = [128, 256], strides = [1, 1]} : vector<128x1280xf32> to vector<128x256xf32>
    %10 = vector.extract_strided_slice %6 {offsets = [0, 768], sizes = [128, 256], strides = [1, 1]} : vector<128x1280xf32> to vector<128x256xf32>
    %11 = vector.extract_strided_slice %6 {offsets = [0, 1024], sizes = [128, 256], strides = [1, 1]} : vector<128x1280xf32> to vector<128x256xf32>
    %12 = arith.mulf %7, %7 : vector<128x256xf32>
    %cst_6 = arith.constant dense<0.000000e+00> : vector<128xf32>
    %13 = vector.multi_reduction <add>, %12, %cst_6 [1] : vector<128x256xf32> to vector<128xf32>
    %14 = vector.shape_cast %13 : vector<128xf32> to vector<128x1xf32>
    %cst_7 = arith.constant 2.560000e+02 : f32
    %15 = vector.broadcast %cst_7 : f32 to vector<128x1xf32>
    %16 = arith.divf %14, %15 : vector<128x1xf32>
    %cst_8 = arith.constant 9.99999997E-7 : f32
    %17 = vector.broadcast %cst_8 : f32 to vector<128x1xf32>
    %18 = arith.addf %16, %17 : vector<128x1xf32>
    %19 = math.rsqrt %18 : vector<128x1xf32>
    %20 = arith.mulf %8, %8 : vector<128x256xf32>
    %cst_9 = arith.constant dense<0.000000e+00> : vector<128xf32>
    %21 = vector.multi_reduction <add>, %20, %cst_9 [1] : vector<128x256xf32> to vector<128xf32>
    %22 = vector.shape_cast %21 : vector<128xf32> to vector<128x1xf32>
    %cst_10 = arith.constant 2.560000e+02 : f32
    %23 = vector.broadcast %cst_10 : f32 to vector<128x1xf32>
    %24 = arith.divf %22, %23 : vector<128x1xf32>
    %cst_11 = arith.constant 9.99999997E-7 : f32
    %25 = vector.broadcast %cst_11 : f32 to vector<128x1xf32>
    %26 = arith.addf %24, %25 : vector<128x1xf32>
    %27 = math.rsqrt %26 : vector<128x1xf32>
    %c0_12 = arith.constant 0 : index
    %c0_13 = arith.constant 0 : index
    %28 = vector.load %arg5[%c0_12, %c0_13] : memref<128x256xf32, #tpu.memory_space<vmem>>, vector<128x256xf32>
    %29 = arith.mulf %7, %28 : vector<128x256xf32>
    %c0_14 = arith.constant 0 : index
    %c0_15 = arith.constant 0 : index
    %30 = vector.load %arg6[%c0_14, %c0_15] : memref<128x256xf32, #tpu.memory_space<vmem>>, vector<128x256xf32>
    %31 = arith.mulf %10, %30 : vector<128x256xf32>
    %32 = arith.addf %29, %31 : vector<128x256xf32>
    %33 = vector.broadcast %19 : vector<128x1xf32> to vector<128x256xf32>
    %34 = arith.mulf %32, %33 : vector<128x256xf32>
    %c0_16 = arith.constant 0 : index
    %c0_17 = arith.constant 0 : index
    %c0_18 = arith.constant 0 : index
    %35 = vector.load %arg9[%c0_16, %c0_17, %c0_18] : memref<1x128x256xf32, #tpu.memory_space<vmem>>, vector<1x128x256xf32>
    %36 = vector.shape_cast %35 : vector<1x128x256xf32> to vector<128x256xf32>
    %37 = vector.shape_cast %34 : vector<128x256xf32> to vector<1x128x256xf32>
    tpu.vector_store %arg9[%c0_16, %c0_17, %c0_18], %37 {strides = array<i32>} : memref<1x128x256xf32, #tpu.memory_space<vmem>>, vector<1x128x256xf32>,
    %c0_19 = arith.constant 0 : index
    %c0_20 = arith.constant 0 : index
    %38 = vector.load %arg7[%c0_19, %c0_20] : memref<128x256xf32, #tpu.memory_space<vmem>>, vector<128x256xf32>
    %39 = arith.mulf %8, %38 : vector<128x256xf32>
    %c0_21 = arith.constant 0 : index
    %c0_22 = arith.constant 0 : index
    %40 = vector.load %arg8[%c0_21, %c0_22] : memref<128x256xf32, #tpu.memory_space<vmem>>, vector<128x256xf32>
    %41 = arith.mulf %11, %40 : vector<128x256xf32>
    %42 = arith.addf %39, %41 : vector<128x256xf32>
    %43 = vector.broadcast %27 : vector<128x1xf32> to vector<128x256xf32>
    %44 = arith.mulf %42, %43 : vector<128x256xf32>
    %c0_23 = arith.constant 0 : index
    %c0_24 = arith.constant 0 : index
    %c0_25 = arith.constant 0 : index
    %45 = vector.load %arg10[%c0_23, %c0_24, %c0_25] : memref<1x128x256xf32, #tpu.memory_space<vmem>>, vector<1x128x256xf32>
    %46 = vector.shape_cast %45 : vector<1x128x256xf32> to vector<128x256xf32>
    %47 = vector.shape_cast %44 : vector<128x256xf32> to vector<1x128x256xf32>
    tpu.vector_store %arg10[%c0_23, %c0_24, %c0_25], %47 {strides = array<i32>} : memref<1x128x256xf32, #tpu.memory_space<vmem>>, vector<1x128x256xf32>,
    %c0_26 = arith.constant 0 : index
    %c0_27 = arith.constant 0 : index
    %c0_28 = arith.constant 0 : index
    %48 = vector.load %arg11[%c0_26, %c0_27, %c0_28] : memref<1x128x256xf32, #tpu.memory_space<vmem>>, vector<1x128x256xf32>
    %49 = vector.shape_cast %48 : vector<1x128x256xf32> to vector<128x256xf32>
    %50 = vector.shape_cast %9 : vector<128x256xf32> to vector<1x128x256xf32>
    tpu.vector_store %arg11[%c0_26, %c0_27, %c0_28], %50 {strides = array<i32>} : memref<1x128x256xf32, #tpu.memory_space<vmem>>, vector<1x128x256xf32>,
    return
  }
  func.func @transform_0(%arg0: i32, %arg1: i32) -> (i32, i32, i32) {
    %c0_i32 = arith.constant 0 : i32
    %c0_i32_0 = arith.constant 0 : i32
    return %arg0, %arg1, %c0_i32 : i32, i32, i32
  }
  func.func @transform_1(%arg0: i32, %arg1: i32) -> (i32, i32) {
    %c0_i32 = arith.constant 0 : i32
    %c0_i32_0 = arith.constant 0 : i32
    %c0_i32_1 = arith.constant 0 : i32
    return %c0_i32, %c0_i32_0 : i32, i32
  }
  func.func @transform_2(%arg0: i32, %arg1: i32) -> (i32, i32) {
    %c0_i32 = arith.constant 0 : i32
    %c0_i32_0 = arith.constant 0 : i32
    %c0_i32_1 = arith.constant 0 : i32
    return %c0_i32, %c0_i32_0 : i32, i32
  }
  func.func @transform_3(%arg0: i32, %arg1: i32) -> (i32, i32) {
    %c0_i32 = arith.constant 0 : i32
    %c0_i32_0 = arith.constant 0 : i32
    return %arg1, %c0_i32 : i32, i32
  }
  func.func @transform_4(%arg0: i32, %arg1: i32) -> (i32, i32) {
    %c0_i32 = arith.constant 0 : i32
    %c0_i32_0 = arith.constant 0 : i32
    return %arg1, %c0_i32 : i32, i32
  }
  func.func @transform_5(%arg0: i32, %arg1: i32) -> (i32, i32) {
    %c0_i32 = arith.constant 0 : i32
    %c0_i32_0 = arith.constant 0 : i32
    return %arg1, %c0_i32 : i32, i32
  }
  func.func @transform_6(%arg0: i32, %arg1: i32) -> (i32, i32) {
    %c0_i32 = arith.constant 0 : i32
    %c0_i32_0 = arith.constant 0 : i32
    return %arg1, %c0_i32 : i32, i32
  }
  func.func @transform_7(%arg0: i32, %arg1: i32) -> (i32, i32, i32) {
    %c0_i32 = arith.constant 0 : i32
    %c0_i32_0 = arith.constant 0 : i32
    return %arg0, %arg1, %c0_i32 : i32, i32, i32
  }
  func.func @transform_8(%arg0: i32, %arg1: i32) -> (i32, i32, i32) {
    %c0_i32 = arith.constant 0 : i32
    %c0_i32_0 = arith.constant 0 : i32
    return %arg0, %arg1, %c0_i32 : i32, i32, i32
  }
  func.func @transform_9(%arg0: i32, %arg1: i32) -> (i32, i32, i32) {
    %c0_i32 = arith.constant 0 : i32
    %c0_i32_0 = arith.constant 0 : i32
    return %arg0, %arg1, %c0_i32 : i32, i32, i32
  }
}

</mosaic_0001>

<bundles_post_ra>
// kernel: tpu_custom_call.1
= control target key start
LH: loop header
LB: loop body
LE: loop exit
PB: predicated region body
PF: predicated region fallthrough
CT: control target
= control target key end

     0   :  { %s5344_s0 = inlined_call_operand.hbm [shape: f32[2,128,256], index: 0, kind: input, shape index: {}]   ;;  %s5345_s1 = inlined_call_operand.hbm [shape: f32[256,1280], index: 1, kind: input, shape index: {}]   ;;  %s5346_s2 = inlined_call_operand.hbm [shape: f32[1,1280], index: 2, kind: input, shape index: {}]   ;;  %s5347_s3 = inlined_call_operand.hbm [shape: f32[128,256], index: 3, kind: input, shape index: {}]   ;;  %s5348_s4 = inlined_call_operand.hbm [shape: f32[128,256], index: 4, kind: input, shape index: {}]   ;;  %s5349_s5 = inlined_call_operand.hbm [shape: f32[128,256], index: 5, kind: input, shape index: {}]   ;;  %s5350_s6 = inlined_call_operand.hbm [shape: f32[128,256], index: 6, kind: input, shape index: {}]   ;;  %s5351_s7 = inlined_call_operand.hbm [shape: f32[2,128,256], index: 7, kind: output, shape index: {0}]   ;;  %s5352_s8 = inlined_call_operand.hbm [shape: f32[2,128,256], index: 8, kind: output, shape index: {1}]   ;;  %s5353_s9 = inlined_call_operand.hbm [shape: f32[2,128,256], index: 9, kind: output, shape index: {2}]  }
   0x1   :  { %5391 = sst [smem:[#allocation67_spill]] %s5344_s0 }
   0x2   :  { %5392 = sst [smem:[#allocation68_spill]] %s5345_s1 }
   0x3   :  { %5393 = sst [smem:[#allocation69_spill]] %s5346_s2 }
   0x4   :  { %5394 = sst [smem:[#allocation70_spill]] %s5347_s3 }
   0x5   :  { %5395 = sst [smem:[#allocation71_spill]] %s5348_s4 }
   0x6   :  { %5396 = sst [smem:[#allocation72_spill]] %s5349_s5 }
   0x7   :  { %5397 = sst [smem:[#allocation73_spill]] %s5351_s7 }
   0x8   :  { %5398 = sst [smem:[#allocation74_spill]] %s5353_s9 }
   0x9   :  { %15 = vsyncpa [#allocation3], 0 }
   0xa   :  { %17 = vsyncpa [#allocation3 + $0x1], 0 }
   0xb   :  { %18 = vsyncpa [#allocation6], 0 }
   0xc   :  { %19 = vsyncpa [#allocation9], 0 }
   0xd   :  { %20 = vsyncpa [#allocation12], 0 }
   0xe   :  { %21 = vsyncpa [#allocation4], 0 }
   0xf   :  { %23 = vsyncpa [#allocation4 + $0x1], 0 }
  0x10   :  { %24 = vsyncpa [#allocation16], 0 }
  0x11   :  { %26 = vsyncpa [#allocation16 + $0x1], 0  ;;  %s3775_s30 = smov 0   ;;  %s3777_s10 = smov 0  }
  0x12   :  { %s3779_s11 = smov 0   ;;  %s3781_s12 = smov 0  }
  0x13   :  { %s3783_s13 = smov 0   ;;  %s3785_s14 = smov 0  }
  0x14 LB: > { %s3806_s15 = sadd.s32 4294967295, %s3707_s14   ;;  %p2755_p0 = scmp.ge.s32.totalorder %s3707_s14, 1  ;;  %s3707_s14 = sphi %s3785_s14, %s32_s14   ;;  %s3703_s13 = sphi %s3783_s13, %s5542_s13   ;;  %s3699_s12 = sphi %s3781_s12, %s5541_s12   ;;  %s3695_s11 = sphi %s3779_s11, %s5540_s11   ;;  %s3691_s10 = sphi %s3777_s10, %s5539_s10   ;;  %s3687_s30 = sphi %s3775_s30, %s5538_s30  }
  0x15   : > { %p5356_p1 = scmp.eq.s32.totalorder %s3806_s15, 0  ;;  %p307_p2 = scmp.lt.s32.totalorder %s3707_s14, 3 }
  0x16   : > { %s3709_s17 = smov [#allocation5]   ;;  %s3710_s20 = smov [#allocation8]  }
  0x17   : > { %p3811_p3 = pnand %p2755_p0, %p307_p2  ;;  %s319_s18 = sshll.u32 %s3709_s17, 4  ;;  %s3815_s18 = int_to_ptr.vmem [resolvable:$true] %s319_s18 }
  0x18   : > { %s347_s21 = sshll.u32 %s3710_s20, 4  ;;  %s5401_s1 = sld [smem:[#allocation68_spill]]  ;;  %s3826_s21 = int_to_ptr.vmem [resolvable:$true] %s347_s21 }
  0x19   : > { %s5399_s16 = scalar_select %p3811_p3, 1, 0 }
  0x1a   : > { %p3176_p4 = pneg %p3811_p3 }
  0x1c   : > { %p3822_p6 = pnand %p3176_p4, %p5356_p1 }
  0x1e   : > { %s3355_s24 = scalar_lea.hbm %s5401_s1, 40960  ;;  %p3836_p8 = pneg %p3822_p6 }
  0x1f   : > { %p3356_p7 = scmp.ne.s32.totalorder %s5401_s1, %s3355_s24  ;;  %p3362_p11 = scmp.lt.u32.totalorder %s3355_s24, %s5401_s1 }
  0x21   : > { %p3358_p9 = pnand %p3836_p8, %p3356_p7 }
  0x23   : > { %p3359_p10 = pneg %p3358_p9 }
  0x25   : > { %p3364_p12 = pnand %p3362_p11, %p3359_p10 }
  0x27   : > { %3367 = shalt.err (!%p3364_p12)
}
  0x28   : > { %s3368_s17 = scalar_lea.vmem %s3815_s18, 40960  ;;  %p3376_p4 = scmp.lt.s32.totalorder %s3815_s18, %s3815_s18 }
  0x29   : > { %p3369_p13 = scmp.ne.s32.totalorder %s3815_s18, %s3368_s17  ;;  %p3377_p5 = scmp.lt.s32.totalorder %s3368_s17, %s3368_s17 }
  0x2b   : > { %p3371_p0 = pnand %p3369_p13, %p3836_p8  ;;  %p3378_p7 = por %p3377_p5, %p3376_p4 }
  0x2d   : > { %p3372_p2 = pneg %p3371_p0 }
  0x2f   : > { %p3379_p9 = pnand %p3378_p7, %p3372_p2 }
  0x31   : > { %3382 = shalt.err (!%p3379_p9)
}
  0x32   : > { %s3711_s20 = smov 1280   ;;  %s3712_s22 = smov 80  }
  0x33   : > { %3179 = dma.hbm_to_vmem [thread:$0]  (!%p3822_p6), %s5401_s1, 40960, %s3815_s18, [#allocation6], %s3711_s20, %s3711_s20, %s3712_s22  }
  0x34   : > { %s5403_s3 = sld [smem:[#allocation70_spill]] }
  0x3a   : > { %s3383_s28 = scalar_lea.hbm %s5403_s3, 4096 }
  0x3b   : > { %p3384_p5 = scmp.ne.s32.totalorder %s5403_s3, %s3383_s28  ;;  %p3390_p12 = scmp.lt.u32.totalorder %s3383_s28, %s5403_s3 }
  0x3d   : > { %p3386_p10 = pnand %p3384_p5, %p3836_p8 }
  0x3f   : > { %p3387_p11 = pneg %p3386_p10 }
  0x41   : > { %p3392_p13 = pnand %p3390_p12, %p3387_p11 }
  0x43   : > { %3395 = shalt.err (!%p3392_p13)
}
  0x44   : > { %s3396_s18 = scalar_lea.vmem %s3826_s21, 4096  ;;  %p3404_p7 = scmp.lt.s32.totalorder %s3826_s21, %s3826_s21 }
  0x45   : > { %p3397_p0 = scmp.ne.s32.totalorder %s3826_s21, %s3396_s18  ;;  %p3405_p9 = scmp.lt.s32.totalorder %s3396_s18, %s3396_s18 }
  0x47   : > { %p3399_p2 = pnand %p3397_p0, %p3836_p8  ;;  %p3406_p5 = por %p3405_p9, %p3404_p7 }
  0x49   : > { %p3400_p4 = pneg %p3399_p2 }
  0x4b   : > { %p3407_p10 = pnand %p3406_p5, %p3400_p4 }
  0x4d   : > { %3410 = shalt.err (!%p3407_p10)
}
  0x4e   : > { %s5359_s7 = smov 256   ;;  %s5360_s9 = smov 16  }
  0x4f   : > { %3185 = dma.hbm_to_vmem [thread:$0]  (!%p3822_p6), %s5403_s3, 4096, %s3826_s21, [#allocation9], %s5359_s7, %s5359_s7, %s5360_s9  }
  0x50   : > { %s3715_s23 = smov [#allocation11]   ;;  %s3716_s25 = smov [#allocation7]  }
  0x51   : > { %s381_s24 = sshll.u32 %s3715_s23, 4  ;;  %s333_s26 = sshll.u32 %s3716_s25, 4  ;;  %s382_s24 = int_to_ptr.vmem [resolvable:$true] %s381_s24  ;;  %s3883_s26 = int_to_ptr.vmem [resolvable:$true] %s333_s26 }
  0x52   : > { %s5404_s5 = sld [smem:[#allocation72_spill]] }
  0x58   : > { %s3411_s17 = scalar_lea.hbm %s5404_s5, 4096 }
  0x59   : > { %p3412_p11 = scmp.ne.s32.totalorder %s5404_s5, %s3411_s17  ;;  %p3418_p0 = scmp.lt.u32.totalorder %s3411_s17, %s5404_s5 }
  0x5b   : > { %p3414_p12 = pnand %p3412_p11, %p3836_p8 }
  0x5d   : > { %p3415_p13 = pneg %p3414_p12 }
  0x5f   : > { %p3420_p2 = pnand %p3418_p0, %p3415_p13 }
  0x61   : > { %3423 = shalt.err (!%p3420_p2)
}
  0x62   : > { %s3424_s22 = scalar_lea.vmem %s382_s24, 4096  ;;  %p3432_p5 = scmp.lt.s32.totalorder %s382_s24, %s382_s24 }
  0x63   : > { %p3425_p4 = scmp.ne.s32.totalorder %s382_s24, %s3424_s22  ;;  %p3433_p10 = scmp.lt.s32.totalorder %s3424_s22, %s3424_s22 }
  0x65   : > { %p3427_p7 = pnand %p3425_p4, %p3836_p8  ;;  %p3434_p1 = por %p3433_p10, %p3432_p5 }
  0x67   : > { %p3428_p9 = pneg %p3427_p7 }
  0x69   : > { %p3435_p3 = pnand %p3434_p1, %p3428_p9 }
  0x6b   : > { %3438 = shalt.err (!%p3435_p3)
}
  0x6c   : > { %3191 = dma.hbm_to_vmem [thread:$0]  (!%p3822_p6), %s5404_s5, 4096, %s382_s24, [#allocation12], %s5359_s7, %s5359_s7, %s5360_s9  }
  0x6d   : > { %s5405_s2 = sld [smem:[#allocation69_spill]] }
  0x73   : > { %s3439_s29 = scalar_lea.hbm %s5405_s2, 160 }
  0x74   : > { %p3440_p11 = scmp.ne.s32.totalorder %s5405_s2, %s3439_s29  ;;  %p3446_p12 = scmp.lt.u32.totalorder %s3439_s29, %s5405_s2 }
  0x76   : > { %p3442_p1 = pnand %p3440_p11, %p3836_p8 }
  0x78   : > { %p3443_p3 = pneg %p3442_p1 }
  0x7a   : > { %p3448_p13 = pnand %p3446_p12, %p3443_p3 }
  0x7c   : > { %3451 = shalt.err (!%p3448_p13)
}
  0x7d   : > { %s3452_s24 = scalar_lea.vmem %s3883_s26, 160  ;;  %p3460_p7 = scmp.lt.s32.totalorder %s3883_s26, %s3883_s26 }
  0x7e   : > { %p3453_p0 = scmp.ne.s32.totalorder %s3883_s26, %s3452_s24  ;;  %p3461_p9 = scmp.lt.s32.totalorder %s3452_s24, %s3452_s24 }
  0x80   : > { %p3455_p2 = pnand %p3453_p0, %p3836_p8  ;;  %p3462_p5 = por %p3461_p9, %p3460_p7 }
  0x82   : > { %p3456_p4 = pneg %p3455_p2 }
  0x84   : > { %p3463_p10 = pnand %p3462_p5, %p3456_p4 }
  0x86   : > { %3466 = shalt.err (!%p3463_p10)
}
  0x87   : > { %3182 = dma.hbm_to_vmem [thread:$0]  (!%p3822_p6), %s5405_s2, 160, %s3883_s26, [#allocation6]  }
  0x88   : > { %s3717_s23 = smov [#allocation10]   ;;  %s3718_s28 = smov [#allocation13]  }
  0x89   : > { %s364_s25 = sshll.u32 %s3717_s23, 4  ;;  %s398_s29 = sshll.u32 %s3718_s28, 4  ;;  %s365_s25 = int_to_ptr.vmem [resolvable:$true] %s364_s25  ;;  %s3929_s29 = int_to_ptr.vmem [resolvable:$true] %s398_s29 }
  0x8a   : > { %s5406_s4 = sld [smem:[#allocation71_spill]] }
  0x90   : > { %s3467_s20 = scalar_lea.hbm %s5406_s4, 4096 }
  0x91   : > { %p3468_p11 = scmp.ne.s32.totalorder %s5406_s4, %s3467_s20  ;;  %p3474_p12 = scmp.lt.u32.totalorder %s3467_s20, %s5406_s4 }
  0x93   : > { %p3470_p1 = pnand %p3468_p11, %p3836_p8 }
  0x95   : > { %p3471_p3 = pneg %p3470_p1 }
  0x97   : > { %p3476_p13 = pnand %p3474_p12, %p3471_p3 }
  0x99   : > { %3479 = shalt.err (!%p3476_p13)
}
  0x9a   : > { %s3480_s1 = scalar_lea.vmem %s365_s25, 4096  ;;  %p3488_p7 = scmp.lt.s32.totalorder %s365_s25, %s365_s25 }
  0x9b   : > { %p3481_p0 = scmp.ne.s32.totalorder %s365_s25, %s3480_s1  ;;  %p3489_p9 = scmp.lt.s32.totalorder %s3480_s1, %s3480_s1 }
  0x9d   : > { %p3483_p2 = pnand %p3481_p0, %p3836_p8  ;;  %p3490_p5 = por %p3489_p9, %p3488_p7 }
  0x9f   : > { %p3484_p4 = pneg %p3483_p2 }
  0xa1   : > { %p3491_p10 = pnand %p3490_p5, %p3484_p4 }
  0xa3   : > { %3494 = shalt.err (!%p3491_p10)
}
  0xa4   : > { %3188 = dma.hbm_to_vmem [thread:$0]  (!%p3822_p6), %s5406_s4, 4096, %s365_s25, [#allocation9], %s5359_s7, %s5359_s7, %s5360_s9  }
  0xa5   : > { %s3495_s20 = scalar_lea.hbm %s5350_s6, 4096 }
  0xa6   : > { %p3496_p11 = scmp.ne.s32.totalorder %s5350_s6, %s3495_s20  ;;  %p3502_p12 = scmp.lt.u32.totalorder %s3495_s20, %s5350_s6 }
  0xa8   : > { %p3498_p1 = pnand %p3496_p11, %p3836_p8 }
  0xaa   : > { %p3499_p3 = pneg %p3498_p1 }
  0xac   : > { %p3504_p13 = pnand %p3502_p12, %p3499_p3 }
  0xae   : > { %3507 = shalt.err (!%p3504_p13)
}
  0xaf   : > { %s3508_s25 = scalar_lea.vmem %s3929_s29, 4096  ;;  %p3516_p7 = scmp.lt.s32.totalorder %s3929_s29, %s3929_s29 }
  0xb0   : > { %p3509_p0 = scmp.ne.s32.totalorder %s3929_s29, %s3508_s25  ;;  %p3517_p9 = scmp.lt.s32.totalorder %s3508_s25, %s3508_s25 }
  0xb2   : > { %p3511_p2 = pnand %p3509_p0, %p3836_p8  ;;  %p3518_p5 = por %p3517_p9, %p3516_p7 }
  0xb4   : > { %p3512_p4 = pneg %p3511_p2 }
  0xb6   : > { %p3519_p10 = pnand %p3518_p5, %p3512_p4 }
  0xb8   : > { %3522 = shalt.err (!%p3519_p10)
}
  0xb9   : > { %3194 = dma.hbm_to_vmem [thread:$0]  (!%p3822_p6), %s5350_s6, 4096, %s3929_s29, [#allocation12], %s5359_s7, %s5359_s7, %s5360_s9  }
  0xba   : > { %s5358_s19 = sadd.s32 4294967294, %s3707_s14   ;;  %s44_s27 = sadd.s32 1, %s3703_s13 }
  0xbb   : > { %p46_p8 = scmp.ge.s32.totalorder %s44_s27, 2  ;;  %s53_s28 = sadd.s32 1, %s3695_s11 }
  0xbc   : > { %p60_p11 = scmp.ne.s32.totalorder %s3695_s11, %s3691_s10  ;;  %p61_p1 = scmp.eq.s32.totalorder %s3707_s14, 0 }
  0xbd   : > { %s5544_s27 = smov (%p46_p8, %s44_s27), 0  ;;  %p66_p12 = scmp.ne.s32.totalorder %s3691_s10, %s3687_s30 }
  0xbe   : > { %p3986_p3 = por %p61_p1, %p60_p11  ;;  %s48_s29 = ssub.s32 %s3703_s13, %s5544_s27 }
  0xbf   : > { %p238_p6 = scmp.eq.s32.totalorder %s3806_s15, 1  ;;  %p51_p13 = scmp.eq.s32.totalorder %s48_s29, 0 }
  0xc0   : > { %p5408_p0 = scmp.eq.s32.totalorder %s3806_s15, 0  ;;  %p244_p7 = scmp.eq.s32.totalorder %s5358_s19, 1 }
  0xc1   : > { %p4001_p4 = por %p238_p6, %p60_p11  ;;  %p3215_p5 = scmp.lt.s32.totalorder %s3707_s14, 2 }
  0xc2   : > { %p3997_p2 = por %p5408_p0, %p66_p12  ;;  %p4010_p9 = por %p244_p7, %p66_p12 }
  0xc3   : > { %s5410_s20 = scalar_select %p4001_p4, 1, 0 }
  0xc4   : > { %s4008_s21 = scalar_select %p51_p13, %s3695_s11, %s53_s28  }
  0xc5   : > { %s5411_s24 = scalar_select %p4010_p9, 1, 0 }
  0xc6   : > { %s412_s22 = sand.u32 1, %s3695_s11   ;;  %s2788_s26 = sshll.u32 %s3703_s13, 12 }
  0xc7   : > { %s2763_s25 = sshll.u32 %s412_s22, 8  ;;  %s5412_s0 = sld [smem:[#allocation67_spill]] }
  0xc8   : > { %s416_s19 = scalar_lea.vmem [#allocation2], %s2763_s25  ;;  %p4024_p10 = pnand %p3215_p5, %p3986_p3 }
  0xc9   : > { %s426_s28 = sshll.u32 %s416_s19, 4  ;;  %s4030_s9 = scalar_lea.sflag [#allocation3], %s412_s22  ;;  %s4028_s28 = int_to_ptr.vmem [resolvable:$true] %s426_s28 }
  0xca   : > { %p3525_p11 = pneg %p4024_p10 }
  0xcd   : > { %s4020_s29 = scalar_lea.hbm %s5412_s0, %s2788_s26  ;;  %s3528_s26 = scalar_lea.hbm %s5412_s0, 8192 }
  0xce   : > { %s3523_s1 = scalar_lea.hbm %s4020_s29, 4096  ;;  %p3529_p3 = scmp.lt.u32.totalorder %s4020_s29, %s5412_s0 }
  0xcf   : > { %p3524_p8 = scmp.ne.s32.totalorder %s4020_s29, %s3523_s1  ;;  %p3530_p6 = scmp.lt.u32.totalorder %s3528_s26, %s3523_s1 }
  0xd0   : > { %p3532_p0 = scmp.lt.u32.totalorder %s3523_s1, %s4020_s29 }
  0xd1   : > { %p3526_p1 = pnand %p3525_p11, %p3524_p8  ;;  %p3531_p13 = por %p3530_p6, %p3529_p3 }
  0xd3   : > { %p3527_p12 = pneg %p3526_p1  ;;  %p3533_p7 = por %p3532_p0, %p3531_p13 }
  0xd5   : > { %p3534_p5 = pnand %p3533_p7, %p3527_p12 }
  0xd7   : > { %3537 = shalt.err (!%p3534_p5)
}
  0xd8   : > { %s3538_s22 = scalar_lea.vmem %s4028_s28, 4096  ;;  %s3719_s19 = smov [#allocation2]  }
  0xd9   : > { %p3539_p8 = scmp.ne.s32.totalorder %s4028_s28, %s3538_s22  ;;  %s3543_s17 = sshll.u32 %s3719_s19, 4  ;;  %s3544_s17 = int_to_ptr.vmem [resolvable:$false] %s3543_s17 }
  0xda   : > { %s3545_s25 = scalar_lea.vmem %s3544_s17, 8192  ;;  %p3546_p4 = scmp.lt.s32.totalorder %s4028_s28, %s3544_s17 }
  0xdb   : > { %p3541_p1 = pnand %p3539_p8, %p3525_p11  ;;  %p3547_p3 = scmp.lt.s32.totalorder %s3545_s25, %s3538_s22 }
  0xdd   : > { %p3542_p9 = pneg %p3541_p1  ;;  %p3548_p6 = por %p3547_p3, %p3546_p4 }
  0xdf   : > { %p3549_p13 = pnand %p3548_p6, %p3542_p9 }
  0xe1   : > { %3552 = shalt.err (!%p3549_p13)
}
  0xe2   : > { %s5414_s1 = smov 16   ;;  %s5415_s26 = smov 256  }
  0xe3   : > { %3198 = dma.hbm_to_vmem [thread:$0]  (!%p4024_p10), %s4020_s29, 4096, %s4028_s28, %s4030_s9, %s5415_s26, %s5415_s26, %s5414_s1  }
  0xe4   : > { %p5416_p11 = scmp.ne.s32.totalorder %s5399_s16, 0 }
  0xe6   : > { %438 = sbr.rel (%p5416_p11) target bundleno = 824 (0x338), region = 48 }
  0xed   : > { %s4064_s23 = sand.u32 1, %s3691_s10  }
  0xee   : > { %s4067_s22 = sshll.u32 %s4064_s23, 8  ;;  %s441_s7 = scalar_lea.sflag [#allocation3], %s4064_s23 }
  0xef   : > { %s4071_s19 = scalar_lea.vmem [#allocation2], %s4067_s22 }
  0xf0   : > { %3662 = dma.done.wait (%p3997_p2), %s441_s7, 4096  }
  0xf1   : > { %3664 = vsyncadd (%p3997_p2), %s441_s7, 4294963200  ;;  %p5417_p4 = scmp.eq.s32.totalorder %s3806_s15, 0 }
  0xf3   : > { %3666 = dma.done.wait (%p5417_p4), [#allocation6], 41120   ;;  %p5418_p9 = pmov %p5417_p4 }
  0xf4   : > { %p5419_p10 = pmov %p5417_p4 }
  0xf5   : > { %3668 = vsyncadd (%p5418_p9), [#allocation6], 4294926176 }
  0xf6   : > { %3670 = dma.done.wait (%p5419_p10), [#allocation9], 8192   ;;  %p5420_p12 = pmov %p5417_p4 }
  0xf7   : > { %p5421_p0 = pmov %p5417_p4 }
  0xf8   : > { %3672 = vsyncadd (%p5420_p12), [#allocation9], 4294959104 }
  0xf9   : > { %3674 = dma.done.wait (%p5421_p0), [#allocation12], 8192   ;;  %p5422_p7 = pmov %p5421_p0 }
  0xfa   : > { %v554_v0 = vld [vmem:[#allocation5 + $0x8] sm:$0xff]  ;;  %v564_v1 = vld [vmem:[#allocation5 + $0x58] sm:$0xff]  ;;  %v553_v5 = vld [vmem:[#allocation5] sm:$0xff]  ;;  %s4710_s16 = scalar_lea.vmem [#allocation17], %s4067_s22  ;;  %s5081_s9 = scalar_lea.vmem [#allocation15], %s4067_s22 }
  0xfb   : > { %3676 = vsyncadd (%p5422_p7), [#allocation12], 4294959104  ;;  %v556_v2 = vld [vmem:[#allocation5 + $0x18] sm:$0xff]  ;;  %v2792_v3 = vpack.c.bf16 %v564_v1, %v554_v0  ;;  %v566_v4 = vld [vmem:[#allocation5 + $0x68] sm:$0xff]  ;;  %s5090_s18 = scalar_lea.vmem [#allocation14], %s4067_s22  ;;  %s2789_s28 = sshll.u32 %s3699_s12, 12 }
  0xfc   : > { %v563_v6 = vld [vmem:[#allocation5 + $0x50] sm:$0xff]  ;;  %v2856_v7 = vpack.c.bf16 %v566_v4, %v556_v2  ;;  %v565_v10 = vld [vmem:[#allocation5 + $0x60] sm:$0xff]  ;;  %v574_v11 = vld [vmem:[#allocation5 + $0xa8] sm:$0xff]  ;;  %s2515_s17 = sshll.u32 %s5081_s9, 4  ;;  %s2534_s25 = sshll.u32 %s4710_s16, 4  ;;  %s5212_s17 = int_to_ptr.vmem [resolvable:$true] %s2515_s17  ;;  %s5221_s25 = int_to_ptr.vmem [resolvable:$true] %s2534_s25 }
  0xfd   : > { %v2794_v8 = vpack.c.bf16 %v563_v6, %v553_v5  ;;  %v555_v9 = vld [vmem:[#allocation5 + $0x10] sm:$0xff]  ;;  %2793 = vmatprep.subr.bf16.mxu0 %v2792_v3  ;;  %v584_v13 = vld [vmem:[#allocation5 + $0xf8] sm:$0xff]  ;;  %v586_v15 = vld [vmem:[#allocation5 + $0x108] sm:$0xff]  ;;  %s5207_s22 = scalar_lea.hbm %s5352_s8, %s2789_s28  ;;  %s2496_s12 = sshll.u32 %s5090_s18, 4  ;;  %s5230_s12 = int_to_ptr.vmem [resolvable:$true] %s2496_s12 }
  0xfe   : > { %v2858_v12 = vpack.c.bf16 %v565_v10, %v555_v9  ;;  %v576_v14 = vld [vmem:[#allocation5 + $0xb8] sm:$0xff]  ;;  %2857 = vmatprep.subr.bf16.mxu1 %v2856_v7  ;;  %v2796_v16 = vpack.c.bf16 %v584_v13, %v574_v11  ;;  %v573_v18 = vld [vmem:[#allocation5 + $0xa0] sm:$0xff]  ;;  %v583_v19 = vld [vmem:[#allocation5 + $0xf0] sm:$0xff]  ;;  %s5530_s0 = sld [smem:[#allocation73_spill]]  ;;  %s5531_s7 = sand.u32 1, %s3806_s15  }
  0xff   : > { %2795 = vmatpush1.bf16.msra.mxu0 %v2794_v8  ;;  %v2860_v17 = vpack.c.bf16 %v586_v15, %v576_v14  ;;  %v575_v20 = vld [vmem:[#allocation5 + $0xb0] sm:$0xff]  ;;  %v2798_v21 = vpack.c.bf16 %v583_v19, %v573_v18  ;;  %v585_v22 = vld [vmem:[#allocation5 + $0x100] sm:$0xff]  ;;  %v594_v23 = vld [vmem:[#allocation5 + $0x148] sm:$0xff]  ;;  %s3553_s3 = scalar_lea.vmem %s5212_s17, 4096  ;;  %p5532_p5 = scmp.ne.s32.totalorder %s5410_s20, 0 }
 0x100   : > { %2859 = vmatpush1.bf16.msra.mxu1 %v2858_v12  ;;  %v604_v24 = vld [vmem:[#allocation5 + $0x198] sm:$0xff]  ;;  %2797 = vmatprep.subr.bf16.mxu0 %v2796_v16  ;;  %v2862_v25 = vpack.c.bf16 %v585_v22, %v575_v20  ;;  %v606_v28 = vld [vmem:[#allocation5 + $0x1a8] sm:$0xff]  ;;  %v593_v29 = vld [vmem:[#allocation5 + $0x140] sm:$0xff]  ;;  %p3554_p2 = scmp.ne.s32.totalorder %s5212_s17, %s3553_s3  ;;  %s3720_s4 = smov [#allocation15]  }
 0x101   : > { %2861 = vmatprep.subr.bf16.mxu1 %v2860_v17  ;;  %v2800_v26 = vpack.c.bf16 %v604_v24, %v594_v23  ;;  %v596_v27 = vld [vmem:[#allocation5 + $0x158] sm:$0xff]  ;;  %v603_v31 = vld [vmem:[#allocation5 + $0x190] sm:$0xff]  ;;  %v605_v33 = vld [vmem:[#allocation5 + $0x1a0] sm:$0xff] }
 0x102   : > { %v2864_v30 = vpack.c.bf16 %v606_v28, %v596_v27  ;;  %v595_v32 = vld [vmem:[#allocation5 + $0x150] sm:$0xff]  ;;  %v2802_v34 = vpack.c.bf16 %v603_v31, %v593_v29  ;;  %v614_v35 = vld [vmem:[#allocation5 + $0x1e8] sm:$0xff]  ;;  %v624_v36 = vld [vmem:[#allocation5 + $0x238] sm:$0xff]  ;;  %p3555_p8 = pnand %p3554_p2, %p5532_p5 }
 0x103   : > { %2799 = vmatpush1.bf16.msra.mxu0 %v2798_v21  ;;  %v616_v37 = vld [vmem:[#allocation5 + $0x1f8] sm:$0xff]  ;;  %v2866_v38 = vpack.c.bf16 %v605_v33, %v595_v32  ;;  %v2804_v39 = vpack.c.bf16 %v624_v36, %v614_v35  ;;  %v626_v40 = vld [vmem:[#allocation5 + $0x248] sm:$0xff]  ;;  %v613_v41 = vld [vmem:[#allocation5 + $0x1e0] sm:$0xff] }
 0x104   : > { %2863 = vmatpush1.bf16.msra.mxu1 %v2862_v25  ;;  %2801 = vmatprep.subr.bf16.mxu0 %v2800_v26  ;;  %v623_v42 = vld [vmem:[#allocation5 + $0x230] sm:$0xff]  ;;  %v2868_v43 = vpack.c.bf16 %v626_v40, %v616_v37  ;;  %v625_v45 = vld [vmem:[#allocation5 + $0x240] sm:$0xff]  ;;  %v634_v46 = vld [vmem:[#allocation5 + $0x288] sm:$0xff]  ;;  %s5228_s2 = scalar_lea.hbm %s5530_s0, %s2789_s28  ;;  %p3556_p1 = pneg %p3555_p8 }
 0x105   : > { %2865 = vmatprep.subr.bf16.mxu1 %v2864_v30  ;;  %v615_v44 = vld [vmem:[#allocation5 + $0x1f0] sm:$0xff]  ;;  %v644_v47 = vld [vmem:[#allocation5 + $0x2d8] sm:$0xff]  ;;  %v646_v49 = vld [vmem:[#allocation5 + $0x2e8] sm:$0xff]  ;;  %v2806_v50 = vpack.c.bf16 %v623_v42, %v613_v41 }
 0x106   : > { %v636_v48 = vld [vmem:[#allocation5 + $0x298] sm:$0xff]  ;;  %v2870_v51 = vpack.c.bf16 %v625_v45, %v615_v44  ;;  %v2808_v52 = vpack.c.bf16 %v644_v47, %v634_v46  ;;  %v633_v53 = vld [vmem:[#allocation5 + $0x280] sm:$0xff]  ;;  %v643_v54 = vld [vmem:[#allocation5 + $0x2d0] sm:$0xff] }
 0x107   : > { %2803 = vmatpush1.bf16.msra.mxu0 %v2802_v34  ;;  %v635_v55 = vld [vmem:[#allocation5 + $0x290] sm:$0xff]  ;;  %v2872_v56 = vpack.c.bf16 %v646_v49, %v636_v48  ;;  %v645_v57 = vld [vmem:[#allocation5 + $0x2e0] sm:$0xff]  ;;  %v654_v58 = vld [vmem:[#allocation5 + $0x328] sm:$0xff]  ;;  %v2810_v62 = vpack.c.bf16 %v643_v54, %v633_v53 }
 0x108   : > { %2867 = vmatpush1.bf16.msra.mxu1 %v2866_v38  ;;  %2805 = vmatprep.subr.bf16.mxu0 %v2804_v39  ;;  %v664_v59 = vld [vmem:[#allocation5 + $0x378] sm:$0xff]  ;;  %v666_v61 = vld [vmem:[#allocation5 + $0x388] sm:$0xff]  ;;  %v2874_v63 = vpack.c.bf16 %v645_v57, %v635_v55  ;;  %v653_v1 = vld [vmem:[#allocation5 + $0x320] sm:$0xff] }
 0x109   : > { %2869 = vmatprep.subr.bf16.mxu1 %v2868_v43  ;;  %v656_v60 = vld [vmem:[#allocation5 + $0x338] sm:$0xff]  ;;  %v2812_v0 = vpack.c.bf16 %v664_v59, %v654_v58  ;;  %v663_v2 = vld [vmem:[#allocation5 + $0x370] sm:$0xff]  ;;  %v665_v5 = vld [vmem:[#allocation5 + $0x380] sm:$0xff] }
 0x10a   : > { %v655_v3 = vld [vmem:[#allocation5 + $0x330] sm:$0xff]  ;;  %v2876_v4 = vpack.c.bf16 %v666_v61, %v656_v60  ;;  %v674_v6 = vld [vmem:[#allocation5 + $0x3c8] sm:$0xff]  ;;  %v684_v7 = vld [vmem:[#allocation5 + $0x418] sm:$0xff]  ;;  %v2814_v10 = vpack.c.bf16 %v663_v2, %v653_v1 }
 0x10b   : > { %2807 = vmatpush1.bf16.msra.mxu0 %v2806_v50  ;;  %v676_v8 = vld [vmem:[#allocation5 + $0x3d8] sm:$0xff]  ;;  %v686_v9 = vld [vmem:[#allocation5 + $0x428] sm:$0xff]  ;;  %v2878_v11 = vpack.c.bf16 %v665_v5, %v655_v3  ;;  %v2816_v12 = vpack.c.bf16 %v684_v7, %v674_v6  ;;  %v673_v13 = vld [vmem:[#allocation5 + $0x3c0] sm:$0xff] }
 0x10c   : > { %2871 = vmatpush1.bf16.msra.mxu1 %v2870_v51  ;;  %2809 = vmatprep.subr.bf16.mxu0 %v2808_v52  ;;  %v683_v14 = vld [vmem:[#allocation5 + $0x410] sm:$0xff]  ;;  %v2880_v16 = vpack.c.bf16 %v686_v9, %v676_v8  ;;  %v685_v17 = vld [vmem:[#allocation5 + $0x420] sm:$0xff]  ;;  %v694_v18 = vld [vmem:[#allocation5 + $0x468] sm:$0xff] }
 0x10d   : > { %2873 = vmatprep.subr.bf16.mxu1 %v2872_v56  ;;  %v675_v15 = vld [vmem:[#allocation5 + $0x3d0] sm:$0xff]  ;;  %v704_v19 = vld [vmem:[#allocation5 + $0x4b8] sm:$0xff]  ;;  %v706_v21 = vld [vmem:[#allocation5 + $0x4c8] sm:$0xff]  ;;  %v2818_v22 = vpack.c.bf16 %v683_v14, %v673_v13 }
 0x10e   : > { %v696_v20 = vld [vmem:[#allocation5 + $0x478] sm:$0xff]  ;;  %v2882_v23 = vpack.c.bf16 %v685_v17, %v675_v15  ;;  %v2820_v24 = vpack.c.bf16 %v704_v19, %v694_v18  ;;  %v693_v25 = vld [vmem:[#allocation5 + $0x460] sm:$0xff]  ;;  %v703_v26 = vld [vmem:[#allocation5 + $0x4b0] sm:$0xff] }
 0x10f   : > { %2811 = vmatpush1.bf16.msra.mxu0 %v2810_v62  ;;  %v695_v27 = vld [vmem:[#allocation5 + $0x470] sm:$0xff]  ;;  %v2884_v28 = vpack.c.bf16 %v706_v21, %v696_v20  ;;  %v705_v29 = vld [vmem:[#allocation5 + $0x4c0] sm:$0xff]  ;;  %v714_v30 = vld [vmem:[#allocation5 + $0x508] sm:$0xff]  ;;  %v2822_v34 = vpack.c.bf16 %v703_v26, %v693_v25 }
 0x110   : > { %2875 = vmatpush1.bf16.msra.mxu1 %v2874_v63  ;;  %2813 = vmatprep.subr.bf16.mxu0 %v2812_v0  ;;  %v724_v31 = vld [vmem:[#allocation5 + $0x558] sm:$0xff]  ;;  %v726_v33 = vld [vmem:[#allocation5 + $0x568] sm:$0xff]  ;;  %v2886_v35 = vpack.c.bf16 %v705_v29, %v695_v27  ;;  %v713_v37 = vld [vmem:[#allocation5 + $0x500] sm:$0xff] }
 0x111   : > { %2877 = vmatprep.subr.bf16.mxu1 %v2876_v4  ;;  %v716_v32 = vld [vmem:[#allocation5 + $0x518] sm:$0xff]  ;;  %v2824_v36 = vpack.c.bf16 %v724_v31, %v714_v30  ;;  %v723_v38 = vld [vmem:[#allocation5 + $0x550] sm:$0xff]  ;;  %v725_v41 = vld [vmem:[#allocation5 + $0x560] sm:$0xff] }
 0x112   : > { %v715_v39 = vld [vmem:[#allocation5 + $0x510] sm:$0xff]  ;;  %v2888_v40 = vpack.c.bf16 %v726_v33, %v716_v32  ;;  %v734_v42 = vld [vmem:[#allocation5 + $0x5a8] sm:$0xff]  ;;  %v744_v43 = vld [vmem:[#allocation5 + $0x5f8] sm:$0xff]  ;;  %v2826_v46 = vpack.c.bf16 %v723_v38, %v713_v37 }
 0x113   : > { %2815 = vmatpush1.bf16.msra.mxu0 %v2814_v10  ;;  %v736_v44 = vld [vmem:[#allocation5 + $0x5b8] sm:$0xff]  ;;  %v746_v45 = vld [vmem:[#allocation5 + $0x608] sm:$0xff]  ;;  %v2890_v47 = vpack.c.bf16 %v725_v41, %v715_v39  ;;  %v2828_v48 = vpack.c.bf16 %v744_v43, %v734_v42  ;;  %v733_v49 = vld [vmem:[#allocation5 + $0x5a0] sm:$0xff] }
 0x114   : > { %2879 = vmatpush1.bf16.msra.mxu1 %v2878_v11  ;;  %2817 = vmatprep.subr.bf16.mxu0 %v2816_v12  ;;  %v743_v50 = vld [vmem:[#allocation5 + $0x5f0] sm:$0xff]  ;;  %v2892_v52 = vpack.c.bf16 %v746_v45, %v736_v44  ;;  %v745_v53 = vld [vmem:[#allocation5 + $0x600] sm:$0xff]  ;;  %v754_v54 = vld [vmem:[#allocation5 + $0x648] sm:$0xff] }
 0x115   : > { %2881 = vmatprep.subr.bf16.mxu1 %v2880_v16  ;;  %v735_v51 = vld [vmem:[#allocation5 + $0x5b0] sm:$0xff]  ;;  %v764_v55 = vld [vmem:[#allocation5 + $0x698] sm:$0xff]  ;;  %v766_v57 = vld [vmem:[#allocation5 + $0x6a8] sm:$0xff]  ;;  %v2830_v58 = vpack.c.bf16 %v743_v50, %v733_v49 }
 0x116   : > { %v756_v56 = vld [vmem:[#allocation5 + $0x658] sm:$0xff]  ;;  %v2894_v59 = vpack.c.bf16 %v745_v53, %v735_v51  ;;  %v2832_v60 = vpack.c.bf16 %v764_v55, %v754_v54  ;;  %v753_v61 = vld [vmem:[#allocation5 + $0x640] sm:$0xff]  ;;  %v763_v62 = vld [vmem:[#allocation5 + $0x690] sm:$0xff] }
 0x117   : > { %2819 = vmatpush1.bf16.msra.mxu0 %v2818_v22  ;;  %v755_v63 = vld [vmem:[#allocation5 + $0x650] sm:$0xff]  ;;  %v2896_v0 = vpack.c.bf16 %v766_v57, %v756_v56  ;;  %v765_v1 = vld [vmem:[#allocation5 + $0x6a0] sm:$0xff]  ;;  %v774_v2 = vld [vmem:[#allocation5 + $0x6e8] sm:$0xff]  ;;  %v2834_v6 = vpack.c.bf16 %v763_v62, %v753_v61 }
 0x118   : > { %2883 = vmatpush1.bf16.msra.mxu1 %v2882_v23  ;;  %2821 = vmatprep.subr.bf16.mxu0 %v2820_v24  ;;  %v784_v3 = vld [vmem:[#allocation5 + $0x738] sm:$0xff]  ;;  %v786_v5 = vld [vmem:[#allocation5 + $0x748] sm:$0xff]  ;;  %v773_v7 = vld [vmem:[#allocation5 + $0x6e0] sm:$0xff]  ;;  %v2898_v8 = vpack.c.bf16 %v765_v1, %v755_v63 }
 0x119   : > { %2885 = vmatprep.subr.bf16.mxu1 %v2884_v28  ;;  %v776_v4 = vld [vmem:[#allocation5 + $0x6f8] sm:$0xff]  ;;  %v2836_v9 = vpack.c.bf16 %v784_v3, %v774_v2  ;;  %v783_v10 = vld [vmem:[#allocation5 + $0x730] sm:$0xff]  ;;  %v785_v12 = vld [vmem:[#allocation5 + $0x740] sm:$0xff] }
 0x11a   : > { %v775_v11 = vld [vmem:[#allocation5 + $0x6f0] sm:$0xff]  ;;  %v2900_v13 = vpack.c.bf16 %v786_v5, %v776_v4  ;;  %v794_v14 = vld [vmem:[#allocation5 + $0x788] sm:$0xff]  ;;  %v804_v15 = vld [vmem:[#allocation5 + $0x7d8] sm:$0xff]  ;;  %v2838_v19 = vpack.c.bf16 %v783_v10, %v773_v7 }
 0x11b   : > { %2823 = vmatpush1.bf16.msra.mxu0 %v2822_v34  ;;  %v4090_v16 = vld [vmem:[%s4071_s19 + $0x8] sm:$0xff]  ;;  %v796_v17 = vld [vmem:[#allocation5 + $0x798] sm:$0xff]  ;;  %v2902_v20 = vpack.c.bf16 %v785_v12, %v775_v11  ;;  %v2840_v21 = vpack.c.bf16 %v804_v15, %v794_v14  ;;  %v793_v22 = vld [vmem:[#allocation5 + $0x780] sm:$0xff] }
 0x11c   : > { %2887 = vmatpush1.bf16.msra.mxu1 %v2886_v35  ;;  %2825 = vmatprep.subr.bf16.mxu0 %v2824_v36  ;;  %v806_v18 = vld [vmem:[#allocation5 + $0x7e8] sm:$0xff]  ;;  %v803_v23 = vld [vmem:[#allocation5 + $0x7d0] sm:$0xff]  ;;  %v805_v26 = vld [vmem:[#allocation5 + $0x7e0] sm:$0xff] }
 0x11d   : > { %2889 = vmatprep.subr.bf16.mxu1 %v2888_v40  ;;  %991 = vmatprep.mubr.f32.mxu0 %v4090_v16  ;;  %v795_v24 = vld [vmem:[#allocation5 + $0x790] sm:$0xff]  ;;  %v2904_v25 = vpack.c.bf16 %v806_v18, %v796_v17  ;;  %v814_v27 = vld [vmem:[#allocation5 + $0x828] sm:$0xff]  ;;  %v824_v28 = vld [vmem:[#allocation5 + $0x878] sm:$0xff]  ;;  %v2842_v31 = vpack.c.bf16 %v803_v23, %v793_v22 }
 0x11e   : > { %1152 = vmatprep.mubr.f32.mxu1 %v4090_v16  ;;  %v816_v29 = vld [vmem:[#allocation5 + $0x838] sm:$0xff]  ;;  %v826_v30 = vld [vmem:[#allocation5 + $0x888] sm:$0xff]  ;;  %v2906_v32 = vpack.c.bf16 %v805_v26, %v795_v24  ;;  %v2844_v33 = vpack.c.bf16 %v824_v28, %v814_v27  ;;  %v813_v34 = vld [vmem:[#allocation5 + $0x820] sm:$0xff] }
 0x11f   : > { %2827 = vmatpush1.bf16.msra.mxu0 %v2826_v46  ;;  %v823_v35 = vld [vmem:[#allocation5 + $0x870] sm:$0xff]  ;;  %v2908_v37 = vpack.c.bf16 %v826_v30, %v816_v29  ;;  %v825_v38 = vld [vmem:[#allocation5 + $0x880] sm:$0xff]  ;;  %v834_v39 = vld [vmem:[#allocation5 + $0x8c8] sm:$0xff] }
 0x120   : > { %2891 = vmatpush1.bf16.msra.mxu1 %v2890_v47  ;;  %2829 = vmatprep.subr.bf16.mxu0 %v2828_v48  ;;  %v815_v36 = vld [vmem:[#allocation5 + $0x830] sm:$0xff]  ;;  %v844_v40 = vld [vmem:[#allocation5 + $0x918] sm:$0xff]  ;;  %v846_v42 = vld [vmem:[#allocation5 + $0x928] sm:$0xff]  ;;  %v2846_v43 = vpack.c.bf16 %v823_v35, %v813_v34 }
 0x121   : > { %2893 = vmatprep.subr.bf16.mxu1 %v2892_v52  ;;  %v836_v41 = vld [vmem:[#allocation5 + $0x8d8] sm:$0xff]  ;;  %v2910_v44 = vpack.c.bf16 %v825_v38, %v815_v36  ;;  %v2848_v45 = vpack.c.bf16 %v844_v40, %v834_v39  ;;  %v833_v46 = vld [vmem:[#allocation5 + $0x8c0] sm:$0xff]  ;;  %v843_v47 = vld [vmem:[#allocation5 + $0x910] sm:$0xff] }
 0x122   : > { %v835_v48 = vld [vmem:[#allocation5 + $0x8d0] sm:$0xff]  ;;  %v2912_v49 = vpack.c.bf16 %v846_v42, %v836_v41  ;;  %v845_v50 = vld [vmem:[#allocation5 + $0x920] sm:$0xff]  ;;  %v854_v51 = vld [vmem:[#allocation5 + $0x968] sm:$0xff]  ;;  %v2850_v55 = vpack.c.bf16 %v843_v47, %v833_v46 }
 0x123   : > { %2831 = vmatpush1.bf16.msra.mxu0 %v2830_v58  ;;  %v864_v52 = vld [vmem:[#allocation5 + $0x9b8] sm:$0xff]  ;;  %v866_v54 = vld [vmem:[#allocation5 + $0x9c8] sm:$0xff]  ;;  %v2914_v56 = vpack.c.bf16 %v845_v50, %v835_v48  ;;  %v853_v58 = vld [vmem:[#allocation5 + $0x960] sm:$0xff] }
 0x124   : > { %2895 = vmatpush1.bf16.msra.mxu1 %v2894_v59  ;;  %2833 = vmatprep.subr.bf16.mxu0 %v2832_v60  ;;  %v856_v53 = vld [vmem:[#allocation5 + $0x978] sm:$0xff]  ;;  %v2852_v57 = vpack.c.bf16 %v864_v52, %v854_v51  ;;  %v863_v59 = vld [vmem:[#allocation5 + $0x9b0] sm:$0xff]  ;;  %v865_v62 = vld [vmem:[#allocation5 + $0x9c0] sm:$0xff] }
 0x125   : > { %2897 = vmatprep.subr.bf16.mxu1 %v2896_v0  ;;  %v855_v60 = vld [vmem:[#allocation5 + $0x970] sm:$0xff]  ;;  %v2916_v61 = vpack.c.bf16 %v866_v54, %v856_v53  ;;  %v558_v63 = vld [vmem:[#allocation5 + $0x28] sm:$0xff]  ;;  %v568_v0 = vld [vmem:[#allocation5 + $0x78] sm:$0xff]  ;;  %v2854_v3 = vpack.c.bf16 %v863_v59, %v853_v58 }
 0x126   : > { %v560_v1 = vld [vmem:[#allocation5 + $0x38] sm:$0xff]  ;;  %v570_v2 = vld [vmem:[#allocation5 + $0x88] sm:$0xff]  ;;  %v2918_v4 = vpack.c.bf16 %v865_v62, %v855_v60  ;;  %v2920_v5 = vpack.c.bf16 %v568_v0, %v558_v63  ;;  %v567_v7 = vld [vmem:[#allocation5 + $0x70] sm:$0xff] }
 0x127   : > { %2835 = vmatpush1.bf16.msra.mxu0 %v2834_v6  ;;  %v557_v6 = vld [vmem:[#allocation5 + $0x20] sm:$0xff]  ;;  %v578_v11 = vld [vmem:[#allocation5 + $0xc8] sm:$0xff]  ;;  %v588_v12 = vld [vmem:[#allocation5 + $0x118] sm:$0xff] }
 0x128   : > { %2899 = vmatpush1.bf16.msra.mxu1 %v2898_v8  ;;  %2837 = vmatprep.subr.bf16.mxu0 %v2836_v9  ;;  %v2984_v8 = vpack.c.bf16 %v570_v2, %v560_v1  ;;  %v559_v9 = vld [vmem:[#allocation5 + $0x30] sm:$0xff]  ;;  %v569_v10 = vld [vmem:[#allocation5 + $0x80] sm:$0xff]  ;;  %v2922_v14 = vpack.c.bf16 %v567_v7, %v557_v6  ;;  %v580_v15 = vld [vmem:[#allocation5 + $0xd8] sm:$0xff]  ;;  %v2924_v22 = vpack.c.bf16 %v588_v12, %v578_v11 }
 0x129   : > { %2901 = vmatprep.subr.bf16.mxu1 %v2900_v13  ;;  %v4095_v13 = vld [vmem:[%s4071_s19] sm:$0xff]  ;;  %v590_v17 = vld [vmem:[#allocation5 + $0x128] sm:$0xff]  ;;  %v2986_v18 = vpack.c.bf16 %v569_v10, %v559_v9  ;;  %v579_v23 = vld [vmem:[#allocation5 + $0xd0] sm:$0xff] }
 0x12a   : > { %v589_v24 = vld [vmem:[#allocation5 + $0x120] sm:$0xff]  ;;  %v598_v26 = vld [vmem:[#allocation5 + $0x168] sm:$0xff]  ;;  %v608_v27 = vld [vmem:[#allocation5 + $0x1b8] sm:$0xff] }
 0x12b   : > { %2839 = vmatpush1.bf16.msra.mxu0 %v2838_v19  ;;  %v577_v19 = vld [vmem:[#allocation5 + $0xc0] sm:$0xff]  ;;  %v4103_v28 = vld [vmem:[%s4071_s19 + $0x10] sm:$0xff]  ;;  %v600_v30 = vld [vmem:[#allocation5 + $0x178] sm:$0xff]  ;;  %v2928_v36 = vpack.c.bf16 %v608_v27, %v598_v26 }
 0x12c   : > { %2903 = vmatpush1.bf16.msra.mxu1 %v2902_v20  ;;  %2841 = vmatprep.subr.bf16.mxu0 %v2840_v21  ;;  %v587_v20 = vld [vmem:[#allocation5 + $0x110] sm:$0xff]  ;;  %v4098_v21 = vld [vmem:[%s4071_s19 + $0x18] sm:$0xff]  ;;  %v4108_v35 = vld [vmem:[%s4071_s19 + $0x28] sm:$0xff] }
 0x12d   : > { %2905 = vmatprep.subr.bf16.mxu1 %v2904_v25  ;;  %v2988_v25 = vpack.c.bf16 %v590_v17, %v580_v15  ;;  %v2926_v29 = vpack.c.bf16 %v587_v20, %v577_v19  ;;  %v607_v34 = vld [vmem:[#allocation5 + $0x1b0] sm:$0xff]  ;;  %v609_v38 = vld [vmem:[#allocation5 + $0x1c0] sm:$0xff]  ;;  %v618_v40 = vld [vmem:[#allocation5 + $0x208] sm:$0xff] }
 0x12e   : > { %v628_v41 = vld [vmem:[#allocation5 + $0x258] sm:$0xff]  ;;  %v4113_v42 = vld [vmem:[%s4071_s19 + $0x20] sm:$0xff]  ;;  %v627_v48 = vld [vmem:[#allocation5 + $0x250] sm:$0xff] }
 0x12f   : > { %2843 = vmatpush1.bf16.msra.mxu0 %v2842_v31  ;;  %v610_v31 = vld [vmem:[#allocation5 + $0x1c8] sm:$0xff]  ;;  %v617_v47 = vld [vmem:[#allocation5 + $0x200] sm:$0xff]  ;;  %v2932_v50 = vpack.c.bf16 %v628_v41, %v618_v40  ;;  %v619_v51 = vld [vmem:[#allocation5 + $0x210] sm:$0xff] }
 0x130   : > { %2907 = vmatpush1.bf16.msra.mxu1 %v2906_v32  ;;  %2845 = vmatprep.subr.bf16.mxu0 %v2844_v33  ;;  %v2990_v32 = vpack.c.bf16 %v589_v24, %v579_v23  ;;  %v597_v33 = vld [vmem:[#allocation5 + $0x160] sm:$0xff]  ;;  %v2992_v39 = vpack.c.bf16 %v610_v31, %v600_v30  ;;  %v638_v54 = vld [vmem:[#allocation5 + $0x2a8] sm:$0xff]  ;;  %v640_v58 = vld [vmem:[#allocation5 + $0x2b8] sm:$0xff] }
 0x131   : > { %2909 = vmatprep.subr.bf16.mxu1 %v2908_v37  ;;  %v599_v37 = vld [vmem:[#allocation5 + $0x170] sm:$0xff]  ;;  %v629_v52 = vld [vmem:[#allocation5 + $0x260] sm:$0xff]  ;;  %v650_v59 = vld [vmem:[#allocation5 + $0x308] sm:$0xff] }
 0x132   : > { %v2994_v46 = vpack.c.bf16 %v609_v38, %v599_v37  ;;  %v2998_v60 = vpack.c.bf16 %v629_v52, %v619_v51  ;;  %v647_v62 = vld [vmem:[#allocation5 + $0x2f0] sm:$0xff]  ;;  %v4128_v63 = vld [vmem:[%s4071_s19 + $0x48] sm:$0xff]  ;;  %v649_v2 = vld [vmem:[#allocation5 + $0x300] sm:$0xff] }
 0x133   : > { %2847 = vmatpush1.bf16.msra.mxu0 %v2846_v43  ;;  %v2930_v43 = vpack.c.bf16 %v607_v34, %v597_v33  ;;  %v639_v1 = vld [vmem:[#allocation5 + $0x2b0] sm:$0xff]  ;;  %v4133_v6 = vld [vmem:[%s4071_s19 + $0x40] sm:$0xff]  ;;  %v670_v9 = vld [vmem:[#allocation5 + $0x3a8] sm:$0xff] }
 0x134   : > { %2911 = vmatpush1.bf16.msra.mxu1 %v2910_v44  ;;  %2849 = vmatprep.subr.bf16.mxu0 %v2848_v45  ;;  %v620_v44 = vld [vmem:[#allocation5 + $0x218] sm:$0xff]  ;;  %v630_v45 = vld [vmem:[#allocation5 + $0x268] sm:$0xff]  ;;  %v3002_v10 = vpack.c.bf16 %v649_v2, %v639_v1  ;;  %v657_v11 = vld [vmem:[#allocation5 + $0x340] sm:$0xff] }
 0x135   : > { %2913 = vmatprep.subr.bf16.mxu1 %v2912_v49  ;;  %v4118_v49 = vld [vmem:[%s4071_s19 + $0x38] sm:$0xff]  ;;  %v2996_v53 = vpack.c.bf16 %v630_v45, %v620_v44  ;;  %v667_v12 = vld [vmem:[#allocation5 + $0x390] sm:$0xff]  ;;  %v678_v20 = vld [vmem:[#allocation5 + $0x3e8] sm:$0xff] }
 0x136   : > { %v659_v17 = vld [vmem:[#allocation5 + $0x350] sm:$0xff]  ;;  %v2942_v24 = vpack.c.bf16 %v667_v12, %v657_v11  ;;  %v690_v26 = vld [vmem:[#allocation5 + $0x448] sm:$0xff]  ;;  %v689_v34 = vld [vmem:[#allocation5 + $0x440] sm:$0xff] }
 0x137   : > { %2851 = vmatpush1.bf16.msra.mxu0 %v2850_v55  ;;  %v648_v55 = vld [vmem:[#allocation5 + $0x2f8] sm:$0xff]  ;;  %v4143_v23 = vld [vmem:[%s4071_s19 + $0x50] sm:$0xff]  ;;  %v4148_v31 = vld [vmem:[%s4071_s19 + $0x68] sm:$0xff] }
 0x138   : > { %2915 = vmatpush1.bf16.msra.mxu1 %v2914_v56  ;;  %2853 = vmatprep.subr.bf16.mxu0 %v2852_v57  ;;  %v4123_v56 = vld [vmem:[%s4071_s19 + $0x30] sm:$0xff]  ;;  %v2934_v57 = vpack.c.bf16 %v627_v48, %v617_v47  ;;  %v2936_v0 = vpack.c.bf16 %v648_v55, %v638_v54  ;;  %v698_v37 = vld [vmem:[#allocation5 + $0x488] sm:$0xff]  ;;  %v708_v38 = vld [vmem:[#allocation5 + $0x4d8] sm:$0xff] }
 0x139   : > { %2917 = vmatprep.subr.bf16.mxu1 %v2916_v61  ;;  %v637_v61 = vld [vmem:[#allocation5 + $0x2a0] sm:$0xff]  ;;  %v687_v30 = vld [vmem:[#allocation5 + $0x430] sm:$0xff]  ;;  %v700_v41 = vld [vmem:[#allocation5 + $0x498] sm:$0xff]  ;;  %v2948_v48 = vpack.c.bf16 %v708_v38, %v698_v37 }
 0x13a   : > { %v2938_v7 = vpack.c.bf16 %v647_v62, %v637_v61  ;;  %v679_v33 = vld [vmem:[#allocation5 + $0x3f0] sm:$0xff]  ;;  %v697_v45 = vld [vmem:[#allocation5 + $0x480] sm:$0xff]  ;;  %v4158_v47 = vld [vmem:[%s4071_s19 + $0x78] sm:$0xff] }
 0x13b   : > { %2855 = vmatpush1.bf16.msra.mxu0 %v2854_v3  ;;  %v3000_v3 = vpack.c.bf16 %v650_v59, %v640_v58  ;;  %v3010_v44 = vpack.c.bf16 %v689_v34, %v679_v33  ;;  %v709_v51 = vld [vmem:[#allocation5 + $0x4e0] sm:$0xff]  ;;  %v728_v54 = vld [vmem:[#allocation5 + $0x578] sm:$0xff]  ;;  %v4163_v55 = vld [vmem:[%s4071_s19 + $0x70] sm:$0xff] }
 0x13c   : > { %2919 = vmatpush1.bf16.msra.mxu1 %v2918_v4  ;;  %2921 = vmatprep.subr.bf16.mxu0 %v2920_v5  ;;  %v658_v4 = vld [vmem:[#allocation5 + $0x348] sm:$0xff]  ;;  %v668_v5 = vld [vmem:[#allocation5 + $0x398] sm:$0xff]  ;;  %v717_v61 = vld [vmem:[#allocation5 + $0x520] sm:$0xff] }
 0x13d   : > { %2985 = vmatprep.subr.bf16.mxu1 %v2984_v8  ;;  %v660_v8 = vld [vmem:[#allocation5 + $0x358] sm:$0xff]  ;;  %v2940_v15 = vpack.c.bf16 %v668_v5, %v658_v4  ;;  %v730_v59 = vld [vmem:[#allocation5 + $0x588] sm:$0xff]  ;;  %v727_v62 = vld [vmem:[#allocation5 + $0x570] sm:$0xff] }
 0x13e   : > { %992 = vmatmul.mubr.f32.vlgmr.msra.gmra.mrb[0].mxu0 %v4095_v13  ;;  %v3004_v19 = vpack.c.bf16 %v670_v9, %v660_v8  ;;  %v720_v58 = vld [vmem:[#allocation5 + $0x538] sm:$0xff]  ;;  %v719_v2 = vld [vmem:[#allocation5 + $0x530] sm:$0xff]  ;;  %v738_v5 = vld [vmem:[#allocation5 + $0x5c8] sm:$0xff]  ;;  %v2954_v9 = vpack.c.bf16 %v727_v62, %v717_v61 }
 0x13f   : > { %1153 = vmatmul.mubr.f32.vlgmr.msra.gmra.mrb[0].mxu1 %v4095_v13  ;;  %2923 = vmatpush1.bf16.msra.mxu0 %v2922_v14  ;;  %v4138_v14 = vld [vmem:[%s4071_s19 + $0x58] sm:$0xff]  ;;  %v3016_v4 = vpack.c.bf16 %v730_v59, %v720_v58  ;;  %v4173_v8 = vld [vmem:[%s4071_s19 + $0x80] sm:$0xff]  ;;  %v750_v11 = vld [vmem:[#allocation5 + $0x628] sm:$0xff] }
 0x140   : > { %2987 = vmatpush1.bf16.msra.mxu1 %v2986_v18  ;;  %997 = vmatprep.mubr.f32.mxu0 %v4098_v21  ;;  %v669_v18 = vld [vmem:[#allocation5 + $0x3a0] sm:$0xff]  ;;  %v4188_v37 = vld [vmem:[%s4071_s19 + $0xa8] sm:$0xff]  ;;  %v779_v59 = vld [vmem:[#allocation5 + $0x710] sm:$0xff] }
 0x141   : > { %1158 = vmatprep.mubr.f32.mxu1 %v4098_v21  ;;  %2925 = vmatprep.subr.bf16.mxu0 %v2924_v22  ;;  %v688_v22 = vld [vmem:[#allocation5 + $0x438] sm:$0xff]  ;;  %v3006_v27 = vpack.c.bf16 %v669_v18, %v659_v17  ;;  %v747_v17 = vld [vmem:[#allocation5 + $0x610] sm:$0xff]  ;;  %v757_v34 = vld [vmem:[#allocation5 + $0x660] sm:$0xff] }
 0x142   : > { %998 = vmatmul.mubr.f32.gmra.mrb[2].mxu0 %v4103_v28  ;;  %2989 = vmatprep.subr.bf16.mxu1 %v2988_v25  ;;  %v680_v25 = vld [vmem:[#allocation5 + $0x3f8] sm:$0xff]  ;;  %v798_v62 = vld [vmem:[#allocation5 + $0x7a8] sm:$0xff] }
 0x143   : > { %1159 = vmatmul.mubr.f32.gmra.mrb[2].mxu1 %v4103_v28  ;;  %2927 = vmatpush1.bf16.msra.mxu0 %v2926_v29  ;;  %v677_v29 = vld [vmem:[#allocation5 + $0x3e0] sm:$0xff]  ;;  %v4178_v18 = vld [vmem:[%s4071_s19 + $0x98] sm:$0xff] }
 0x144   : > { %2991 = vmatpush1.bf16.msra.mxu1 %v2990_v32  ;;  %1003 = vmatprep.mubr.f32.mxu0 %v4108_v35  ;;  %v2944_v32 = vpack.c.bf16 %v688_v22, %v678_v20  ;;  %v2946_v40 = vpack.c.bf16 %v687_v30, %v677_v29  ;;  %v739_v20 = vld [vmem:[#allocation5 + $0x5d0] sm:$0xff]  ;;  %v749_v22 = vld [vmem:[#allocation5 + $0x620] sm:$0xff]  ;;  %v760_v30 = vld [vmem:[#allocation5 + $0x678] sm:$0xff] }
 0x145   : > { %1164 = vmatprep.mubr.f32.mxu1 %v4108_v35  ;;  %2929 = vmatprep.subr.bf16.mxu0 %v2928_v36  ;;  %v3008_v36 = vpack.c.bf16 %v690_v26, %v680_v25  ;;  %v758_v25 = vld [vmem:[#allocation5 + $0x668] sm:$0xff]  ;;  %v768_v26 = vld [vmem:[#allocation5 + $0x6b8] sm:$0xff]  ;;  %v3022_v33 = vpack.c.bf16 %v749_v22, %v739_v20 }
 0x146   : > { %1004 = vmatmul.mubr.f32.gmra.mrb[4].mxu0 %v4113_v42  ;;  %2993 = vmatprep.subr.bf16.mxu1 %v2992_v39  ;;  %v4153_v39 = vld [vmem:[%s4071_s19 + $0x60] sm:$0xff]  ;;  %v2960_v38 = vpack.c.bf16 %v768_v26, %v758_v25  ;;  %v818_v20 = vld [vmem:[#allocation5 + $0x848] sm:$0xff]  ;;  %v828_v22 = vld [vmem:[#allocation5 + $0x898] sm:$0xff] }
 0x147   : > { %1165 = vmatmul.mubr.f32.gmra.mrb[4].mxu1 %v4113_v42  ;;  %2931 = vmatpush1.bf16.msra.mxu0 %v2930_v43  ;;  %v710_v43 = vld [vmem:[#allocation5 + $0x4e8] sm:$0xff]  ;;  %v820_v26 = vld [vmem:[#allocation5 + $0x858] sm:$0xff] }
 0x148   : > { %2995 = vmatpush1.bf16.msra.mxu1 %v2994_v46  ;;  %1009 = vmatprep.mubr.f32.mxu0 %v4118_v49  ;;  %v707_v46 = vld [vmem:[#allocation5 + $0x4d0] sm:$0xff]  ;;  %v3012_v52 = vpack.c.bf16 %v710_v43, %v700_v41  ;;  %v769_v41 = vld [vmem:[#allocation5 + $0x6c0] sm:$0xff] }
 0x149   : > { %1170 = vmatprep.mubr.f32.mxu1 %v4118_v49  ;;  %2933 = vmatprep.subr.bf16.mxu0 %v2932_v50  ;;  %v699_v50 = vld [vmem:[#allocation5 + $0x490] sm:$0xff] }
 0x14a   : > { %1010 = vmatmul.mubr.f32.gmra.mrb[6].mxu0 %v4123_v56  ;;  %2997 = vmatprep.subr.bf16.mxu1 %v2996_v53  ;;  %v718_v53 = vld [vmem:[#allocation5 + $0x528] sm:$0xff] }
 0x14b   : > { %1171 = vmatmul.mubr.f32.gmra.mrb[6].mxu1 %v4123_v56  ;;  %2935 = vmatpush1.bf16.msra.mxu0 %v2934_v57  ;;  %v2950_v57 = vpack.c.bf16 %v707_v46, %v697_v45  ;;  %v2952_v1 = vpack.c.bf16 %v728_v54, %v718_v53  ;;  %v788_v45 = vld [vmem:[#allocation5 + $0x758] sm:$0xff]  ;;  %v4193_v46 = vld [vmem:[%s4071_s19 + $0xa0] sm:$0xff]  ;;  %v787_v54 = vld [vmem:[#allocation5 + $0x750] sm:$0xff] }
 0x14c   : > { %2999 = vmatpush1.bf16.msra.mxu1 %v2998_v60  ;;  %1015 = vmatprep.mubr.f32.mxu0 %v4128_v63  ;;  %v3014_v60 = vpack.c.bf16 %v709_v51, %v699_v50  ;;  %v780_v50 = vld [vmem:[#allocation5 + $0x718] sm:$0xff]  ;;  %v790_v51 = vld [vmem:[#allocation5 + $0x768] sm:$0xff]  ;;  %v777_v53 = vld [vmem:[#allocation5 + $0x700] sm:$0xff] }
 0x14d   : > { %1176 = vmatprep.mubr.f32.mxu1 %v4128_v63  ;;  %2937 = vmatprep.subr.bf16.mxu0 %v2936_v0  ;;  %v4168_v0 = vld [vmem:[%s4071_s19 + $0x88] sm:$0xff]  ;;  %v3028_v61 = vpack.c.bf16 %v790_v51, %v780_v50  ;;  %v840_v50 = vld [vmem:[#allocation5 + $0x8f8] sm:$0xff] }
 0x14e   : > { %1016 = vmatmul.mubr.f32.gmra.mrb[8].mxu0 %v4133_v6  ;;  %3001 = vmatprep.subr.bf16.mxu1 %v3000_v3  ;;  %v729_v3 = vld [vmem:[#allocation5 + $0x580] sm:$0xff]  ;;  %v850_v51 = vld [vmem:[#allocation5 + $0x948] sm:$0xff] }
 0x14f   : > { %1177 = vmatmul.mubr.f32.gmra.mrb[8].mxu1 %v4133_v6  ;;  %2939 = vmatpush1.bf16.msra.mxu0 %v2938_v7  ;;  %v748_v7 = vld [vmem:[#allocation5 + $0x618] sm:$0xff]  ;;  %v3018_v12 = vpack.c.bf16 %v729_v3, %v719_v2  ;;  %v4203_v2 = vld [vmem:[%s4071_s19 + $0xb0] sm:$0xff]  ;;  %v2966_v3 = vpack.c.bf16 %v787_v54, %v777_v53  ;;  %v837_v53 = vld [vmem:[#allocation5 + $0x8e0] sm:$0xff] }
 0x150   : > { %3003 = vmatpush1.bf16.msra.mxu1 %v3002_v10  ;;  %1021 = vmatprep.mubr.f32.mxu0 %v4138_v14  ;;  %v740_v10 = vld [vmem:[#allocation5 + $0x5d8] sm:$0xff]  ;;  %v847_v54 = vld [vmem:[#allocation5 + $0x930] sm:$0xff] }
 0x151   : > { %1182 = vmatprep.mubr.f32.mxu1 %v4138_v14  ;;  %2941 = vmatprep.subr.bf16.mxu0 %v2940_v15  ;;  %v737_v15 = vld [vmem:[#allocation5 + $0x5c0] sm:$0xff] }
 0x152   : > { %1022 = vmatmul.mubr.f32.gmra.mrb[10].mxu0 %v4143_v23  ;;  %3005 = vmatprep.subr.bf16.mxu1 %v3004_v19  ;;  %v2956_v19 = vpack.c.bf16 %v748_v7, %v738_v5  ;;  %v2958_v29 = vpack.c.bf16 %v747_v17, %v737_v15  ;;  %v810_v5 = vld [vmem:[#allocation5 + $0x808] sm:$0xff]  ;;  %v799_v15 = vld [vmem:[#allocation5 + $0x7b0] sm:$0xff]  ;;  %v809_v17 = vld [vmem:[#allocation5 + $0x800] sm:$0xff] }
 0x153   : > { %1183 = vmatmul.mubr.f32.gmra.mrb[10].mxu1 %v4143_v23  ;;  %2943 = vmatpush1.bf16.msra.mxu0 %v2942_v24  ;;  %v3020_v24 = vpack.c.bf16 %v750_v11, %v740_v10  ;;  %v807_v10 = vld [vmem:[#allocation5 + $0x7f0] sm:$0xff]  ;;  %v4208_v11 = vld [vmem:[%s4071_s19 + $0xc8] sm:$0xff] }
 0x154   : > { %3007 = vmatpush1.bf16.msra.mxu1 %v3006_v27  ;;  %1027 = vmatprep.mubr.f32.mxu0 %v4148_v31  ;;  %v4183_v27 = vld [vmem:[%s4071_s19 + $0x90] sm:$0xff] }
 0x155   : > { %1188 = vmatprep.mubr.f32.mxu1 %v4148_v31  ;;  %2945 = vmatprep.subr.bf16.mxu0 %v2944_v32  ;;  %v770_v32 = vld [vmem:[#allocation5 + $0x6c8] sm:$0xff] }
 0x156   : > { %1028 = vmatmul.mubr.f32.gmra.mrb[12].mxu0 %v4153_v39  ;;  %3009 = vmatprep.subr.bf16.mxu1 %v3008_v36  ;;  %v767_v36 = vld [vmem:[#allocation5 + $0x6b0] sm:$0xff]  ;;  %v3024_v43 = vpack.c.bf16 %v770_v32, %v760_v30  ;;  %v3034_v30 = vpack.c.bf16 %v809_v17, %v799_v15  ;;  %v817_v32 = vld [vmem:[#allocation5 + $0x840] sm:$0xff]  ;;  %v4238_v17 = vld [vmem:[%s4071_s19 + $0xf8] sm:$0xff] }
 0x157   : > { %1189 = vmatmul.mubr.f32.gmra.mrb[12].mxu1 %v4153_v39  ;;  %2947 = vmatpush1.bf16.msra.mxu0 %v2946_v40  ;;  %v759_v40 = vld [vmem:[#allocation5 + $0x670] sm:$0xff] }
 0x158   : > { %3011 = vmatpush1.bf16.msra.mxu1 %v3010_v44  ;;  %1033 = vmatprep.mubr.f32.mxu0 %v4158_v47  ;;  %v778_v44 = vld [vmem:[#allocation5 + $0x708] sm:$0xff]  ;;  %v867_v15 = vld [vmem:[#allocation5 + $0x9d0] sm:$0xff] }
 0x159   : > { %1194 = vmatprep.mubr.f32.mxu1 %v4158_v47  ;;  %2949 = vmatprep.subr.bf16.mxu0 %v2948_v48  ;;  %v2962_v48 = vpack.c.bf16 %v767_v36, %v757_v34  ;;  %v2964_v58 = vpack.c.bf16 %v788_v45, %v778_v44  ;;  %v4218_v34 = vld [vmem:[%s4071_s19 + $0xd8] sm:$0xff]  ;;  %v2972_v36 = vpack.c.bf16 %v828_v22, %v818_v20  ;;  %v4223_v45 = vld [vmem:[%s4071_s19 + $0xd0] sm:$0xff]  ;;  %v869_v22 = vld [vmem:[#allocation5 + $0x9e0] sm:$0xff] }
 0x15a   : > { %1034 = vmatmul.mubr.f32.gmra.mrb[14].mxu0 %v4163_v55  ;;  %3013 = vmatprep.subr.bf16.mxu1 %v3012_v52  ;;  %v3026_v52 = vpack.c.bf16 %v769_v41, %v759_v40  ;;  %v829_v40 = vld [vmem:[#allocation5 + $0x8a0] sm:$0xff]  ;;  %v848_v44 = vld [vmem:[#allocation5 + $0x938] sm:$0xff]  ;;  %v859_v20 = vld [vmem:[#allocation5 + $0x990] sm:$0xff] }
 0x15b   : > { %1195 = vmatmul.mubr.f32.gmra.mrb[14].mxu1 %v4163_v55  ;;  %2951 = vmatpush1.bf16.msra.mxu0 %v2950_v57  ;;  %v4198_v57 = vld [vmem:[%s4071_s19 + $0xb8] sm:$0xff] }
 0x15c   : > { %3015 = vmatpush1.bf16.msra.mxu1 %v3014_v60  ;;  %1039 = vmatprep.mubr.f32.mxu0 %v4168_v0  ;;  %v789_v60 = vld [vmem:[#allocation5 + $0x760] sm:$0xff] }
 0x15d   : > { %1200 = vmatprep.mubr.f32.mxu1 %v4168_v0  ;;  %2953 = vmatprep.subr.bf16.mxu0 %v2952_v1  ;;  %v808_v1 = vld [vmem:[#allocation5 + $0x7f8] sm:$0xff]  ;;  %v3030_v7 = vpack.c.bf16 %v789_v60, %v779_v59  ;;  %v839_v60 = vld [vmem:[#allocation5 + $0x8f0] sm:$0xff] }
 0x15e   : > { %1040 = vmatmul.mubr.f32.gmra.mrb[16].mxu0 %v4173_v8  ;;  %3017 = vmatprep.subr.bf16.mxu1 %v3016_v4  ;;  %v800_v4 = vld [vmem:[#allocation5 + $0x7b8] sm:$0xff] }
 0x15f   : > { %1201 = vmatmul.mubr.f32.gmra.mrb[16].mxu1 %v4173_v8  ;;  %2955 = vmatpush1.bf16.msra.mxu0 %v2954_v9  ;;  %v797_v9 = vld [vmem:[#allocation5 + $0x7a0] sm:$0xff] }
 0x160   : > { %3019 = vmatpush1.bf16.msra.mxu1 %v3018_v12  ;;  %1045 = vmatprep.mubr.f32.mxu0 %v4178_v18  ;;  %v2968_v12 = vpack.c.bf16 %v808_v1, %v798_v62  ;;  %v2970_v25 = vpack.c.bf16 %v807_v10, %v797_v9  ;;  %v3040_v62 = vpack.c.bf16 %v850_v51, %v840_v50  ;;  %v858_v1 = vld [vmem:[#allocation5 + $0x988] sm:$0xff]  ;;  %v591_v50 = vld [vmem:[#allocation5 + $0x130] sm:$0xff] }
 0x161   : > { %1206 = vmatprep.mubr.f32.mxu1 %v4178_v18  ;;  %2957 = vmatprep.subr.bf16.mxu0 %v2956_v19  ;;  %v3032_v19 = vpack.c.bf16 %v810_v5, %v800_v4  ;;  %v4233_v4 = vld [vmem:[%s4071_s19 + $0xe0] sm:$0xff]  ;;  %v2978_v5 = vpack.c.bf16 %v847_v54, %v837_v53  ;;  %v870_v9 = vld [vmem:[#allocation5 + $0x9e8] sm:$0xff]  ;;  %v612_v53 = vld [vmem:[#allocation5 + $0x1d8] sm:$0xff] }
 0x162   : > { %1046 = vmatmul.mubr.f32.gmra.mrb[18].mxu0 %v4183_v27  ;;  %3021 = vmatprep.subr.bf16.mxu1 %v3020_v24  ;;  %v4213_v24 = vld [vmem:[%s4071_s19 + $0xc0] sm:$0xff] }
 0x163   : > { %1207 = vmatmul.mubr.f32.gmra.mrb[18].mxu1 %v4183_v27  ;;  %2959 = vmatpush1.bf16.msra.mxu0 %v2958_v29  ;;  %v830_v29 = vld [vmem:[#allocation5 + $0x8a8] sm:$0xff] }
 0x164   : > { %3023 = vmatpush1.bf16.msra.mxu1 %v3022_v33  ;;  %1051 = vmatprep.mubr.f32.mxu0 %v4188_v37  ;;  %v827_v33 = vld [vmem:[#allocation5 + $0x890] sm:$0xff]  ;;  %v3036_v41 = vpack.c.bf16 %v830_v29, %v820_v26  ;;  %v562_v26 = vld [vmem:[#allocation5 + $0x48] sm:$0xff]  ;;  %v572_v29 = vld [vmem:[#allocation5 + $0x98] sm:$0xff] }
 0x165   : > { %1212 = vmatprep.mubr.f32.mxu1 %v4188_v37  ;;  %2961 = vmatprep.subr.bf16.mxu0 %v2960_v38  ;;  %v819_v38 = vld [vmem:[#allocation5 + $0x850] sm:$0xff] }
 0x166   : > { %1052 = vmatmul.mubr.f32.gmra.mrb[20].mxu0 %v4193_v46  ;;  %3025 = vmatprep.subr.bf16.mxu1 %v3024_v43  ;;  %v838_v43 = vld [vmem:[#allocation5 + $0x8e8] sm:$0xff] }
 0x167   : > { %1213 = vmatmul.mubr.f32.gmra.mrb[20].mxu1 %v4193_v46  ;;  %2963 = vmatpush1.bf16.msra.mxu0 %v2962_v48  ;;  %v2974_v48 = vpack.c.bf16 %v827_v33, %v817_v32  ;;  %v2976_v59 = vpack.c.bf16 %v848_v44, %v838_v43  ;;  %v3046_v33 = vpack.c.bf16 %v869_v22, %v859_v20  ;;  %v592_v43 = vld [vmem:[#allocation5 + $0x138] sm:$0xff]  ;;  %v671_v20 = vld [vmem:[#allocation5 + $0x3b0] sm:$0xff]  ;;  %v682_v22 = vld [vmem:[#allocation5 + $0x408] sm:$0xff] }
 0x168   : > { %3027 = vmatpush1.bf16.msra.mxu1 %v3026_v52  ;;  %1057 = vmatprep.mubr.f32.mxu0 %v4198_v57  ;;  %v3038_v52 = vpack.c.bf16 %v829_v40, %v819_v38  ;;  %v571_v38 = vld [vmem:[#allocation5 + $0x90] sm:$0xff]  ;;  %v3048_v40 = vpack.c.bf16 %v572_v29, %v562_v26  ;;  %v681_v26 = vld [vmem:[#allocation5 + $0x400] sm:$0xff] }
 0x169   : > { %1218 = vmatprep.mubr.f32.mxu1 %v4198_v57  ;;  %2965 = vmatprep.subr.bf16.mxu0 %v2964_v58  ;;  %v4228_v58 = vld [vmem:[%s4071_s19 + $0xe8] sm:$0xff]  ;;  %v691_v29 = vld [vmem:[#allocation5 + $0x450] sm:$0xff] }
 0x16a   : > { %1058 = vmatmul.mubr.f32.gmra.mrb[22].mxu0 %v4203_v2  ;;  %3029 = vmatprep.subr.bf16.mxu1 %v3028_v61  ;;  %v849_v61 = vld [vmem:[#allocation5 + $0x940] sm:$0xff] }
 0x16b   : > { %1219 = vmatmul.mubr.f32.gmra.mrb[22].mxu1 %v4203_v2  ;;  %2967 = vmatpush1.bf16.msra.mxu0 %v2966_v3  ;;  %v868_v3 = vld [vmem:[#allocation5 + $0x9d8] sm:$0xff]  ;;  %v3042_v10 = vpack.c.bf16 %v849_v61, %v839_v60  ;;  %v611_v60 = vld [vmem:[#allocation5 + $0x1d0] sm:$0xff]  ;;  %v622_v61 = vld [vmem:[#allocation5 + $0x228] sm:$0xff] }
 0x16c   : > { %3031 = vmatpush1.bf16.msra.mxu1 %v3030_v7  ;;  %1063 = vmatprep.mubr.f32.mxu0 %v4208_v11  ;;  %v860_v7 = vld [vmem:[#allocation5 + $0x998] sm:$0xff] }
 0x16d   : > { %1224 = vmatprep.mubr.f32.mxu1 %v4208_v11  ;;  %2969 = vmatprep.subr.bf16.mxu0 %v2968_v12  ;;  %v857_v12 = vld [vmem:[#allocation5 + $0x980] sm:$0xff] }
 0x16e   : > { %1064 = vmatmul.mubr.f32.gmra.mrb[24].mxu0 %v4213_v24  ;;  %3033 = vmatprep.subr.bf16.mxu1 %v3032_v19  ;;  %v2980_v19 = vpack.c.bf16 %v868_v3, %v858_v1  ;;  %v2982_v32 = vpack.c.bf16 %v867_v15, %v857_v12  ;;  %v621_v1 = vld [vmem:[#allocation5 + $0x220] sm:$0xff]  ;;  %v631_v3 = vld [vmem:[#allocation5 + $0x270] sm:$0xff]  ;;  %v662_v12 = vld [vmem:[#allocation5 + $0x368] sm:$0xff] }
 0x16f   : > { %1225 = vmatmul.mubr.f32.gmra.mrb[24].mxu1 %v4213_v24  ;;  %2971 = vmatpush1.bf16.msra.mxu0 %v2970_v25  ;;  %v3044_v25 = vpack.c.bf16 %v870_v9, %v860_v7  ;;  %v652_v7 = vld [vmem:[#allocation5 + $0x318] sm:$0xff]  ;;  %v641_v9 = vld [vmem:[#allocation5 + $0x2c0] sm:$0xff] }
 0x170   : > { %3035 = vmatpush1.bf16.msra.mxu1 %v3034_v30  ;;  %1069 = vmatprep.mubr.f32.mxu0 %v4218_v34  ;;  %v4243_v30 = vld [vmem:[%s4071_s19 + $0xf0] sm:$0xff]  ;;  %v672_v15 = vld [vmem:[#allocation5 + $0x3b8] sm:$0xff] }
 0x171   : > { %1230 = vmatprep.mubr.f32.mxu1 %v4218_v34  ;;  %2973 = vmatprep.subr.bf16.mxu0 %v2972_v36  ;;  %v561_v36 = vld [vmem:[#allocation5 + $0x40] sm:$0xff] }
 0x172   : > { %1070 = vmatmul.mubr.f32.gmra.mrb[26].mxu0 %v4223_v45  ;;  %3037 = vmatprep.subr.bf16.mxu1 %v3036_v41  ;;  %v582_v41 = vld [vmem:[#allocation5 + $0xe8] sm:$0xff]  ;;  %v3050_v44 = vpack.c.bf16 %v571_v38, %v561_v36  ;;  %v712_v36 = vld [vmem:[#allocation5 + $0x4f8] sm:$0xff]  ;;  %v3074_v38 = vpack.c.bf16 %v691_v29, %v681_v26 }
 0x173   : > { %1231 = vmatmul.mubr.f32.gmra.mrb[26].mxu1 %v4223_v45  ;;  %2975 = vmatpush1.bf16.msra.mxu0 %v2974_v48  ;;  %v581_v48 = vld [vmem:[#allocation5 + $0xe0] sm:$0xff]  ;;  %v3052_v51 = vpack.c.bf16 %v592_v43, %v582_v41  ;;  %v711_v41 = vld [vmem:[#allocation5 + $0x4f0] sm:$0xff]  ;;  %v832_v26 = vld [vmem:[#allocation5 + $0x8b8] sm:$0xff] }
 0x174   : > { %3039 = vmatpush1.bf16.msra.mxu1 %v3038_v52  ;;  %1075 = vmatprep.mubr.f32.mxu0 %v4228_v58  ;;  %v602_v52 = vld [vmem:[#allocation5 + $0x188] sm:$0xff]  ;;  %v3054_v54 = vpack.c.bf16 %v591_v50, %v581_v48  ;;  %v732_v48 = vld [vmem:[#allocation5 + $0x598] sm:$0xff] }
 0x175   : > { %1236 = vmatprep.mubr.f32.mxu1 %v4228_v58  ;;  %2977 = vmatprep.subr.bf16.mxu0 %v2976_v59  ;;  %v601_v59 = vld [vmem:[#allocation5 + $0x180] sm:$0xff] }
 0x176   : > { %1076 = vmatmul.mubr.f32.gmra.mrb[28].mxu0 %v4233_v4  ;;  %3041 = vmatprep.subr.bf16.mxu1 %v3040_v62  ;;  %v632_v62 = vld [vmem:[#allocation5 + $0x278] sm:$0xff] }
 0x177   : > { %1237 = vmatmul.mubr.f32.gmra.mrb[28].mxu1 %v4233_v4  ;;  %2979 = vmatpush1.bf16.msra.mxu0 %v2978_v5  ;;  %v642_v5 = vld [vmem:[#allocation5 + $0x2c8] sm:$0xff] }
 0x178   : > { %3043 = vmatpush1.bf16.msra.mxu1 %v3042_v10  ;;  %1081 = vmatprep.mubr.f32.mxu0 %v4238_v17  ;;  %v651_v10 = vld [vmem:[#allocation5 + $0x310] sm:$0xff] }
 0x179   : > { %1242 = vmatprep.mubr.f32.mxu1 %v4238_v17  ;;  %2981 = vmatprep.subr.bf16.mxu0 %v2980_v19  ;;  %v661_v19 = vld [vmem:[#allocation5 + $0x360] sm:$0xff] }
 0x17a   : > { %1082 = vmatmul.mubr.f32.gmra.mrb[30].mxu0 %v4243_v30  ;;  %3045 = vmatprep.subr.bf16.mxu1 %v3044_v25  ;;  %v692_v25 = vld [vmem:[#allocation5 + $0x458] sm:$0xff] }
 0x17b   : > { %1243 = vmatmul.mubr.f32.gmra.mrb[30].mxu1 %v4243_v30  ;;  %2983 = vmatpush1.bf16.msra.mxu0 %v2982_v32  ;;  %v3072_v32 = vpack.c.bf16 %v692_v25, %v682_v22  ;;  %v811_v22 = vld [vmem:[#allocation5 + $0x810] sm:$0xff] }
 0x17c   : > { %3047 = vmatpush1.bf16.msra.mxu1 %v3046_v33  ;;  %1313 = vmatprep.mubr.f32.mxu0 %v4090_v16  ;;  %v702_v33 = vld [vmem:[#allocation5 + $0x4a8] sm:$0xff] }
 0x17d   : > { %1474 = vmatprep.mubr.f32.mxu1 %v4090_v16  ;;  %3049 = vmatprep.subr.bf16.mxu0 %v3048_v40  ;;  %v3056_v16 = vpack.c.bf16 %v612_v53, %v602_v52  ;;  %v3076_v43 = vpack.c.bf16 %v712_v36, %v702_v33  ;;  %v731_v52 = vld [vmem:[#allocation5 + $0x590] sm:$0xff] }
 0x17e   : > { %1314 = vmatmul.mubr.f32.vlgmr.msra.gmra.mrb[32].mxu0 %v4095_v13  ;;  %3112 = vmatprep.subr.bf16.mxu1 %v3048_v40  ;;  %v701_v40 = vld [vmem:[#allocation5 + $0x4a0] sm:$0xff]  ;;  %v831_v33 = vld [vmem:[#allocation5 + $0x8b0] sm:$0xff] }
 0x17f   : > { %1475 = vmatmul.mubr.f32.vlgmr.msra.gmra.mrb[32].mxu1 %v4095_v13  ;;  %3051 = vmatpush1.bf16.msra.mxu0 %v3050_v44  ;;  %v3058_v13 = vpack.c.bf16 %v611_v60, %v601_v59  ;;  %v3078_v50 = vpack.c.bf16 %v711_v41, %v701_v40  ;;  %v752_v59 = vld [vmem:[#allocation5 + $0x638] sm:$0xff] }
 0x180   : > { %3128 = vmatpush1.bf16.msra.mxu1 %v3050_v44  ;;  %1319 = vmatprep.mubr.f32.mxu0 %v4098_v21  ;;  %v722_v44 = vld [vmem:[#allocation5 + $0x548] sm:$0xff]  ;;  %v852_v40 = vld [vmem:[#allocation5 + $0x958] sm:$0xff] }
 0x181   : > { %1480 = vmatprep.mubr.f32.mxu1 %v4098_v21  ;;  %3053 = vmatprep.subr.bf16.mxu0 %v3052_v51  ;;  %v3060_v21 = vpack.c.bf16 %v632_v62, %v622_v61  ;;  %v3080_v53 = vpack.c.bf16 %v732_v48, %v722_v44  ;;  %v751_v61 = vld [vmem:[#allocation5 + $0x630] sm:$0xff] }
 0x182   : > { %1320 = vmatmul.mubr.f32.gmra.mrb[34].mxu0 %v4103_v28  ;;  %3113 = vmatprep.subr.bf16.mxu1 %v3052_v51  ;;  %v721_v51 = vld [vmem:[#allocation5 + $0x540] sm:$0xff]  ;;  %v851_v44 = vld [vmem:[#allocation5 + $0x950] sm:$0xff] }
 0x183   : > { %1481 = vmatmul.mubr.f32.gmra.mrb[34].mxu1 %v4103_v28  ;;  %3055 = vmatpush1.bf16.msra.mxu0 %v3054_v54  ;;  %v3062_v28 = vpack.c.bf16 %v631_v3, %v621_v1  ;;  %v3082_v60 = vpack.c.bf16 %v731_v52, %v721_v51  ;;  %v772_v1 = vld [vmem:[#allocation5 + $0x6d8] sm:$0xff] }
 0x184   : > { %3129 = vmatpush1.bf16.msra.mxu1 %v3054_v54  ;;  %1325 = vmatprep.mubr.f32.mxu0 %v4108_v35  ;;  %v742_v54 = vld [vmem:[#allocation5 + $0x5e8] sm:$0xff]  ;;  %v872_v51 = vld [vmem:[#allocation5 + $0x9f8] sm:$0xff] }
 0x185   : > { %1486 = vmatprep.mubr.f32.mxu1 %v4108_v35  ;;  %3057 = vmatprep.subr.bf16.mxu0 %v3056_v16  ;;  %v3064_v35 = vpack.c.bf16 %v652_v7, %v642_v5  ;;  %v3084_v62 = vpack.c.bf16 %v752_v59, %v742_v54  ;;  %v771_v5 = vld [vmem:[#allocation5 + $0x6d0] sm:$0xff] }
 0x186   : > { %1326 = vmatmul.mubr.f32.gmra.mrb[36].mxu0 %v4113_v42  ;;  %3114 = vmatprep.subr.bf16.mxu1 %v3056_v16  ;;  %v741_v16 = vld [vmem:[#allocation5 + $0x5e0] sm:$0xff]  ;;  %v871_v54 = vld [vmem:[#allocation5 + $0x9f0] sm:$0xff] }
 0x187   : > { %1487 = vmatmul.mubr.f32.gmra.mrb[36].mxu1 %v4113_v42  ;;  %3059 = vmatpush1.bf16.msra.mxu0 %v3058_v13  ;;  %v3066_v42 = vpack.c.bf16 %v651_v10, %v641_v9  ;;  %v3086_v3 = vpack.c.bf16 %v751_v61, %v741_v16  ;;  %v792_v9 = vld [vmem:[#allocation5 + $0x778] sm:$0xff]  ;;  %v3347_v16 = vld [vmem:[%s4071_s19 + $0x8] sm:$0xff]  ;;  %v3348_v61 = vld [vmem:[%s4071_s19] sm:$0xff] }
 0x188   : > { %3130 = vmatpush1.bf16.msra.mxu1 %v3058_v13  ;;  %1331 = vmatprep.mubr.f32.mxu0 %v4118_v49  ;;  %v762_v13 = vld [vmem:[#allocation5 + $0x688] sm:$0xff] }
 0x189   : > { %1492 = vmatprep.mubr.f32.mxu1 %v4118_v49  ;;  %3061 = vmatprep.subr.bf16.mxu0 %v3060_v21  ;;  %v3068_v49 = vpack.c.bf16 %v672_v15, %v662_v12  ;;  %v3088_v7 = vpack.c.bf16 %v772_v1, %v762_v13  ;;  %v791_v12 = vld [vmem:[#allocation5 + $0x770] sm:$0xff]  ;;  %v3351_v1 = vld [vmem:[%s4071_s19 + $0x28] sm:$0xff] }
 0x18a   : > { %1332 = vmatmul.mubr.f32.gmra.mrb[38].mxu0 %v4123_v56  ;;  %3115 = vmatprep.subr.bf16.mxu1 %v3060_v21  ;;  %v761_v21 = vld [vmem:[#allocation5 + $0x680] sm:$0xff]  ;;  %v3350_v13 = vld [vmem:[%s4071_s19 + $0x10] sm:$0xff] }
 0x18b   : > { %1493 = vmatmul.mubr.f32.gmra.mrb[38].mxu1 %v4123_v56  ;;  %3063 = vmatpush1.bf16.msra.mxu0 %v3062_v28  ;;  %v3070_v56 = vpack.c.bf16 %v671_v20, %v661_v19  ;;  %v3090_v10 = vpack.c.bf16 %v771_v5, %v761_v21  ;;  %v812_v19 = vld [vmem:[#allocation5 + $0x818] sm:$0xff] }
 0x18c   : > { %3131 = vmatpush1.bf16.msra.mxu1 %v3062_v28  ;;  %1337 = vmatprep.mubr.f32.mxu0 %v4128_v63  ;;  %v782_v28 = vld [vmem:[#allocation5 + $0x728] sm:$0xff] }
 0x18d   : > { %1498 = vmatprep.mubr.f32.mxu1 %v4128_v63  ;;  %3065 = vmatprep.subr.bf16.mxu0 %v3064_v35  ;;  %v3092_v15 = vpack.c.bf16 %v792_v9, %v782_v28 }
 0x18e   : > { %1338 = vmatmul.mubr.f32.gmra.mrb[40].mxu0 %v4133_v6  ;;  %3116 = vmatprep.subr.bf16.mxu1 %v3064_v35  ;;  %v781_v35 = vld [vmem:[#allocation5 + $0x720] sm:$0xff] }
 0x18f   : > { %1499 = vmatmul.mubr.f32.gmra.mrb[40].mxu1 %v4133_v6  ;;  %3067 = vmatpush1.bf16.msra.mxu0 %v3066_v42  ;;  %v3094_v20 = vpack.c.bf16 %v791_v12, %v781_v35 }
 0x190   : > { %3132 = vmatpush1.bf16.msra.mxu1 %v3066_v42  ;;  %1343 = vmatprep.mubr.f32.mxu0 %v4138_v14  ;;  %v802_v42 = vld [vmem:[#allocation5 + $0x7c8] sm:$0xff] }
 0x191   : > { %1504 = vmatprep.mubr.f32.mxu1 %v4138_v14  ;;  %3069 = vmatprep.subr.bf16.mxu0 %v3068_v49  ;;  %v3096_v25 = vpack.c.bf16 %v812_v19, %v802_v42 }
 0x192   : > { %1344 = vmatmul.mubr.f32.gmra.mrb[42].mxu0 %v4143_v23  ;;  %3117 = vmatprep.subr.bf16.mxu1 %v3068_v49  ;;  %v801_v49 = vld [vmem:[#allocation5 + $0x7c0] sm:$0xff] }
 0x193   : > { %1505 = vmatmul.mubr.f32.gmra.mrb[42].mxu1 %v4143_v23  ;;  %3071 = vmatpush1.bf16.msra.mxu0 %v3070_v56  ;;  %v3098_v29 = vpack.c.bf16 %v811_v22, %v801_v49 }
 0x194   : > { %3133 = vmatpush1.bf16.msra.mxu1 %v3070_v56  ;;  %1349 = vmatprep.mubr.f32.mxu0 %v4148_v31  ;;  %v822_v56 = vld [vmem:[#allocation5 + $0x868] sm:$0xff] }
 0x195   : > { %1510 = vmatprep.mubr.f32.mxu1 %v4148_v31  ;;  %3073 = vmatprep.subr.bf16.mxu0 %v3072_v32  ;;  %v3100_v36 = vpack.c.bf16 %v832_v26, %v822_v56 }
 0x196   : > { %1350 = vmatmul.mubr.f32.gmra.mrb[44].mxu0 %v4153_v39  ;;  %3118 = vmatprep.subr.bf16.mxu1 %v3072_v32  ;;  %v821_v32 = vld [vmem:[#allocation5 + $0x860] sm:$0xff] }
 0x197   : > { %1511 = vmatmul.mubr.f32.gmra.mrb[44].mxu1 %v4153_v39  ;;  %3075 = vmatpush1.bf16.msra.mxu0 %v3074_v38  ;;  %v3102_v41 = vpack.c.bf16 %v831_v33, %v821_v32 }
 0x198   : > { %3134 = vmatpush1.bf16.msra.mxu1 %v3074_v38  ;;  %1355 = vmatprep.mubr.f32.mxu0 %v4158_v47  ;;  %v842_v38 = vld [vmem:[#allocation5 + $0x908] sm:$0xff] }
 0x199   : > { %1516 = vmatprep.mubr.f32.mxu1 %v4158_v47  ;;  %3077 = vmatprep.subr.bf16.mxu0 %v3076_v43  ;;  %v3104_v48 = vpack.c.bf16 %v852_v40, %v842_v38 }
 0x19a   : > { %1356 = vmatmul.mubr.f32.gmra.mrb[46].mxu0 %v4163_v55  ;;  %3119 = vmatprep.subr.bf16.mxu1 %v3076_v43  ;;  %v841_v43 = vld [vmem:[#allocation5 + $0x900] sm:$0xff] }
 0x19b   : > { %1517 = vmatmul.mubr.f32.gmra.mrb[46].mxu1 %v4163_v55  ;;  %3079 = vmatpush1.bf16.msra.mxu0 %v3078_v50  ;;  %v3106_v52 = vpack.c.bf16 %v851_v44, %v841_v43 }
 0x19c   : > { %3135 = vmatpush1.bf16.msra.mxu1 %v3078_v50  ;;  %1361 = vmatprep.mubr.f32.mxu0 %v4168_v0  ;;  %v862_v50 = vld [vmem:[#allocation5 + $0x9a8] sm:$0xff] }
 0x19d   : > { %1522 = vmatprep.mubr.f32.mxu1 %v4168_v0  ;;  %3081 = vmatprep.subr.bf16.mxu0 %v3080_v53  ;;  %v3108_v59 = vpack.c.bf16 %v872_v51, %v862_v50 }
 0x19e   : > { %1362 = vmatmul.mubr.f32.gmra.mrb[48].mxu0 %v4173_v8  ;;  %3120 = vmatprep.subr.bf16.mxu1 %v3080_v53  ;;  %v861_v53 = vld [vmem:[#allocation5 + $0x9a0] sm:$0xff] }
 0x19f   : > { %1523 = vmatmul.mubr.f32.gmra.mrb[48].mxu1 %v4173_v8  ;;  %3083 = vmatpush1.bf16.msra.mxu0 %v3082_v60 }
 0x1a0   : > { %3136 = vmatpush1.bf16.msra.mxu1 %v3082_v60  ;;  %1367 = vmatprep.mubr.f32.mxu0 %v4178_v18  ;;  %v3110_v60 = vpack.c.bf16 %v871_v54, %v861_v53 }
 0x1a1   : > { %1528 = vmatprep.mubr.f32.mxu1 %v4178_v18  ;;  %3085 = vmatprep.subr.bf16.mxu0 %v3084_v62 }
 0x1a2   : > { %1368 = vmatmul.mubr.f32.gmra.mrb[50].mxu0 %v4183_v27  ;;  %3121 = vmatprep.subr.bf16.mxu1 %v3084_v62  ;;  %v3349_v62 = vld [vmem:[%s4071_s19 + $0x18] sm:$0xff] }
 0x1a3   : > { %1529 = vmatmul.mubr.f32.gmra.mrb[50].mxu1 %v4183_v27  ;;  %3087 = vmatpush1.bf16.msra.mxu0 %v3086_v3 }
 0x1a4   : > { %3137 = vmatpush1.bf16.msra.mxu1 %v3086_v3  ;;  %1373 = vmatprep.mubr.f32.mxu0 %v4188_v37  ;;  %v3352_v3 = vld [vmem:[%s4071_s19 + $0x20] sm:$0xff] }
 0x1a5   : > { %1534 = vmatprep.mubr.f32.mxu1 %v4188_v37  ;;  %3089 = vmatprep.subr.bf16.mxu0 %v3088_v7 }
 0x1a6   : > { %1374 = vmatmul.mubr.f32.gmra.mrb[52].mxu0 %v4193_v46  ;;  %3122 = vmatprep.subr.bf16.mxu1 %v3088_v7 }
 0x1a7   : > { %1535 = vmatmul.mubr.f32.gmra.mrb[52].mxu1 %v4193_v46  ;;  %3091 = vmatpush1.bf16.msra.mxu0 %v3090_v10 }
 0x1a8   : > { %3138 = vmatpush1.bf16.msra.mxu1 %v3090_v10  ;;  %1379 = vmatprep.mubr.f32.mxu0 %v4198_v57 }
 0x1a9   : > { %1540 = vmatprep.mubr.f32.mxu1 %v4198_v57  ;;  %3093 = vmatprep.subr.bf16.mxu0 %v3092_v15 }
 0x1aa   : > { %1380 = vmatmul.mubr.f32.gmra.mrb[54].mxu0 %v4203_v2  ;;  %3123 = vmatprep.subr.bf16.mxu1 %v3092_v15 }
 0x1ab   : > { %1541 = vmatmul.mubr.f32.gmra.mrb[54].mxu1 %v4203_v2  ;;  %3095 = vmatpush1.bf16.msra.mxu0 %v3094_v20 }
 0x1ac   : > { %3139 = vmatpush1.bf16.msra.mxu1 %v3094_v20  ;;  %1385 = vmatprep.mubr.f32.mxu0 %v4208_v11 }
 0x1ad   : > { %1546 = vmatprep.mubr.f32.mxu1 %v4208_v11  ;;  %3097 = vmatprep.subr.bf16.mxu0 %v3096_v25 }
 0x1ae   : > { %1386 = vmatmul.mubr.f32.gmra.mrb[56].mxu0 %v4213_v24  ;;  %3124 = vmatprep.subr.bf16.mxu1 %v3096_v25 }
 0x1af   : > { %1547 = vmatmul.mubr.f32.gmra.mrb[56].mxu1 %v4213_v24  ;;  %3099 = vmatpush1.bf16.msra.mxu0 %v3098_v29 }
 0x1b0   : > { %3140 = vmatpush1.bf16.msra.mxu1 %v3098_v29  ;;  %1391 = vmatprep.mubr.f32.mxu0 %v4218_v34 }
 0x1b1   : > { %1552 = vmatprep.mubr.f32.mxu1 %v4218_v34  ;;  %3101 = vmatprep.subr.bf16.mxu0 %v3100_v36 }
 0x1b2   : > { %1392 = vmatmul.mubr.f32.gmra.mrb[58].mxu0 %v4223_v45  ;;  %3125 = vmatprep.subr.bf16.mxu1 %v3100_v36 }
 0x1b3   : > { %1553 = vmatmul.mubr.f32.gmra.mrb[58].mxu1 %v4223_v45  ;;  %3103 = vmatpush1.bf16.msra.mxu0 %v3102_v41 }
 0x1b4   : > { %3141 = vmatpush1.bf16.msra.mxu1 %v3102_v41  ;;  %1397 = vmatprep.mubr.f32.mxu0 %v4228_v58 }
 0x1b5   : > { %1558 = vmatprep.mubr.f32.mxu1 %v4228_v58  ;;  %3105 = vmatprep.subr.bf16.mxu0 %v3104_v48 }
 0x1b6   : > { %1398 = vmatmul.mubr.f32.gmra.mrb[60].mxu0 %v4233_v4  ;;  %3126 = vmatprep.subr.bf16.mxu1 %v3104_v48 }
 0x1b7   : > { %1559 = vmatmul.mubr.f32.gmra.mrb[60].mxu1 %v4233_v4  ;;  %3107 = vmatpush1.bf16.msra.mxu0 %v3106_v52 }
 0x1b8   : > { %3142 = vmatpush1.bf16.msra.mxu1 %v3106_v52  ;;  %1403 = vmatprep.mubr.f32.mxu0 %v4238_v17 }
 0x1b9   : > { %1564 = vmatprep.mubr.f32.mxu1 %v4238_v17  ;;  %3109 = vmatprep.subr.bf16.mxu0 %v3108_v59 }
 0x1ba   : > { %1404 = vmatmul.mubr.f32.gmra.mrb[62].mxu0 %v4243_v30  ;;  %3127 = vmatprep.subr.bf16.mxu1 %v3108_v59 }
 0x1bb   : > { %1565 = vmatmul.mubr.f32.gmra.mrb[62].mxu1 %v4243_v30  ;;  %3111 = vmatpush1.bf16.msra.mxu0 %v3110_v60 }
 0x1bc   : > { %3143 = vmatpush1.bf16.msra.mxu1 %v3110_v60  ;;  %1635 = vmatprep.mubr.f32.mxu0 %v3347_v16 }
 0x1bd   : > { %1683 = vmatprep.mubr.f32.mxu1 %v4168_v0  ;;  %v3353_v0 = vld [vmem:[%s4071_s19 + $0x38] sm:$0xff] }
 0x1be   : > { %1636 = vmatmul.mubr.f32.vlgmr.msra.gmra.mrb[64].mxu0 %v3348_v61 }
 0x1bf   : > { %1684 = vmatmul.mubr.f32.vlgmr.msra.gmra.mrb[64].mxu1 %v4173_v8  ;;  %1641 = vmatprep.mubr.f32.mxu0 %v3349_v62  ;;  %v3354_v8 = vld [vmem:[%s4071_s19 + $0x30] sm:$0xff]  ;;  %s5236_s19 = scalar_lea.sflag [#allocation16], %s5531_s7 }
 0x1c0   : > { %1689 = vmatprep.mubr.f32.mxu1 %v4178_v18 }
 0x1c2   : > { %1642 = vmatmul.mubr.f32.gmra.mrb[66].mxu0 %v3350_v13 }
 0x1c3   : > { %1690 = vmatmul.mubr.f32.gmra.mrb[66].mxu1 %v4183_v27  ;;  %1647 = vmatprep.mubr.f32.mxu0 %v3351_v1 }
 0x1c4   : > { %1695 = vmatprep.mubr.f32.mxu1 %v4188_v37 }
 0x1c6   : > { %1648 = vmatmul.mubr.f32.gmra.mrb[68].mxu0 %v3352_v3 }
 0x1c7   : > { %1696 = vmatmul.mubr.f32.gmra.mrb[68].mxu1 %v4193_v46  ;;  %1653 = vmatprep.mubr.f32.mxu0 %v3353_v0 }
 0x1c8   : > { %1701 = vmatprep.mubr.f32.mxu1 %v4198_v57 }
 0x1ca   : > { %1654 = vmatmul.mubr.f32.gmra.mrb[70].mxu0 %v3354_v8 }
 0x1cb   : > { %1702 = vmatmul.mubr.f32.gmra.mrb[70].mxu1 %v4203_v2  ;;  %1659 = vmatprep.mubr.f32.mxu0 %v4128_v63  ;;  %v877_v63 = vlaneseq }
 0x1cc   : > { %1707 = vmatprep.mubr.f32.mxu1 %v4208_v11 }
 0x1ce   : > { %1660 = vmatmul.mubr.f32.gmra.mrb[72].mxu0 %v4133_v6  ;;  %v4345_v6 = vshrl.u32 %v877_v63, 7 }
 0x1cf   : > { %1708 = vmatmul.mubr.f32.gmra.mrb[72].mxu1 %v4213_v24  ;;  %1665 = vmatprep.mubr.f32.mxu0 %v4138_v14 }
 0x1d0   : > { %1713 = vmatprep.mubr.f32.mxu1 %v4218_v34  ;;  %v5363_v14 = vsub.s32 0, %v4345_v6  ;;  %v891_v18 = vsub.s32 3, %v4345_v6 }
 0x1d2   : > { %1666 = vmatmul.mubr.f32.gmra.mrb[74].mxu0 %v4143_v23  ;;  %v4348_v23 = vld [vmem:[#allocation7] sm:$0xff] }
 0x1d3   : > { %1714 = vmatmul.mubr.f32.gmra.mrb[74].mxu1 %v4223_v45  ;;  %1671 = vmatprep.mubr.f32.mxu0 %v4148_v31  ;;  %v887_v31 = vsub.s32 2, %v4345_v6  ;;  %v4367_v37 = vrot.slane %v4348_v23, %v891_v18 }
 0x1d4   : > { %1719 = vmatprep.mubr.f32.mxu1 %v4228_v58 }
 0x1d6   : > { %1672 = vmatmul.mubr.f32.gmra.mrb[76].mxu0 %v4153_v39  ;;  %v5362_v39 = vsub.s32 1, %v4345_v6 }
 0x1d7   : > { %1720 = vmatmul.mubr.f32.gmra.mrb[76].mxu1 %v4233_v4  ;;  %1677 = vmatprep.mubr.f32.mxu0 %v4158_v47  ;;  %v4356_v47 = vrot.slane %v4348_v23, %v5363_v14 }
 0x1d8   : > { %1725 = vmatprep.mubr.f32.mxu1 %v4238_v17  ;;  %v4364_v27 = vrot.slane %v4348_v23, %v5362_v39 }
 0x1da   : > { %1678 = vmatmul.mubr.f32.gmra.mrb[78].mxu0 %v4163_v55  ;;  %v4359_v55 = vrot.slane %v4348_v23, %v887_v31 }
 0x1db   : > { %1726 = vmatmul.mubr.f32.gmra.mrb[78].mxu1 %v4243_v30 }
 0x211   : > { %v993_v46 = vpop.f32.mrb[0].mxu0 }
 0x212   : > { %v4370_v57 = vadd.f32 %v993_v46, %v4356_v47  ;;  %v1154_v2 = vpop.f32.mrb[0].mxu1  ;;  %v995_v11 = vpop.f32.mrb[1].mxu0 }
 0x213   : > { %v4373_v24 = vadd.f32 %v1154_v2, %v4359_v55  ;;  %v4376_v34 = vadd.f32 %v995_v11, %v4364_v27  ;;  %v1156_v45 = vpop.f32.mrb[1].mxu1 }
 0x214   : > { %v1732_v58 = vmul.f32 %v4370_v57, %v4370_v57  ;;  %v4381_v4 = vadd.f32 %v1156_v45, %v4367_v37 }
 0x215   : > { %v1733_v17 = vmul.f32 %v4376_v34, %v4376_v34  ;;  %v999_v30 = vpop.f32.mrb[2].mxu0  ;;  %v1861_v21 = vmul.f32 %v4373_v24, %v4373_v24 }
 0x216   : > { %v4388_v5 = vadd.f32 %v999_v30, %v4356_v47  ;;  %v1160_v7 = vpop.f32.mrb[2].mxu1  ;;  %v1001_v28 = vpop.f32.mrb[3].mxu0  ;;  %v1862_v9 = vmul.f32 %v4381_v4, %v4381_v4 }
 0x217   : > { %v4393_v10 = vadd.f32 %v1160_v7, %v4359_v55  ;;  %v4396_v35 = vadd.f32 %v1001_v28, %v4364_v27  ;;  %v1162_v12 = vpop.f32.mrb[3].mxu1  ;;  %v1764_v15 = vadd.f32 %v1733_v17, %v1732_v58 }
 0x218   : > { %v4399_v42 = vadd.f32 %v1162_v12, %v4367_v37  ;;  %v1893_v19 = vadd.f32 %v1862_v9, %v1861_v21  ;;  %v1734_v20 = vmul.f32 %v4388_v5, %v4388_v5 }
 0x219   : > { %v1863_v49 = vmul.f32 %v4393_v10, %v4393_v10  ;;  %v1005_v22 = vpop.f32.mrb[4].mxu0  ;;  %v1735_v25 = vmul.f32 %v4396_v35, %v4396_v35 }
 0x21a   : > { %v1864_v56 = vmul.f32 %v4399_v42, %v4399_v42  ;;  %v1166_v26 = vpop.f32.mrb[4].mxu1  ;;  %1894 = vadd.xlane.f32.xlu0 %v1893_v19  ;;  %v4410_v29 = vadd.f32 %v1005_v22, %v4356_v47  ;;  %v1007_v32 = vpop.f32.mrb[5].mxu0 }
 0x21b   : > { %v4413_v33 = vadd.f32 %v1166_v26, %v4359_v55  ;;  %v1168_v36 = vpop.f32.mrb[5].mxu1  ;;  %v4416_v38 = vadd.f32 %v1007_v32, %v4364_v27  ;;  %v1767_v40 = vadd.f32 %v1735_v25, %v1734_v20 }
 0x21c   : > { %v4419_v41 = vadd.f32 %v1168_v36, %v4367_v37  ;;  %v1736_v43 = vmul.f32 %v4410_v29, %v4410_v29  ;;  %v1896_v44 = vadd.f32 %v1864_v56, %v1863_v49 }
 0x21d   : > { %v1865_v48 = vmul.f32 %v4413_v33, %v4413_v33  ;;  %v1737_v50 = vmul.f32 %v4416_v38, %v4416_v38  ;;  %1768 = vadd.xlane.f32.xlu1 %v1767_v40  ;;  %v1011_v51 = vpop.f32.mrb[6].mxu0 }
 0x21e   : > { %v1866_v52 = vmul.f32 %v4419_v41, %v4419_v41  ;;  %v1172_v53 = vpop.f32.mrb[6].mxu1  ;;  %1765 = vadd.xlane.f32.xlu0 %v1764_v15  ;;  %v4430_v54 = vadd.f32 %v1011_v51, %v4356_v47  ;;  %v1013_v59 = vpop.f32.mrb[7].mxu0 }
 0x21f   : > { %v4433_v60 = vadd.f32 %v1172_v53, %v4359_v55  ;;  %v1174_v16 = vpop.f32.mrb[7].mxu1  ;;  %v4436_v61 = vadd.f32 %v1013_v59, %v4364_v27  ;;  %v1770_v62 = vadd.f32 %v1737_v50, %v1736_v43 }
 0x220   : > { %v4439_v13 = vadd.f32 %v1174_v16, %v4367_v37  ;;  %v1738_v1 = vmul.f32 %v4430_v54, %v4430_v54  ;;  %v1899_v3 = vadd.f32 %v1866_v52, %v1865_v48 }
 0x221   : > { %5423 = vst [vmem:[#allocation24_spill] sm:$0xff] %v4433_v60  ;;  %v1867_v0 = vmul.f32 %v4433_v60, %v4433_v60  ;;  %v1739_v8 = vmul.f32 %v4436_v61, %v4436_v61  ;;  %v1017_v63 = vpop.f32.mrb[8].mxu0 }
 0x222   : > { %5424 = vst [vmem:[#allocation25_spill] sm:$0xff] %v4439_v13  ;;  %v1868_v31 = vmul.f32 %v4439_v13, %v4439_v13  ;;  %v1178_v18 = vpop.f32.mrb[8].mxu1  ;;  %1900 = vadd.xlane.f32.xlu1 %v1899_v3  ;;  %1897 = vadd.xlane.f32.xlu0 %v1896_v44  ;;  %v4450_v46 = vadd.f32 %v1017_v63, %v4356_v47  ;;  %v1019_v2 = vpop.f32.mrb[9].mxu0 }
 0x223   : > { %v4453_v11 = vadd.f32 %v1178_v18, %v4359_v55  ;;  %v1180_v45 = vpop.f32.mrb[9].mxu1  ;;  %v4456_v58 = vadd.f32 %v1019_v2, %v4364_v27  ;;  %v1773_v17 = vadd.f32 %v1739_v8, %v1738_v1 }
 0x224   : > { %v4459_v30 = vadd.f32 %v1180_v45, %v4367_v37  ;;  %v1740_v21 = vmul.f32 %v4450_v46, %v4450_v46  ;;  %v1902_v7 = vadd.f32 %v1868_v31, %v1867_v0 }
 0x225   : > { %5425 = vst [vmem:[#allocation26_spill] sm:$0xff] %v4453_v11  ;;  %v1869_v28 = vmul.f32 %v4453_v11, %v4453_v11  ;;  %v1741_v9 = vmul.f32 %v4456_v58, %v4456_v58  ;;  %v1023_v12 = vpop.f32.mrb[10].mxu0 }
 0x226   : > { %5426 = vst [vmem:[#allocation27_spill] sm:$0xff] %v4459_v30  ;;  %v1870_v15 = vmul.f32 %v4459_v30, %v4459_v30  ;;  %v1184_v19 = vpop.f32.mrb[10].mxu1  ;;  %1903 = vadd.xlane.f32.xlu1 %v1902_v7  ;;  %1771 = vadd.xlane.f32.xlu0 %v1770_v62  ;;  %v4470_v20 = vadd.f32 %v1023_v12, %v4356_v47  ;;  %v1025_v49 = vpop.f32.mrb[11].mxu0 }
 0x227   : > { %v4473_v22 = vadd.f32 %v1184_v19, %v4359_v55  ;;  %v1186_v25 = vpop.f32.mrb[11].mxu1  ;;  %v4476_v56 = vadd.f32 %v1025_v49, %v4364_v27  ;;  %v1776_v26 = vadd.f32 %v1741_v9, %v1740_v21 }
 0x228   : > { %v4479_v32 = vadd.f32 %v1186_v25, %v4367_v37  ;;  %v1742_v36 = vmul.f32 %v4470_v20, %v4470_v20  ;;  %v1905_v40 = vadd.f32 %v1870_v15, %v1869_v28 }
 0x229   : > { %5427 = vst [vmem:[#allocation28_spill] sm:$0xff] %v4473_v22  ;;  %v1871_v43 = vmul.f32 %v4473_v22, %v4473_v22  ;;  %v1743_v44 = vmul.f32 %v4476_v56, %v4476_v56  ;;  %v1029_v48 = vpop.f32.mrb[12].mxu0 }
 0x22a   : > { %5428 = vst [vmem:[#allocation29_spill] sm:$0xff] %v4479_v32  ;;  %v1872_v50 = vmul.f32 %v4479_v32, %v4479_v32  ;;  %v1190_v51 = vpop.f32.mrb[12].mxu1  ;;  %1774 = vadd.xlane.f32.xlu1 %v1773_v17  ;;  %1906 = vadd.xlane.f32.xlu0 %v1905_v40  ;;  %v4490_v52 = vadd.f32 %v1029_v48, %v4356_v47  ;;  %v1031_v53 = vpop.f32.mrb[13].mxu0 }
 0x22b   : > { %v4493_v59 = vadd.f32 %v1190_v51, %v4359_v55  ;;  %v1192_v16 = vpop.f32.mrb[13].mxu1  ;;  %v4496_v62 = vadd.f32 %v1031_v53, %v4364_v27  ;;  %v1779_v1 = vadd.f32 %v1743_v44, %v1742_v36 }
 0x22c   : > { %v4499_v3 = vadd.f32 %v1192_v16, %v4367_v37  ;;  %v1744_v0 = vmul.f32 %v4490_v52, %v4490_v52  ;;  %v1908_v8 = vadd.f32 %v1872_v50, %v1871_v43 }
 0x22d   : > { %5429 = vst [vmem:[#allocation30_spill] sm:$0xff] %v4493_v59  ;;  %v1873_v63 = vmul.f32 %v4493_v59, %v4493_v59  ;;  %v1745_v31 = vmul.f32 %v4496_v62, %v4496_v62  ;;  %v1035_v18 = vpop.f32.mrb[14].mxu0 }
 0x22e   : > { %5430 = vst [vmem:[#allocation31_spill] sm:$0xff] %v4499_v3  ;;  %v1874_v2 = vmul.f32 %v4499_v3, %v4499_v3  ;;  %v1196_v45 = vpop.f32.mrb[14].mxu1  ;;  %1909 = vadd.xlane.f32.xlu1 %v1908_v8  ;;  %1777 = vadd.xlane.f32.xlu0 %v1776_v26  ;;  %v4510_v17 = vadd.f32 %v1035_v18, %v4356_v47  ;;  %v1037_v21 = vpop.f32.mrb[15].mxu0 }
 0x22f   : > { %v4513_v7 = vadd.f32 %v1196_v45, %v4359_v55  ;;  %v1198_v28 = vpop.f32.mrb[15].mxu1  ;;  %v4516_v9 = vadd.f32 %v1037_v21, %v4364_v27  ;;  %v1782_v12 = vadd.f32 %v1745_v31, %v1744_v0 }
 0x230   : > { %v4519_v15 = vadd.f32 %v1198_v28, %v4367_v37  ;;  %v1746_v19 = vmul.f32 %v4510_v17, %v4510_v17  ;;  %v1911_v49 = vadd.f32 %v1874_v2, %v1873_v63 }
 0x231   : > { %5431 = vst [vmem:[#allocation32_spill] sm:$0xff] %v4513_v7  ;;  %v1875_v25 = vmul.f32 %v4513_v7, %v4513_v7  ;;  %v1747_v26 = vmul.f32 %v4516_v9, %v4516_v9  ;;  %v1041_v36 = vpop.f32.mrb[16].mxu0 }
 0x232   : > { %5432 = vst [vmem:[#allocation33_spill] sm:$0xff] %v4519_v15  ;;  %v1876_v40 = vmul.f32 %v4519_v15, %v4519_v15  ;;  %v1202_v43 = vpop.f32.mrb[16].mxu1  ;;  %1780 = vadd.xlane.f32.xlu1 %v1779_v1  ;;  %1912 = vadd.xlane.f32.xlu0 %v1911_v49  ;;  %v4530_v44 = vadd.f32 %v1041_v36, %v4356_v47  ;;  %v1043_v48 = vpop.f32.mrb[17].mxu0 }
 0x233   : > { %v4533_v50 = vadd.f32 %v1202_v43, %v4359_v55  ;;  %v1204_v51 = vpop.f32.mrb[17].mxu1  ;;  %v4536_v53 = vadd.f32 %v1043_v48, %v4364_v27  ;;  %v1785_v16 = vadd.f32 %v1747_v26, %v1746_v19 }
 0x234   : > { %v4539_v0 = vadd.f32 %v1204_v51, %v4367_v37  ;;  %v1748_v8 = vmul.f32 %v4530_v44, %v4530_v44  ;;  %v1914_v1 = vadd.f32 %v1876_v40, %v1875_v25 }
 0x235   : > { %5433 = vst [vmem:[#allocation34_spill] sm:$0xff] %v4533_v50  ;;  %v1877_v63 = vmul.f32 %v4533_v50, %v4533_v50  ;;  %v1749_v31 = vmul.f32 %v4536_v53, %v4536_v53  ;;  %v1047_v18 = vpop.f32.mrb[18].mxu0 }
 0x236   : > { %5434 = vst [vmem:[#allocation35_spill] sm:$0xff] %v4539_v0  ;;  %v1878_v2 = vmul.f32 %v4539_v0, %v4539_v0  ;;  %v1208_v45 = vpop.f32.mrb[18].mxu1  ;;  %1915 = vadd.xlane.f32.xlu1 %v1914_v1  ;;  %1783 = vadd.xlane.f32.xlu0 %v1782_v12  ;;  %v4550_v21 = vadd.f32 %v1047_v18, %v4356_v47  ;;  %v1049_v28 = vpop.f32.mrb[19].mxu0  ;;  %v899_v0 = vsub.s32 5, %v4345_v6 }
 0x237   : > { %v4553_v19 = vadd.f32 %v1208_v45, %v4359_v55  ;;  %v1210_v49 = vpop.f32.mrb[19].mxu1  ;;  %v4556_v25 = vadd.f32 %v1049_v28, %v4364_v27  ;;  %v1788_v26 = vadd.f32 %v1749_v31, %v1748_v8 }
 0x238   : > { %v4559_v36 = vadd.f32 %v1210_v49, %v4367_v37  ;;  %v1750_v40 = vmul.f32 %v4550_v21, %v4550_v21  ;;  %v1917_v43 = vadd.f32 %v1878_v2, %v1877_v63 }
 0x239   : > { %5435 = vst [vmem:[#allocation36_spill] sm:$0xff] %v4553_v19  ;;  %v1879_v12 = vmul.f32 %v4553_v19, %v4553_v19  ;;  %v1751_v48 = vmul.f32 %v4556_v25, %v4556_v25  ;;  %v1053_v51 = vpop.f32.mrb[20].mxu0  ;;  %v903_v19 = vsub.s32 6, %v4345_v6 }
 0x23a   : > { %5436 = vst [vmem:[#allocation37_spill] sm:$0xff] %v4559_v36  ;;  %v1880_v1 = vmul.f32 %v4559_v36, %v4559_v36  ;;  %v1214_v18 = vpop.f32.mrb[20].mxu1  ;;  %1786 = vadd.xlane.f32.xlu1 %v1785_v16  ;;  %1918 = vadd.xlane.f32.xlu0 %v1917_v43  ;;  %v4570_v8 = vadd.f32 %v1053_v51, %v4356_v47  ;;  %v1055_v31 = vpop.f32.mrb[21].mxu0 }
 0x23b   : > { %v4573_v45 = vadd.f32 %v1214_v18, %v4359_v55  ;;  %v1216_v63 = vpop.f32.mrb[21].mxu1  ;;  %v4576_v2 = vadd.f32 %v1055_v31, %v4364_v27  ;;  %v1791_v28 = vadd.f32 %v1751_v48, %v1750_v40 }
 0x23c   : > { %v4579_v49 = vadd.f32 %v1216_v63, %v4367_v37  ;;  %v1752_v39 = vmul.f32 %v4570_v8, %v4570_v8  ;;  %v1920_v16 = vadd.f32 %v1880_v1, %v1879_v12 }
 0x23d   : > { %5437 = vst [vmem:[#allocation38_spill] sm:$0xff] %v4573_v45  ;;  %v1881_v43 = vmul.f32 %v4573_v45, %v4573_v45  ;;  %v1753_v51 = vmul.f32 %v4576_v2, %v4576_v2  ;;  %v1059_v18 = vpop.f32.mrb[22].mxu0 }
 0x23e   : > { %5438 = vst [vmem:[#allocation39_spill] sm:$0xff] %v4579_v49  ;;  %v1882_v14 = vmul.f32 %v4579_v49, %v4579_v49  ;;  %v1220_v31 = vpop.f32.mrb[22].mxu1  ;;  %1921 = vadd.xlane.f32.xlu1 %v1920_v16  ;;  %1789 = vadd.xlane.f32.xlu0 %v1788_v26  ;;  %v4590_v40 = vadd.f32 %v1059_v18, %v4356_v47  ;;  %v1061_v48 = vpop.f32.mrb[23].mxu0 }
 0x23f   : > { %v4593_v63 = vadd.f32 %v1220_v31, %v4359_v55  ;;  %v1222_v12 = vpop.f32.mrb[23].mxu1  ;;  %v4596_v1 = vadd.f32 %v1061_v48, %v4364_v27  ;;  %v1794_v15 = vadd.f32 %v1753_v51, %v1752_v39 }
 0x240   : > { %v4599_v7 = vadd.f32 %v1222_v12, %v4367_v37  ;;  %v1754_v49 = vmul.f32 %v4590_v40, %v4590_v40  ;;  %v1923_v16 = vadd.f32 %v1882_v14, %v1881_v43 }
 0x241   : > { %5439 = vst [vmem:[#allocation40_spill] sm:$0xff] %v4593_v63  ;;  %v1883_v26 = vmul.f32 %v4593_v63, %v4593_v63  ;;  %v1755_v18 = vmul.f32 %v4596_v1, %v4596_v1  ;;  %v1065_v31 = vpop.f32.mrb[24].mxu0 }
 0x242   : > { %5440 = vst [vmem:[#allocation41_spill] sm:$0xff] %v4599_v7  ;;  %v1884_v45 = vmul.f32 %v4599_v7, %v4599_v7  ;;  %v1226_v48 = vpop.f32.mrb[24].mxu1  ;;  %1792 = vadd.xlane.f32.xlu1 %v1791_v28  ;;  %1924 = vadd.xlane.f32.xlu0 %v1923_v16  ;;  %v4610_v39 = vadd.f32 %v1065_v31, %v4356_v47  ;;  %v1067_v51 = vpop.f32.mrb[25].mxu0 }
 0x243   : > { %v4613_v12 = vadd.f32 %v1226_v48, %v4359_v55  ;;  %v1228_v14 = vpop.f32.mrb[25].mxu1  ;;  %v4616_v43 = vadd.f32 %v1067_v51, %v4364_v27  ;;  %v1797_v63 = vadd.f32 %v1755_v18, %v1754_v49 }
 0x244   : > { %v4619_v3 = vadd.f32 %v1228_v14, %v4367_v37  ;;  %v1756_v7 = vmul.f32 %v4610_v39, %v4610_v39  ;;  %v1926_v28 = vadd.f32 %v1884_v45, %v1883_v26 }
 0x245   : > { %5441 = vst [vmem:[#allocation42_spill] sm:$0xff] %v4613_v12  ;;  %v1885_v16 = vmul.f32 %v4613_v12, %v4613_v12  ;;  %v1757_v31 = vmul.f32 %v4616_v43, %v4616_v43  ;;  %v1071_v48 = vpop.f32.mrb[26].mxu0 }
 0x246   : > { %5442 = vst [vmem:[#allocation43_spill] sm:$0xff] %v4619_v3  ;;  %v1886_v59 = vmul.f32 %v4619_v3, %v4619_v3  ;;  %v1232_v51 = vpop.f32.mrb[26].mxu1  ;;  %1927 = vadd.xlane.f32.xlu1 %v1926_v28  ;;  %1795 = vadd.xlane.f32.xlu0 %v1794_v15  ;;  %v4630_v49 = vadd.f32 %v1071_v48, %v4356_v47  ;;  %v1073_v18 = vpop.f32.mrb[27].mxu0 }
 0x247   : > { %v4633_v14 = vadd.f32 %v1232_v51, %v4359_v55  ;;  %v1234_v45 = vpop.f32.mrb[27].mxu1  ;;  %v4636_v26 = vadd.f32 %v1073_v18, %v4364_v27  ;;  %v1800_v12 = vadd.f32 %v1757_v31, %v1756_v7 }
 0x248   : > { %v4639_v36 = vadd.f32 %v1234_v45, %v4367_v37  ;;  %v1758_v3 = vmul.f32 %v4630_v49, %v4630_v49  ;;  %v1929_v28 = vadd.f32 %v1886_v59, %v1885_v16  ;;  %v895_v59 = vsub.s32 4, %v4345_v6 }
 0x249   : > { %5443 = vst [vmem:[#allocation44_spill] sm:$0xff] %v4633_v14  ;;  %v1887_v15 = vmul.f32 %v4633_v14, %v4633_v14  ;;  %v1759_v48 = vmul.f32 %v4636_v26, %v4636_v26  ;;  %v1077_v51 = vpop.f32.mrb[28].mxu0 }
 0x24a   : > { %5444 = vst [vmem:[#allocation45_spill] sm:$0xff] %v4639_v36  ;;  %v1888_v18 = vmul.f32 %v4639_v36, %v4639_v36  ;;  %v1238_v7 = vpop.f32.mrb[28].mxu1  ;;  %1798 = vadd.xlane.f32.xlu1 %v1797_v63  ;;  %1930 = vadd.xlane.f32.xlu0 %v1929_v28  ;;  %v4651_v31 = vadd.f32 %v1077_v51, %v4356_v47  ;;  %v1079_v45 = vpop.f32.mrb[29].mxu0  ;;  %v907_v51 = vsub.s32 7, %v4345_v6 }
 0x24b   : > { %v4655_v16 = vadd.f32 %v1238_v7, %v4359_v55  ;;  %v1240_v14 = vpop.f32.mrb[29].mxu1  ;;  %v4658_v32 = vadd.f32 %v1079_v45, %v4364_v27  ;;  %v1803_v22 = vadd.f32 %v1759_v48, %v1758_v3  ;;  %v4672_v3 = vrot.slane %v4348_v23, %v903_v19 }
 0x24c   : > { %v4662_v36 = vadd.f32 %v1240_v14, %v4367_v37  ;;  %v1760_v63 = vmul.f32 %v4651_v31, %v4651_v31  ;;  %v1932_v28 = vadd.f32 %v1888_v18, %v1887_v15  ;;  %v4680_v30 = vrot.slane %v4348_v23, %v895_v59 }
 0x24d   : > { %5445 = vst [vmem:[#allocation46_spill] sm:$0xff] %v4655_v16  ;;  %v1889_v7 = vmul.f32 %v4655_v16, %v4655_v16  ;;  %v1761_v50 = vmul.f32 %v4658_v32, %v4658_v32  ;;  %v1083_v45 = vpop.f32.mrb[30].mxu0  ;;  %v4697_v59 = vrot.slane %v4348_v23, %v907_v51  ;;  %v1990_v51 = vld [vmem:[#allocation8 + $0x8] sm:$0xff] }
 0x24e   : > { %5446 = vst [vmem:[#allocation47_spill] sm:$0xff] %v4662_v36  ;;  %v1890_v14 = vmul.f32 %v4662_v36, %v4662_v36  ;;  %v1244_v48 = vpop.f32.mrb[30].mxu1  ;;  %1933 = vadd.xlane.f32.xlu1 %v1932_v28  ;;  %1801 = vadd.xlane.f32.xlu0 %v1800_v12  ;;  %v4677_v15 = vadd.f32 %v1083_v45, %v4356_v47  ;;  %v1085_v18 = vpop.f32.mrb[31].mxu0 }
 0x24f   : > { %v4683_v16 = vadd.f32 %v1244_v48, %v4359_v55  ;;  %v1246_v11 = vpop.f32.mrb[31].mxu1  ;;  %v4686_v19 = vadd.f32 %v1085_v18, %v4364_v27  ;;  %v1806_v13 = vadd.f32 %v1761_v50, %v1760_v63  ;;  %v4689_v36 = vrot.slane %v4348_v23, %v899_v0  ;;  %v1989_v63 = vld [vmem:[#allocation8] sm:$0xff]  ;;  %v2054_v48 = vld [vmem:[#allocation10 + $0x8] sm:$0xff] }
 0x250   : > { %v4692_v12 = vadd.f32 %v1246_v11, %v4367_v37  ;;  %v1762_v47 = vmul.f32 %v4677_v15, %v4677_v15  ;;  %v1935_v28 = vadd.f32 %v1890_v14, %v1889_v7  ;;  %v2053_v0 = vld [vmem:[#allocation10] sm:$0xff] }
 0x251   : > { %5447 = vst [vmem:[#allocation48_spill] sm:$0xff] %v4683_v16  ;;  %5448 = vst [vmem:[#allocation49_spill] sm:$0xff] %v4686_v19  ;;  %v1891_v55 = vmul.f32 %v4683_v16, %v4683_v16  ;;  %v1763_v27 = vmul.f32 %v4686_v19, %v4686_v19  ;;  %v1315_v50 = vpop.f32.mrb[32].mxu0 }
 0x252   : > { %5449 = vst [vmem:[#allocation50_spill] sm:$0xff] %v4692_v12  ;;  %v1892_v37 = vmul.f32 %v4692_v12, %v4692_v12  ;;  %v1476_v11 = vpop.f32.mrb[32].mxu1  ;;  %1804 = vadd.xlane.f32.xlu1 %v1803_v22  ;;  %1936 = vadd.xlane.f32.xlu0 %v1935_v28  ;;  %v1316_v7 = vadd.f32 %v1315_v50, %v4680_v30  ;;  %v1317_v23 = vpop.f32.mrb[33].mxu0  ;;  %v1991_v12 = vld [vmem:[#allocation8 + $0x10] sm:$0xff] }
 0x253   : > { %v1477_v45 = vadd.f32 %v1476_v11, %v4672_v3  ;;  %v1478_v14 = vpop.f32.mrb[33].mxu1  ;;  %v1809_v18 = vadd.f32 %v1763_v27, %v1762_v47  ;;  %v1318_v16 = vadd.f32 %v1317_v23, %v4689_v36  ;;  %v2021_v22 = vmul.f32 %v1989_v63, %v4370_v57  ;;  %v2055_v23 = vld [vmem:[#allocation10 + $0x10] sm:$0xff]  ;;  %v2056_v63 = vld [vmem:[#allocation10 + $0x18] sm:$0xff] }
 0x254   : > { %v1479_v19 = vadd.f32 %v1478_v14, %v4697_v59  ;;  %v1938_v60 = vadd.f32 %v1892_v37, %v1891_v55  ;;  %2437 = vst [vmem:[%s4710_s16] sm:$0xff] %v1316_v7  ;;  %v2022_v11 = vmul.f32 %v1990_v51, %v4376_v34  ;;  %v1992_v14 = vld [vmem:[#allocation8 + $0x18] sm:$0xff] }
 0x255   : > { %v2085_v28 = vmul.f32 %v2053_v0, %v1477_v45  ;;  %2438 = vst [vmem:[%s4710_s16 + $0x8] sm:$0xff] %v1318_v16  ;;  %v1321_v50 = vpop.f32.mrb[34].mxu0  ;;  %v2024_v45 = vmul.f32 %v1992_v14, %v4396_v35 }
 0x256   : > { %v2086_v47 = vmul.f32 %v2054_v48, %v1479_v19  ;;  %v1482_v27 = vpop.f32.mrb[34].mxu1  ;;  %1939 = vadd.xlane.f32.xlu1 %v1938_v60  ;;  %1807 = vadd.xlane.f32.xlu0 %v1806_v13  ;;  %v1322_v55 = vadd.f32 %v1321_v50, %v4680_v30  ;;  %v1323_v37 = vpop.f32.mrb[35].mxu0  ;;  %v2023_v60 = vmul.f32 %v1991_v12, %v4388_v5  ;;  %v1993_v48 = vld [vmem:[#allocation8 + $0x20] sm:$0xff] }
 0x257   : > { %v4717_v7 = vadd.f32 %v2085_v28, %v2021_v22  ;;  %v1483_v57 = vadd.f32 %v1482_v27, %v4672_v3  ;;  %v1484_v16 = vpop.f32.mrb[35].mxu1  ;;  %v1324_v34 = vadd.f32 %v1323_v37, %v4689_v36  ;;  %v2057_v50 = vld [vmem:[#allocation10 + $0x20] sm:$0xff]  ;;  %v1994_v27 = vld [vmem:[#allocation8 + $0x28] sm:$0xff] }
 0x258   : > { %v4721_v0 = vadd.f32 %v2086_v47, %v2022_v11  ;;  %v1485_v19 = vadd.f32 %v1484_v16, %v4697_v59  ;;  %2439 = vst [vmem:[%s4710_s16 + $0x10] sm:$0xff] %v1322_v55 }
 0x259   : > { %v2087_v13 = vmul.f32 %v2055_v23, %v1483_v57  ;;  %2440 = vst [vmem:[%s4710_s16 + $0x18] sm:$0xff] %v1324_v34  ;;  %v1327_v51 = vpop.f32.mrb[36].mxu0  ;;  %v2058_v23 = vld [vmem:[#allocation10 + $0x28] sm:$0xff]  ;;  %v2025_v57 = vmul.f32 %v1993_v48, %v4410_v29  ;;  %v1995_v34 = vld [vmem:[#allocation8 + $0x30] sm:$0xff]  ;;  %v2060_v48 = vld [vmem:[#allocation10 + $0x38] sm:$0xff] }
 0x25a   : > { %v2088_v22 = vmul.f32 %v2056_v63, %v1485_v19  ;;  %v1488_v28 = vpop.f32.mrb[36].mxu1  ;;  %1810 = vadd.xlane.f32.xlu1 %v1809_v18  ;;  %v1328_v11 = vadd.f32 %v1327_v51, %v4680_v30  ;;  %v1329_v47 = vpop.f32.mrb[37].mxu0  ;;  %v2026_v63 = vmul.f32 %v1994_v27, %v4416_v38  ;;  %v2027_v27 = vmul.f32 %v1995_v34, %v4430_v54  ;;  %v2062_v34 = vld [vmem:[#allocation10 + $0x48] sm:$0xff] }
 0x25b   : > { %v4729_v37 = vadd.f32 %v2087_v13, %v2023_v60  ;;  %v1489_v5 = vadd.f32 %v1488_v28, %v4672_v3  ;;  %v1490_v12 = vpop.f32.mrb[37].mxu1  ;;  %v1330_v55 = vadd.f32 %v1329_v47, %v4689_v36  ;;  %v2059_v13 = vld [vmem:[#allocation10 + $0x30] sm:$0xff] }
 0x25c   : > { %v4733_v35 = vadd.f32 %v2088_v22, %v2024_v45  ;;  %v1491_v14 = vadd.f32 %v1490_v12, %v4697_v59  ;;  %2441 = vst [vmem:[%s4710_s16 + $0x20] sm:$0xff] %v1328_v11  ;;  %v1996_v22 = vld [vmem:[#allocation8 + $0x38] sm:$0xff] }
 0x25d   : > { %v2089_v18 = vmul.f32 %v2057_v50, %v1489_v5  ;;  %2442 = vst [vmem:[%s4710_s16 + $0x28] sm:$0xff] %v1330_v55  ;;  %v1333_v16 = vpop.f32.mrb[38].mxu0  ;;  %v1997_v55 = vld [vmem:[#allocation8 + $0x40] sm:$0xff] }
 0x25e   : > { %v2090_v19 = vmul.f32 %v2058_v23, %v1491_v14  ;;  %v1494_v60 = vpop.f32.mrb[38].mxu1  ;;  %v1334_v51 = vadd.f32 %v1333_v16, %v4680_v30  ;;  %v1335_v45 = vpop.f32.mrb[39].mxu0  ;;  %v2028_v23 = vmul.f32 %v1996_v22, %v4436_v61  ;;  %v2029_v22 = vmul.f32 %v1997_v55, %v4450_v46  ;;  %v2064_v55 = vld [vmem:[#allocation10 + $0x58] sm:$0xff] }
 0x25f   : > { %v4741_v28 = vadd.f32 %v2089_v18, %v2025_v57  ;;  %v1495_v11 = vadd.f32 %v1494_v60, %v4672_v3  ;;  %v1496_v29 = vpop.f32.mrb[39].mxu1  ;;  %v1336_v50 = vadd.f32 %v1335_v45, %v4689_v36  ;;  %v2061_v18 = vld [vmem:[#allocation10 + $0x40] sm:$0xff] }
 0x260   : > { %v4745_v47 = vadd.f32 %v2090_v19, %v2026_v63  ;;  %v1497_v38 = vadd.f32 %v1496_v29, %v4697_v59  ;;  %2443 = vst [vmem:[%s4710_s16 + $0x30] sm:$0xff] %v1334_v51  ;;  %v1998_v19 = vld [vmem:[#allocation8 + $0x48] sm:$0xff] }
 0x261   : > { %v2091_v5 = vmul.f32 %v2059_v13, %v1495_v11  ;;  %2444 = vst [vmem:[%s4710_s16 + $0x38] sm:$0xff] %v1336_v50  ;;  %v1339_v12 = vpop.f32.mrb[40].mxu0  ;;  %v1999_v50 = vld [vmem:[#allocation8 + $0x50] sm:$0xff] }
 0x262   : > { %v2092_v14 = vmul.f32 %v2060_v48, %v1497_v38  ;;  %v1500_v57 = vpop.f32.mrb[40].mxu1  ;;  %v1340_v16 = vadd.f32 %v1339_v12, %v4680_v30  ;;  %v1341_v63 = vpop.f32.mrb[41].mxu0  ;;  %v2030_v48 = vmul.f32 %v1998_v19, %v4456_v58  ;;  %v2031_v19 = vmul.f32 %v1999_v50, %v4470_v20  ;;  %v2066_v50 = vld [vmem:[#allocation10 + $0x68] sm:$0xff] }
 0x263   : > { %v4753_v60 = vadd.f32 %v2091_v5, %v2027_v27  ;;  %v1501_v51 = vadd.f32 %v1500_v57, %v4672_v3  ;;  %v1502_v54 = vpop.f32.mrb[41].mxu1  ;;  %v1342_v13 = vadd.f32 %v1341_v63, %v4689_v36  ;;  %v2063_v5 = vld [vmem:[#allocation10 + $0x50] sm:$0xff] }
 0x264   : > { %v4757_v45 = vadd.f32 %v2092_v14, %v2028_v23  ;;  %v1503_v61 = vadd.f32 %v1502_v54, %v4697_v59  ;;  %2445 = vst [vmem:[%s4710_s16 + $0x40] sm:$0xff] %v1340_v16  ;;  %v2000_v14 = vld [vmem:[#allocation8 + $0x58] sm:$0xff] }
 0x265   : > { %v2093_v11 = vmul.f32 %v2061_v18, %v1501_v51  ;;  %2446 = vst [vmem:[%s4710_s16 + $0x48] sm:$0xff] %v1342_v13  ;;  %v1345_v29 = vpop.f32.mrb[42].mxu0  ;;  %v2001_v13 = vld [vmem:[#allocation8 + $0x60] sm:$0xff] }
 0x266   : > { %v2094_v38 = vmul.f32 %v2062_v34, %v1503_v61  ;;  %v1506_v27 = vpop.f32.mrb[42].mxu1  ;;  %v1346_v12 = vadd.f32 %v1345_v29, %v4680_v30  ;;  %v1347_v23 = vpop.f32.mrb[43].mxu0  ;;  %v2032_v34 = vmul.f32 %v2000_v14, %v4476_v56  ;;  %v2033_v14 = vmul.f32 %v2001_v13, %v4490_v52  ;;  %v2068_v13 = vld [vmem:[#allocation10 + $0x78] sm:$0xff] }
 0x267   : > { %v4765_v57 = vadd.f32 %v2093_v11, %v2029_v22  ;;  %v1507_v16 = vadd.f32 %v1506_v27, %v4672_v3  ;;  %v1508_v46 = vpop.f32.mrb[43].mxu1  ;;  %v1348_v18 = vadd.f32 %v1347_v23, %v4689_v36  ;;  %v2065_v11 = vld [vmem:[#allocation10 + $0x60] sm:$0xff] }
 0x268   : > { %v4769_v63 = vadd.f32 %v2094_v38, %v2030_v48  ;;  %v1509_v58 = vadd.f32 %v1508_v46, %v4697_v59  ;;  %2447 = vst [vmem:[%s4710_s16 + $0x50] sm:$0xff] %v1346_v12  ;;  %v2002_v38 = vld [vmem:[#allocation8 + $0x68] sm:$0xff] }
 0x269   : > { %v2095_v51 = vmul.f32 %v2063_v5, %v1507_v16  ;;  %2448 = vst [vmem:[%s4710_s16 + $0x58] sm:$0xff] %v1348_v18  ;;  %v1351_v54 = vpop.f32.mrb[44].mxu0  ;;  %v2003_v18 = vld [vmem:[#allocation8 + $0x70] sm:$0xff] }
 0x26a   : > { %v2096_v61 = vmul.f32 %v2064_v55, %v1509_v58  ;;  %v1512_v22 = vpop.f32.mrb[44].mxu1  ;;  %v1352_v29 = vadd.f32 %v1351_v54, %v4680_v30  ;;  %v1353_v48 = vpop.f32.mrb[45].mxu0  ;;  %v2034_v55 = vmul.f32 %v2002_v38, %v4496_v62  ;;  %v2035_v38 = vmul.f32 %v2003_v18, %v4510_v17  ;;  %v2070_v18 = vld [vmem:[#allocation10 + $0x88] sm:$0xff] }
 0x26b   : > { %v4777_v27 = vadd.f32 %v2095_v51, %v2031_v19  ;;  %v1513_v12 = vadd.f32 %v1512_v22, %v4672_v3  ;;  %v1514_v20 = vpop.f32.mrb[45].mxu1  ;;  %v1354_v5 = vadd.f32 %v1353_v48, %v4689_v36  ;;  %v2067_v51 = vld [vmem:[#allocation10 + $0x70] sm:$0xff] }
 0x26c   : > { %v4781_v23 = vadd.f32 %v2096_v61, %v2032_v34  ;;  %v1515_v56 = vadd.f32 %v1514_v20, %v4697_v59  ;;  %2449 = vst [vmem:[%s4710_s16 + $0x60] sm:$0xff] %v1352_v29  ;;  %v2004_v61 = vld [vmem:[#allocation8 + $0x78] sm:$0xff] }
 0x26d   : > { %v2097_v16 = vmul.f32 %v2065_v11, %v1513_v12  ;;  %2450 = vst [vmem:[%s4710_s16 + $0x68] sm:$0xff] %v1354_v5  ;;  %v1357_v46 = vpop.f32.mrb[46].mxu0  ;;  %v2005_v5 = vld [vmem:[#allocation8 + $0x80] sm:$0xff] }
 0x26e   : > { %v2098_v58 = vmul.f32 %v2066_v50, %v1515_v56  ;;  %v1518_v19 = vpop.f32.mrb[46].mxu1  ;;  %v1358_v54 = vadd.f32 %v1357_v46, %v4680_v30  ;;  %v1359_v34 = vpop.f32.mrb[47].mxu0  ;;  %v2036_v50 = vmul.f32 %v2004_v61, %v4516_v9  ;;  %v2037_v61 = vmul.f32 %v2005_v5, %v4530_v44  ;;  %v2072_v5 = vld [vmem:[#allocation10 + $0x98] sm:$0xff] }
 0x26f   : > { %v4789_v22 = vadd.f32 %v2097_v16, %v2033_v14  ;;  %v1519_v29 = vadd.f32 %v1518_v19, %v4672_v3  ;;  %v1520_v52 = vpop.f32.mrb[47].mxu1  ;;  %v1360_v11 = vadd.f32 %v1359_v34, %v4689_v36  ;;  %v2069_v16 = vld [vmem:[#allocation10 + $0x80] sm:$0xff] }
 0x270   : > { %v4793_v48 = vadd.f32 %v2098_v58, %v2034_v55  ;;  %v1521_v62 = vadd.f32 %v1520_v52, %v4697_v59  ;;  %2451 = vst [vmem:[%s4710_s16 + $0x70] sm:$0xff] %v1358_v54  ;;  %v2006_v58 = vld [vmem:[#allocation8 + $0x88] sm:$0xff] }
 0x271   : > { %v2099_v12 = vmul.f32 %v2067_v51, %v1519_v29  ;;  %2452 = vst [vmem:[%s4710_s16 + $0x78] sm:$0xff] %v1360_v11  ;;  %v1363_v20 = vpop.f32.mrb[48].mxu0  ;;  %v2007_v11 = vld [vmem:[#allocation8 + $0x90] sm:$0xff] }
 0x272   : > { %v2100_v56 = vmul.f32 %v2068_v13, %v1521_v62  ;;  %v1524_v14 = vpop.f32.mrb[48].mxu1  ;;  %v1364_v46 = vadd.f32 %v1363_v20, %v4680_v30  ;;  %v1365_v55 = vpop.f32.mrb[49].mxu0  ;;  %v2038_v13 = vmul.f32 %v2006_v58, %v4536_v53  ;;  %v2039_v58 = vmul.f32 %v2007_v11, %v4550_v21  ;;  %v2074_v11 = vld [vmem:[#allocation10 + $0xa8] sm:$0xff] }
 0x273   : > { %v4801_v19 = vadd.f32 %v2099_v12, %v2035_v38  ;;  %v1525_v54 = vadd.f32 %v1524_v14, %v4672_v3  ;;  %v1526_v17 = vpop.f32.mrb[49].mxu1  ;;  %v1366_v51 = vadd.f32 %v1365_v55, %v4689_v36  ;;  %v2071_v12 = vld [vmem:[#allocation10 + $0x90] sm:$0xff] }
 0x274   : > { %v4805_v34 = vadd.f32 %v2100_v56, %v2036_v50  ;;  %v1527_v9 = vadd.f32 %v1526_v17, %v4697_v59  ;;  %2453 = vst [vmem:[%s4710_s16 + $0x80] sm:$0xff] %v1364_v46  ;;  %v2008_v56 = vld [vmem:[#allocation8 + $0x98] sm:$0xff] }
 0x275   : > { %5450 = vst [vmem:[#allocation51_spill] sm:$0xff] %v4801_v19  ;;  %v2101_v29 = vmul.f32 %v2069_v16, %v1525_v54  ;;  %2454 = vst [vmem:[%s4710_s16 + $0x88] sm:$0xff] %v1366_v51  ;;  %v1369_v52 = vpop.f32.mrb[50].mxu0  ;;  %v2009_v51 = vld [vmem:[#allocation8 + $0xa0] sm:$0xff] }
 0x276   : > { %5451 = vst [vmem:[#allocation52_spill] sm:$0xff] %v4805_v34  ;;  %v2102_v62 = vmul.f32 %v2070_v18, %v1527_v9  ;;  %v1530_v38 = vpop.f32.mrb[50].mxu1  ;;  %v1370_v20 = vadd.f32 %v1369_v52, %v4680_v30  ;;  %v1371_v50 = vpop.f32.mrb[51].mxu0  ;;  %v2040_v18 = vmul.f32 %v2008_v56, %v4556_v25  ;;  %v2041_v56 = vmul.f32 %v2009_v51, %v4570_v8  ;;  %v2076_v51 = vld [vmem:[#allocation10 + $0xb8] sm:$0xff]  ;;  %v2242_v34 = vld [vmem:[#allocation11 + $0xe8] sm:$0xff] }
 0x277   : > { %v4813_v14 = vadd.f32 %v2101_v29, %v2037_v61  ;;  %v1531_v46 = vadd.f32 %v1530_v38, %v4672_v3  ;;  %v1532_v44 = vpop.f32.mrb[51].mxu1  ;;  %v1372_v16 = vadd.f32 %v1371_v50, %v4689_v36  ;;  %v2073_v29 = vld [vmem:[#allocation10 + $0xa0] sm:$0xff] }
 0x278   : > { %v4817_v55 = vadd.f32 %v2102_v62, %v2038_v13  ;;  %v1533_v53 = vadd.f32 %v1532_v44, %v4697_v59  ;;  %2455 = vst [vmem:[%s4710_s16 + $0x90] sm:$0xff] %v1370_v20  ;;  %v2010_v62 = vld [vmem:[#allocation8 + $0xa8] sm:$0xff] }
 0x279   : > { %5452 = vst [vmem:[#allocation53_spill] sm:$0xff] %v4813_v14  ;;  %v2103_v54 = vmul.f32 %v2071_v12, %v1531_v46  ;;  %2456 = vst [vmem:[%s4710_s16 + $0x98] sm:$0xff] %v1372_v16  ;;  %v1375_v17 = vpop.f32.mrb[52].mxu0  ;;  %v2011_v16 = vld [vmem:[#allocation8 + $0xb0] sm:$0xff] }
 0x27a   : > { %5453 = vst [vmem:[#allocation54_spill] sm:$0xff] %v4817_v55  ;;  %v2104_v9 = vmul.f32 %v2072_v5, %v1533_v53  ;;  %v1536_v61 = vpop.f32.mrb[52].mxu1  ;;  %v1376_v52 = vadd.f32 %v1375_v17, %v4680_v30  ;;  %v1377_v13 = vpop.f32.mrb[53].mxu0  ;;  %v2042_v5 = vmul.f32 %v2010_v62, %v4576_v2  ;;  %v2043_v62 = vmul.f32 %v2011_v16, %v4590_v40  ;;  %v2078_v16 = vld [vmem:[#allocation10 + $0xc8] sm:$0xff]  ;;  %v5488_v55 = vld [vmem:[#allocation39_spill] sm:$0xff] }
 0x27b   : > { %v4825_v38 = vadd.f32 %v2103_v54, %v2039_v58  ;;  %v1537_v20 = vadd.f32 %v1536_v61, %v4672_v3  ;;  %v1538_v21 = vpop.f32.mrb[53].mxu1  ;;  %v1378_v12 = vadd.f32 %v1377_v13, %v4689_v36  ;;  %v2075_v54 = vld [vmem:[#allocation10 + $0xb0] sm:$0xff] }
 0x27c   : > { %v4829_v50 = vadd.f32 %v2104_v9, %v2040_v18  ;;  %v1539_v25 = vadd.f32 %v1538_v21, %v4697_v59  ;;  %2457 = vst [vmem:[%s4710_s16 + $0xa0] sm:$0xff] %v1376_v52  ;;  %v2012_v9 = vld [vmem:[#allocation8 + $0xb8] sm:$0xff] }
 0x27d   : > { %5454 = vst [vmem:[#allocation55_spill] sm:$0xff] %v4825_v38  ;;  %v2105_v46 = vmul.f32 %v2073_v29, %v1537_v20  ;;  %2458 = vst [vmem:[%s4710_s16 + $0xa8] sm:$0xff] %v1378_v12  ;;  %v1381_v44 = vpop.f32.mrb[54].mxu0  ;;  %v2013_v12 = vld [vmem:[#allocation8 + $0xc0] sm:$0xff]  ;;  %v2283_v38 = vld [vmem:[#allocation13 + $0x30] sm:$0xff] }
 0x27e   : > { %5455 = vst [vmem:[#allocation56_spill] sm:$0xff] %v4829_v50  ;;  %v2106_v53 = vmul.f32 %v2074_v11, %v1539_v25  ;;  %v1542_v58 = vpop.f32.mrb[54].mxu1  ;;  %v1382_v17 = vadd.f32 %v1381_v44, %v4680_v30  ;;  %v1383_v18 = vpop.f32.mrb[55].mxu0  ;;  %v2044_v11 = vmul.f32 %v2012_v9, %v4596_v1  ;;  %v2045_v9 = vmul.f32 %v2013_v12, %v4610_v39  ;;  %v2080_v12 = vld [vmem:[#allocation10 + $0xd8] sm:$0xff] }
 0x27f   : > { %v4837_v61 = vadd.f32 %v2105_v46, %v2041_v56  ;;  %v1543_v52 = vadd.f32 %v1542_v58, %v4672_v3  ;;  %v1544_v8 = vpop.f32.mrb[55].mxu1  ;;  %v1384_v29 = vadd.f32 %v1383_v18, %v4689_v36  ;;  %v2077_v46 = vld [vmem:[#allocation10 + $0xc0] sm:$0xff] }
 0x280   : > { %v4841_v13 = vadd.f32 %v2106_v53, %v2042_v5  ;;  %v1545_v2 = vadd.f32 %v1544_v8, %v4697_v59  ;;  %2459 = vst [vmem:[%s4710_s16 + $0xb0] sm:$0xff] %v1382_v17  ;;  %v2014_v53 = vld [vmem:[#allocation8 + $0xc8] sm:$0xff] }
 0x281   : > { %5456 = vst [vmem:[#allocation57_spill] sm:$0xff] %v4837_v61  ;;  %v2107_v20 = vmul.f32 %v2075_v54, %v1543_v52  ;;  %2460 = vst [vmem:[%s4710_s16 + $0xb8] sm:$0xff] %v1384_v29  ;;  %v1387_v21 = vpop.f32.mrb[56].mxu0  ;;  %v2015_v29 = vld [vmem:[#allocation8 + $0xd0] sm:$0xff] }
 0x282   : > { %5457 = vst [vmem:[#allocation58_spill] sm:$0xff] %v4841_v13  ;;  %v2108_v25 = vmul.f32 %v2076_v51, %v1545_v2  ;;  %v1548_v56 = vpop.f32.mrb[56].mxu1  ;;  %v1388_v44 = vadd.f32 %v1387_v21, %v4680_v30  ;;  %v1389_v5 = vpop.f32.mrb[57].mxu0  ;;  %v2046_v51 = vmul.f32 %v2014_v53, %v4616_v43  ;;  %v2047_v53 = vmul.f32 %v2015_v29, %v4630_v49  ;;  %v5482_v13 = vld [vmem:[#allocation37_spill] sm:$0xff] }
 0x283   : > { %v4849_v58 = vadd.f32 %v2107_v20, %v2043_v62  ;;  %v1549_v17 = vadd.f32 %v1548_v56, %v4672_v3  ;;  %v1550_v40 = vpop.f32.mrb[57].mxu1  ;;  %v1390_v54 = vadd.f32 %v1389_v5, %v4689_v36  ;;  %v2079_v20 = vld [vmem:[#allocation10 + $0xd0] sm:$0xff] }
 0x284   : > { %v4853_v18 = vadd.f32 %v2108_v25, %v2044_v11  ;;  %v1551_v1 = vadd.f32 %v1550_v40, %v4697_v59  ;;  %2461 = vst [vmem:[%s4710_s16 + $0xc0] sm:$0xff] %v1388_v44  ;;  %v2016_v25 = vld [vmem:[#allocation8 + $0xd8] sm:$0xff] }
 0x285   : > { %5458 = vst [vmem:[#allocation59_spill] sm:$0xff] %v4849_v58  ;;  %v2109_v52 = vmul.f32 %v2077_v46, %v1549_v17  ;;  %2462 = vst [vmem:[%s4710_s16 + $0xc8] sm:$0xff] %v1390_v54  ;;  %v1393_v8 = vpop.f32.mrb[58].mxu0  ;;  %v2017_v54 = vld [vmem:[#allocation8 + $0xe0] sm:$0xff] }
 0x286   : > { %5459 = vst [vmem:[#allocation60_spill] sm:$0xff] %v4853_v18  ;;  %v2110_v2 = vmul.f32 %v2078_v16, %v1551_v1  ;;  %v1554_v62 = vpop.f32.mrb[58].mxu1  ;;  %v1394_v21 = vadd.f32 %v1393_v8, %v4680_v30  ;;  %v1395_v11 = vpop.f32.mrb[59].mxu0  ;;  %v2048_v16 = vmul.f32 %v2016_v25, %v4636_v26  ;;  %v2214_v25 = vld [vmem:[#allocation11 + $0x8] sm:$0xff]  ;;  %v2281_v58 = vld [vmem:[#allocation13 + $0x20] sm:$0xff] }
 0x287   : > { %v4861_v56 = vadd.f32 %v2109_v52, %v2045_v9  ;;  %v1555_v44 = vadd.f32 %v1554_v62, %v4672_v3  ;;  %v1556_v39 = vpop.f32.mrb[59].mxu1  ;;  %v1396_v46 = vadd.f32 %v1395_v11, %v4689_v36  ;;  %v2081_v52 = vld [vmem:[#allocation10 + $0xe0] sm:$0xff]  ;;  %v2018_v11 = vld [vmem:[#allocation8 + $0xe8] sm:$0xff] }
 0x288   : > { %v4865_v5 = vadd.f32 %v2110_v2, %v2046_v51  ;;  %v1557_v43 = vadd.f32 %v1556_v39, %v4697_v59  ;;  %2463 = vst [vmem:[%s4710_s16 + $0xd0] sm:$0xff] %v1394_v21  ;;  %v874_v51 = vld [vmem:[#allocation7 + $0x8] sm:$0x3]  ;;  %v2213_v2 = vld [vmem:[#allocation11] sm:$0xff] }
 0x289   : > { %5460 = vst [vmem:[#allocation61_spill] sm:$0xff] %v4861_v56  ;;  %v2111_v17 = vmul.f32 %v2079_v20, %v1555_v44  ;;  %2464 = vst [vmem:[%s4710_s16 + $0xd8] sm:$0xff] %v1396_v46  ;;  %v1399_v40 = vpop.f32.mrb[60].mxu0  ;;  %v2082_v20 = vld [vmem:[#allocation10 + $0xe8] sm:$0xff]  ;;  %v2216_v46 = vld [vmem:[#allocation11 + $0x18] sm:$0xff] }
 0x28a   : > { %5461 = vst [vmem:[#allocation62_spill] sm:$0xff] %v4865_v5  ;;  %v2112_v1 = vmul.f32 %v2080_v12, %v1557_v43  ;;  %v1560_v9 = vpop.f32.mrb[60].mxu1  ;;  %v1400_v8 = vadd.f32 %v1399_v40, %v4680_v30  ;;  %v1401_v62 = vpop.f32.mrb[61].mxu0  ;;  %v2215_v12 = vld [vmem:[#allocation11 + $0x10] sm:$0xff]  ;;  %v2217_v43 = vld [vmem:[#allocation11 + $0x20] sm:$0xff]  ;;  %v2049_v40 = vmul.f32 %v2017_v54, %v4651_v31 }
 0x28b   : > { %v4873_v21 = vadd.f32 %v2111_v17, %v2047_v53  ;;  %v1561_v49 = vadd.f32 %v1560_v9, %v4672_v3  ;;  %v1562_v29 = vpop.f32.mrb[61].mxu1  ;;  %v1402_v26 = vadd.f32 %v1401_v62, %v4689_v36  ;;  %v5464_v17 = vsub.s32 0, %v4345_v6  ;;  %v2083_v31 = vld [vmem:[#allocation10 + $0xf0] sm:$0xff] }
 0x28c   : > { %v4877_v44 = vadd.f32 %v2112_v1, %v2048_v16  ;;  %v1563_v39 = vadd.f32 %v1562_v29, %v4697_v59  ;;  %2465 = vst [vmem:[%s4710_s16 + $0xe0] sm:$0xff] %v1400_v8  ;;  %v5465_v62 = vsub.s32 1, %v4345_v6  ;;  %v2245_v16 = vmul.f32 %v2213_v2, %v4373_v24  ;;  %v2218_v1 = vld [vmem:[#allocation11 + $0x28] sm:$0xff]  ;;  %v2019_v29 = vld [vmem:[#allocation8 + $0xf0] sm:$0xff]  ;;  %v2084_v2 = vld [vmem:[#allocation10 + $0xf8] sm:$0xff] }
 0x28d   : > { %5462 = vst [vmem:[#allocation63_spill] sm:$0xff] %v4873_v21  ;;  %v2113_v5 = vmul.f32 %v2081_v52, %v1561_v49  ;;  %2466 = vst [vmem:[%s4710_s16 + $0xe8] sm:$0xff] %v1402_v26  ;;  %v1405_v53 = vpop.f32.mrb[62].mxu0  ;;  %v4885_v9 = vrot.slane %v874_v51, %v5464_v17  ;;  %v2050_v8 = vmul.f32 %v2018_v11, %v4658_v32  ;;  %v2219_v26 = vld [vmem:[#allocation11 + $0x30] sm:$0xff]  ;;  %v2020_v17 = vld [vmem:[#allocation8 + $0xf8] sm:$0xff] }
 0x28e   : > { %5463 = vst [vmem:[#allocation64_spill] sm:$0xff] %v4877_v44  ;;  %v4889_v21 = vrot.slane %v874_v51, %v5465_v62  ;;  %v2114_v44 = vmul.f32 %v2082_v20, %v1563_v39  ;;  %v1566_v56 = vpop.f32.mrb[62].mxu1  ;;  %v1406_v54 = vadd.f32 %v1405_v53, %v4680_v30  ;;  %v1407_v52 = vpop.f32.mrb[63].mxu0  ;;  %v2246_v49 = vmul.f32 %v2214_v25, %v4381_v4  ;;  %v2220_v30 = vld [vmem:[#allocation11 + $0x38] sm:$0xff] }
 0x28f   : > { %v4895_v6 = vadd.f32 %v2113_v5, %v2049_v40  ;;  %v1567_v51 = vadd.f32 %v1566_v56, %v4672_v3  ;;  %v1568_v24 = vpop.f32.mrb[63].mxu1  ;;  %v1408_v32 = vadd.f32 %v1407_v52, %v4689_v36  ;;  %v4900_v11 = vmul.f32 %v2215_v12, %v4393_v10  ;;  %v2221_v56 = vld [vmem:[#allocation11 + $0x40] sm:$0xff]  ;;  %v2222_v36 = vld [vmem:[#allocation11 + $0x48] sm:$0xff] }
 0x290   : > { %v4903_v20 = vmul.f32 %v2216_v46, %v4399_v42  ;;  %v4905_v39 = vadd.f32 %v2114_v44, %v2050_v8  ;;  %v1569_v4 = vadd.f32 %v1568_v24, %v4697_v59  ;;  %2467 = vst [vmem:[%s4710_s16 + $0xf0] sm:$0xff] %v1406_v54  ;;  %v4910_v5 = vmul.f32 %v2217_v43, %v4413_v33  ;;  %v2277_v12 = vld [vmem:[#allocation13] sm:$0xff]  ;;  %v5469_v59 = vld [vmem:[#allocation49_spill] sm:$0xff] }
 0x291   : > { %5466 = vst [vmem:[#allocation65_spill] sm:$0xff] %v4895_v6  ;;  %v4913_v3 = vmul.f32 %v2218_v1, %v4419_v41  ;;  %v2051_v10 = vmul.f32 %v2019_v29, %v4677_v15  ;;  %v2115_v25 = vmul.f32 %v2083_v31, %v1567_v51  ;;  %2468 = vst [vmem:[%s4710_s16 + $0xf8] sm:$0xff] %v1408_v32  ;;  %v1637_v42 = vpop.f32.mrb[64].mxu0  ;;  %v5468_v46 = vld [vmem:[#allocation24_spill] sm:$0xff]  ;;  %v2278_v8 = vld [vmem:[#allocation13 + $0x8] sm:$0xff]  ;;  %s5527_s16 = sld [smem:[#allocation74_spill]] }
 0x292   : > { %5467 = vst [vmem:[#allocation66_spill] sm:$0xff] %v4905_v39  ;;  %v4918_v44 = vmul.f32 %v2219_v26, %v5468_v46  ;;  %v2229_v40 = vld [vmem:[#allocation11 + $0x80] sm:$0xff]  ;;  %v2052_v53 = vmul.f32 %v2020_v17, %v5469_v59  ;;  %v2116_v62 = vmul.f32 %v2084_v2, %v1569_v4  ;;  %v1638_v33 = vadd.f32 %v1637_v42, %v4885_v9  ;;  %v1685_v43 = vpop.f32.mrb[64].mxu1  ;;  %v1639_v1 = vpop.f32.mrb[65].mxu0  ;;  %v5470_v54 = vld [vmem:[#allocation25_spill] sm:$0xff]  ;;  %v5472_v17 = vld [vmem:[#allocation26_spill] sm:$0xff] }
 0x293   : > { %v2293_v41 = vld [vmem:[#allocation13 + $0x80] sm:$0xff]  ;;  %v4923_v52 = vmul.f32 %v2220_v30, %v5470_v54  ;;  %v2230_v15 = vld [vmem:[#allocation11 + $0x88] sm:$0xff]  ;;  %v4925_v29 = vadd.f32 %v2115_v25, %v2051_v10  ;;  %v1686_v31 = vadd.f32 %v1685_v43, %v4885_v9  ;;  %v1640_v26 = vadd.f32 %v1639_v1, %v4889_v21  ;;  %v1687_v51 = vpop.f32.mrb[65].mxu1  ;;  %v5474_v46 = vld [vmem:[#allocation27_spill] sm:$0xff] }
 0x294   : > { %v2294_v24 = vld [vmem:[#allocation13 + $0x88] sm:$0xff]  ;;  %v4930_v2 = vmul.f32 %v2221_v56, %v5472_v17  ;;  %v4932_v32 = vadd.f32 %v2116_v62, %v2052_v53  ;;  %v2309_v4 = vmul.f32 %v2277_v12, %v1638_v33  ;;  %v1688_v42 = vadd.f32 %v1687_v51, %v4889_v21  ;;  %v2223_v59 = vld [vmem:[#allocation11 + $0x50] sm:$0xff]  ;;  %v2224_v10 = vld [vmem:[#allocation11 + $0x58] sm:$0xff] }
 0x295   : > { %5471 = vst [vmem:[#allocation24_spill] sm:$0xff] %v4925_v29  ;;  %v4936_v30 = vmul.f32 %v2222_v36, %v5474_v46  ;;  %v5475_v25 = vld [vmem:[#allocation34_spill] sm:$0xff]  ;;  %v2325_v43 = vmul.f32 %v2293_v41, %v1686_v31  ;;  %v2310_v29 = vmul.f32 %v2278_v8, %v1640_v26  ;;  %v1643_v1 = vpop.f32.mrb[66].mxu0  ;;  %v5476_v6 = vld [vmem:[#allocation35_spill] sm:$0xff] }
 0x296   : > { %5473 = vst [vmem:[#allocation49_spill] sm:$0xff] %v4932_v32  ;;  %v2261_v54 = vmul.f32 %v2229_v40, %v5475_v25  ;;  %v2279_v39 = vld [vmem:[#allocation13 + $0x10] sm:$0xff]  ;;  %v2262_v18 = vmul.f32 %v2230_v15, %v5476_v6  ;;  %v4940_v17 = vadd.f32 %v2309_v4, %v2245_v16  ;;  %v2326_v53 = vmul.f32 %v2294_v24, %v1688_v42  ;;  %v1691_v62 = vpop.f32.mrb[66].mxu1  ;;  %v1645_v36 = vpop.f32.mrb[67].mxu0  ;;  %v2280_v51 = vld [vmem:[#allocation13 + $0x18] sm:$0xff]  ;;  %v5478_v16 = vld [vmem:[#allocation28_spill] sm:$0xff] }
 0x297   : > { %v2231_v56 = vld [vmem:[#allocation11 + $0x90] sm:$0xff]  ;;  %v1644_v12 = vadd.f32 %v1643_v1, %v4885_v9  ;;  %v2232_v46 = vld [vmem:[#allocation11 + $0x98] sm:$0xff]  ;;  %v4945_v40 = vadd.f32 %v2310_v29, %v2246_v49  ;;  %v1692_v41 = vadd.f32 %v1691_v62, %v4885_v9  ;;  %v1646_v8 = vadd.f32 %v1645_v36, %v4889_v21  ;;  %v1693_v6 = vpop.f32.mrb[67].mxu1  ;;  %v5480_v42 = vld [vmem:[#allocation29_spill] sm:$0xff]  ;;  %s5217_s1 = scalar_lea.hbm %s5527_s16, %s2789_s28 }
 0x298   : > { %v2295_v33 = vld [vmem:[#allocation13 + $0x90] sm:$0xff]  ;;  %v4943_v32 = vadd.f32 %v2325_v43, %v2261_v54  ;;  %v2296_v15 = vld [vmem:[#allocation13 + $0x98] sm:$0xff]  ;;  %v4950_v31 = vmul.f32 %v2223_v59, %v5478_v16  ;;  %v4952_v26 = vadd.f32 %v2326_v53, %v2262_v18  ;;  %v1694_v4 = vadd.f32 %v1693_v6, %v4889_v21  ;;  %v2225_v54 = vld [vmem:[#allocation11 + $0x60] sm:$0xff] }
 0x299   : > { %v2311_v24 = vmul.f32 %v2279_v39, %v1644_v12  ;;  %v4956_v25 = vmul.f32 %v2224_v10, %v5480_v42  ;;  %v2226_v49 = vld [vmem:[#allocation11 + $0x68] sm:$0xff]  ;;  %v5481_v29 = vld [vmem:[#allocation36_spill] sm:$0xff]  ;;  %v2327_v1 = vmul.f32 %v2295_v33, %v1692_v41  ;;  %v2312_v62 = vmul.f32 %v2280_v51, %v1646_v8  ;;  %v1649_v36 = vpop.f32.mrb[68].mxu0 }
 0x29a   : > { %5477 = vst [vmem:[#allocation25_spill] sm:$0xff] %v4943_v32  ;;  %5479 = vst [vmem:[#allocation26_spill] sm:$0xff] %v4952_v26  ;;  %v2263_v43 = vmul.f32 %v2231_v56, %v5481_v29  ;;  %v2264_v61 = vmul.f32 %v2232_v46, %v5482_v13  ;;  %v2233_v59 = vld [vmem:[#allocation11 + $0xa0] sm:$0xff]  ;;  %v2328_v39 = vmul.f32 %v2296_v15, %v1694_v4  ;;  %v1697_v12 = vpop.f32.mrb[68].mxu1  ;;  %v1651_v6 = vpop.f32.mrb[69].mxu0  ;;  %v2282_v16 = vld [vmem:[#allocation13 + $0x28] sm:$0xff] }
 0x29b   : > { %v4961_v18 = vadd.f32 %v2311_v24, %v4900_v11  ;;  %v1650_v53 = vadd.f32 %v1649_v36, %v4885_v9  ;;  %v2297_v10 = vld [vmem:[#allocation13 + $0xa0] sm:$0xff]  ;;  %v2234_v42 = vld [vmem:[#allocation11 + $0xa8] sm:$0xff]  ;;  %v4967_v56 = vadd.f32 %v2312_v62, %v4903_v20  ;;  %v1698_v33 = vadd.f32 %v1697_v12, %v4885_v9  ;;  %v1699_v51 = vpop.f32.mrb[69].mxu1  ;;  %v5484_v46 = vld [vmem:[#allocation30_spill] sm:$0xff] }
 0x29c   : > { %v4964_v50 = vadd.f32 %v2327_v1, %v2263_v43  ;;  %v1652_v13 = vadd.f32 %v1651_v6, %v4889_v21  ;;  %v2298_v11 = vld [vmem:[#allocation13 + $0xa8] sm:$0xff]  ;;  %v4972_v41 = vmul.f32 %v2225_v54, %v5484_v46  ;;  %v4974_v8 = vadd.f32 %v2328_v39, %v2264_v61  ;;  %v5486_v4 = vld [vmem:[#allocation31_spill] sm:$0xff]  ;;  %v2227_v43 = vld [vmem:[#allocation11 + $0x70] sm:$0xff] }
 0x29d   : > { %v2313_v15 = vmul.f32 %v2281_v58, %v1650_v53  ;;  %v1700_v24 = vadd.f32 %v1699_v51, %v4889_v21  ;;  %v4978_v29 = vmul.f32 %v2226_v49, %v5486_v4  ;;  %v2228_v20 = vld [vmem:[#allocation11 + $0x78] sm:$0xff]  ;;  %v5487_v1 = vld [vmem:[#allocation38_spill] sm:$0xff]  ;;  %v2329_v36 = vmul.f32 %v2297_v10, %v1698_v33  ;;  %v1655_v6 = vpop.f32.mrb[70].mxu0  ;;  %v5499_v32 = vld [vmem:[#allocation45_spill] sm:$0xff] }
 0x29e   : > { %5483 = vst [vmem:[#allocation27_spill] sm:$0xff] %v4964_v50  ;;  %5485 = vst [vmem:[#allocation34_spill] sm:$0xff] %v4974_v8  ;;  %v2265_v62 = vmul.f32 %v2233_v59, %v5487_v1  ;;  %v2314_v12 = vmul.f32 %v2282_v16, %v1652_v13  ;;  %v2266_v14 = vmul.f32 %v2234_v42, %v5488_v55  ;;  %v2235_v54 = vld [vmem:[#allocation11 + $0xb0] sm:$0xff]  ;;  %v1703_v53 = vpop.f32.mrb[70].mxu1  ;;  %v1657_v51 = vpop.f32.mrb[71].mxu0  ;;  %v2284_v46 = vld [vmem:[#allocation13 + $0x38] sm:$0xff] }
 0x29f   : > { %v4983_v61 = vadd.f32 %v2313_v15, %v4910_v5  ;;  %v2330_v58 = vmul.f32 %v2298_v11, %v1700_v24  ;;  %v1656_v39 = vadd.f32 %v1655_v6, %v4885_v9  ;;  %v2299_v49 = vld [vmem:[#allocation13 + $0xb0] sm:$0xff]  ;;  %v2236_v4 = vld [vmem:[#allocation11 + $0xb8] sm:$0xff]  ;;  %v1704_v10 = vadd.f32 %v1703_v53, %v4885_v9  ;;  %v1705_v16 = vpop.f32.mrb[71].mxu1  ;;  %v5490_v42 = vld [vmem:[#allocation32_spill] sm:$0xff] }
 0x2a0   : > { %v4986_v8 = vadd.f32 %v2329_v36, %v2265_v62  ;;  %v4989_v59 = vadd.f32 %v2314_v12, %v4913_v3  ;;  %v1658_v55 = vadd.f32 %v1657_v51, %v4889_v21  ;;  %v2300_v5 = vld [vmem:[#allocation13 + $0xb8] sm:$0xff]  ;;  %v4994_v33 = vmul.f32 %v2227_v43, %v5490_v42  ;;  %v5492_v24 = vld [vmem:[#allocation33_spill] sm:$0xff]  ;;  %v5493_v62 = vld [vmem:[#allocation40_spill] sm:$0xff] }
 0x2a1   : > { %v4996_v13 = vadd.f32 %v2330_v58, %v2266_v14  ;;  %v2315_v11 = vmul.f32 %v2283_v38, %v1656_v39  ;;  %v1706_v15 = vadd.f32 %v1705_v16, %v4889_v21  ;;  %v5000_v1 = vmul.f32 %v2228_v20, %v5492_v24  ;;  %v2237_v36 = vld [vmem:[#allocation11 + $0xc0] sm:$0xff]  ;;  %v2238_v12 = vld [vmem:[#allocation11 + $0xc8] sm:$0xff]  ;;  %v1661_v51 = vpop.f32.mrb[72].mxu0  ;;  %v2239_v43 = vld [vmem:[#allocation11 + $0xd0] sm:$0xff] }
 0x2a2   : > { %5489 = vst [vmem:[#allocation35_spill] sm:$0xff] %v4986_v8  ;;  %v2267_v3 = vmul.f32 %v2235_v54, %v5493_v62  ;;  %v2331_v6 = vmul.f32 %v2299_v49, %v1704_v10  ;;  %v2316_v53 = vmul.f32 %v2284_v46, %v1658_v55  ;;  %v2285_v8 = vld [vmem:[#allocation13 + $0x40] sm:$0xff]  ;;  %v5494_v50 = vld [vmem:[#allocation41_spill] sm:$0xff]  ;;  %v1662_v58 = vadd.f32 %v1661_v51, %v4885_v9  ;;  %v1709_v39 = vpop.f32.mrb[72].mxu1  ;;  %v1663_v16 = vpop.f32.mrb[73].mxu0  ;;  %v2240_v54 = vld [vmem:[#allocation11 + $0xd8] sm:$0xff] }
 0x2a3   : > { %5491 = vst [vmem:[#allocation28_spill] sm:$0xff] %v4996_v13  ;;  %v2268_v26 = vmul.f32 %v2236_v4, %v5494_v50  ;;  %v5005_v14 = vadd.f32 %v2315_v11, %v4918_v44  ;;  %v2332_v38 = vmul.f32 %v2300_v5, %v1706_v15  ;;  %v2301_v20 = vld [vmem:[#allocation13 + $0xc0] sm:$0xff]  ;;  %v2286_v42 = vld [vmem:[#allocation13 + $0x48] sm:$0xff]  ;;  %v1710_v46 = vadd.f32 %v1709_v39, %v4885_v9  ;;  %v1711_v4 = vpop.f32.mrb[73].mxu1  ;;  %v5496_v10 = vld [vmem:[#allocation42_spill] sm:$0xff] }
 0x2a4   : > { %v5008_v24 = vadd.f32 %v2331_v6, %v2267_v3  ;;  %v5011_v49 = vadd.f32 %v2316_v53, %v4923_v52  ;;  %v1664_v50 = vadd.f32 %v1663_v16, %v4889_v21  ;;  %v2302_v44 = vld [vmem:[#allocation13 + $0xc8] sm:$0xff]  ;;  %v2269_v55 = vmul.f32 %v2237_v36, %v5496_v10  ;;  %v5497_v62 = vld [vmem:[#allocation43_spill] sm:$0xff]  ;;  %v5498_v3 = vld [vmem:[#allocation44_spill] sm:$0xff] }
 0x2a5   : > { %v5016_v5 = vadd.f32 %v2332_v38, %v2268_v26  ;;  %v2317_v11 = vmul.f32 %v2285_v8, %v1662_v58  ;;  %v1712_v15 = vadd.f32 %v1711_v4, %v4889_v21  ;;  %v2270_v51 = vmul.f32 %v2238_v12, %v5497_v62  ;;  %v1667_v13 = vpop.f32.mrb[74].mxu0  ;;  %v2287_v39 = vld [vmem:[#allocation13 + $0x50] sm:$0xff]  ;;  %v2288_v12 = vld [vmem:[#allocation13 + $0x58] sm:$0xff] }
 0x2a6   : > { %5495 = vst [vmem:[#allocation29_spill] sm:$0xff] %v5008_v24  ;;  %v2271_v6 = vmul.f32 %v2239_v43, %v5498_v3  ;;  %v2241_v24 = vld [vmem:[#allocation11 + $0xe0] sm:$0xff]  ;;  %v2333_v52 = vmul.f32 %v2301_v20, %v1710_v46  ;;  %v2318_v53 = vmul.f32 %v2286_v42, %v1664_v50  ;;  %v2272_v16 = vmul.f32 %v2240_v54, %v5499_v32  ;;  %v1715_v36 = vpop.f32.mrb[74].mxu1  ;;  %v2303_v38 = vld [vmem:[#allocation13 + $0xd0] sm:$0xff]  ;;  %v1669_v58 = vpop.f32.mrb[75].mxu0  ;;  %v2304_v32 = vld [vmem:[#allocation13 + $0xd8] sm:$0xff] }
 0x2a7   : > { %v5023_v19 = vadd.f32 %v2317_v11, %v4930_v2  ;;  %v2334_v26 = vmul.f32 %v2302_v44, %v1712_v15  ;;  %v1668_v8 = vadd.f32 %v1667_v13, %v4885_v9  ;;  %v1716_v20 = vadd.f32 %v1715_v36, %v4885_v9  ;;  %v1717_v42 = vpop.f32.mrb[75].mxu1  ;;  %v1895_v54 = vpop.xlane.xlu0 %1894  ;;  %v5501_v10 = vld [vmem:[#allocation46_spill] sm:$0xff] }
 0x2a8   : > { %v5026_v4 = vadd.f32 %v2333_v52, %v2269_v55  ;;  %v5029_v43 = vadd.f32 %v2318_v53, %v4936_v30  ;;  %v1670_v2 = vadd.f32 %v1669_v58, %v4889_v21  ;;  %v1718_v13 = vadd.f32 %v1717_v42, %v4889_v21  ;;  %v5502_v55 = vld [vmem:[#allocation47_spill] sm:$0xff]  ;;  %v2289_v52 = vld [vmem:[#allocation13 + $0x60] sm:$0xff]  ;;  %v2290_v58 = vld [vmem:[#allocation13 + $0x68] sm:$0xff] }
 0x2a9   : > { %v5033_v46 = vadd.f32 %v2334_v26, %v2270_v51  ;;  %v2319_v50 = vmul.f32 %v2287_v39, %v1668_v8  ;;  %v1941_v44 = vmul.f32 0.00390625, %v1895_v54  ;;  %v2273_v11 = vmul.f32 %v2241_v24, %v5501_v10  ;;  %v1673_v3 = vpop.f32.mrb[76].mxu0  ;;  %v2305_v39 = vld [vmem:[#allocation13 + $0xe0] sm:$0xff]  ;;  %v2243_v42 = vld [vmem:[#allocation11 + $0xf0] sm:$0xff] }
 0x2aa   : > { %5500 = vst [vmem:[#allocation36_spill] sm:$0xff] %v5026_v4  ;;  %v2274_v15 = vmul.f32 %v2242_v34, %v5502_v55  ;;  %v2335_v62 = vmul.f32 %v2303_v38, %v1716_v20  ;;  %v2320_v30 = vmul.f32 %v2288_v12, %v1670_v2  ;;  %v2336_v36 = vmul.f32 %v2304_v32, %v1718_v13  ;;  %v1721_v26 = vpop.f32.mrb[76].mxu1  ;;  %v1675_v8 = vpop.f32.mrb[77].mxu0  ;;  %v2306_v12 = vld [vmem:[#allocation13 + $0xe8] sm:$0xff] }
 0x2ab   : > { %v5039_v53 = vadd.f32 %v2319_v50, %v4950_v31  ;;  %v1957_v4 = vadd.f32 1e-06, %v1941_v44  ;;  %v1674_v51 = vadd.f32 %v1673_v3, %v4885_v9  ;;  %v1722_v24 = vadd.f32 %v1721_v26, %v4885_v9  ;;  %v1723_v31 = vpop.f32.mrb[77].mxu1  ;;  %v1769_v20 = vpop.xlane.xlu1 %1768 }
 0x2ac   : > { %v5042_v54 = vadd.f32 %v2335_v62, %v2271_v6  ;;  %v5045_v34 = vadd.f32 %v2320_v30, %v4956_v25  ;;  %v1676_v38 = vadd.f32 %v1675_v8, %v4889_v21  ;;  %v5049_v32 = vadd.f32 %v2336_v36, %v2272_v16  ;;  %v1766_v13 = vpop.xlane.xlu0 %1765  ;;  %v2291_v62 = vld [vmem:[#allocation13 + $0x70] sm:$0xff]  ;;  %v5503_v30 = vld [vmem:[#allocation48_spill] sm:$0xff] }
 0x2ad   : > { %3283 = vrsqrt.f32 %v1957_v4  ;;  %v2321_v2 = vmul.f32 %v2289_v52, %v1674_v51  ;;  %v1724_v50 = vadd.f32 %v1723_v31, %v4889_v21  ;;  %v2337_v44 = vmul.f32 %v2305_v39, %v1722_v24  ;;  %v1679_v25 = vpop.f32.mrb[78].mxu0  ;;  %v2307_v4 = vld [vmem:[#allocation13 + $0xf0] sm:$0xff] }
 0x2ae   : > { %v2322_v6 = vmul.f32 %v2290_v58, %v1676_v38  ;;  %v1814_v10 = vmul.f32 0.00390625, %v1769_v20  ;;  %v1813_v55 = vmul.f32 0.00390625, %v1766_v13  ;;  %v2275_v3 = vmul.f32 %v2243_v42, %v5503_v30  ;;  %v1727_v36 = vpop.f32.mrb[78].mxu1  ;;  %v1681_v52 = vpop.f32.mrb[79].mxu0  ;;  %v2292_v38 = vld [vmem:[#allocation13 + $0x78] sm:$0xff] }
 0x2af   : > { %v5054_v26 = vadd.f32 %v2321_v2, %v4972_v41  ;;  %v2338_v8 = vmul.f32 %v2306_v12, %v1724_v50  ;;  %v1680_v16 = vadd.f32 %v1679_v25, %v4885_v9  ;;  %v5057_v51 = vadd.f32 %v2337_v44, %v2273_v11  ;;  %v1729_v31 = vpop.f32.mrb[79].mxu1  ;;  %v1901_v20 = vpop.xlane.xlu1 %1900  ;;  %v2244_v42 = vld [vmem:[#allocation11 + $0xf8] sm:$0xff] }
 0x2b0   : > { %v5060_v39 = vadd.f32 %v2322_v6, %v4978_v29  ;;  %v1830_v58 = vadd.f32 1e-06, %v1814_v10  ;;  %v1829_v24 = vadd.f32 1e-06, %v1813_v55  ;;  %v1728_v12 = vadd.f32 %v1727_v36, %v4885_v9  ;;  %v2308_v50 = vld [vmem:[#allocation13 + $0xf8] sm:$0xff]  ;;  %v1898_v25 = vpop.xlane.xlu0 %1897 }
 0x2b1   : > { %v5062_v13 = vadd.f32 %v2338_v8, %v2274_v15  ;;  %v2323_v41 = vmul.f32 %v2291_v62, %v1680_v16  ;;  %v1682_v2 = vadd.f32 %v1681_v52, %v4889_v21  ;;  %v1730_v11 = vadd.f32 %v1729_v31, %v4889_v21  ;;  %v5504_v15 = vld [vmem:[#allocation50_spill] sm:$0xff] }
 0x2b2   : > { %3285 = vrsqrt.f32 %v1830_v58  ;;  %v1943_v29 = vmul.f32 0.00390625, %v1901_v20  ;;  %v1942_v44 = vmul.f32 0.00390625, %v1898_v25  ;;  %v2339_v10 = vmul.f32 %v2307_v4, %v1728_v12 }
 0x2b3   : > { %3287 = vrsqrt.f32 %v1829_v24  ;;  %v5068_v6 = vadd.f32 %v2323_v41, %v4994_v33  ;;  %v2324_v55 = vmul.f32 %v2292_v38, %v1682_v2  ;;  %v2276_v30 = vmul.f32 %v2244_v42, %v5504_v15  ;;  %v1904_v16 = vpop.xlane.xlu1 %1903 }
 0x2b4   : > { %v2340_v62 = vmul.f32 %v2308_v50, %v1730_v11  ;;  %v1959_v8 = vadd.f32 1e-06, %v1943_v29  ;;  %v1958_v9 = vadd.f32 1e-06, %v1942_v44  ;;  %v5071_v36 = vadd.f32 %v2339_v10, %v2275_v3  ;;  %v1772_v58 = vpop.xlane.xlu0 %1771 }
 0x2b5   : > { %v5074_v52 = vadd.f32 %v2324_v55, %v5000_v1  ;;  %v1944_v21 = vmul.f32 0.00390625, %v1904_v16  ;;  %v1815_v33 = vmul.f32 0.00390625, %v1772_v58 }
 0x2b6   : > { %v5076_v24 = vadd.f32 %v2340_v62, %v2276_v30  ;;  %3289 = vrsqrt.f32 %v1959_v8 }
 0x2b7   : > { %v3284_v4 = vpop.eup %3283  ;;  %3291 = vrsqrt.f32 %v1958_v9  ;;  %v1960_v38 = vadd.f32 1e-06, %v1944_v21  ;;  %v1831_v42 = vadd.f32 1e-06, %v1815_v33  ;;  %v1775_v3 = vpop.xlane.xlu1 %1774 }
 0x2b8   : > { %v2373_v31 = vmul.f32 %v3284_v4, %v4940_v17  ;;  %v2374_v20 = vmul.f32 %v3284_v4, %v4945_v40  ;;  %v1816_v41 = vmul.f32 0.00390625, %v1775_v3  ;;  %v1907_v1 = vpop.xlane.xlu0 %1906 }
 0x2b9   : > { %3293 = vrsqrt.f32 %v1960_v38  ;;  %v1945_v12 = vmul.f32 0.00390625, %v1907_v1 }
 0x2ba   : > { %2405 = vst [vmem:[%s5081_s9] sm:$0xff] %v2373_v31  ;;  %2406 = vst [vmem:[%s5081_s9 + $0x8] sm:$0xff] %v2374_v20  ;;  %3295 = vrsqrt.f32 %v1831_v42  ;;  %v1832_v2 = vadd.f32 1e-06, %v1816_v41 }
 0x2bb   : > { %v1961_v25 = vadd.f32 1e-06, %v1945_v12  ;;  %v1910_v17 = vpop.xlane.xlu1 %1909 }
 0x2bc   : > { %v3286_v50 = vpop.eup %3285  ;;  %3297 = vrsqrt.f32 %v1832_v2  ;;  %v1946_v44 = vmul.f32 0.00390625, %v1910_v17  ;;  %v1778_v10 = vpop.xlane.xlu0 %1777 }
 0x2bd   : > { %v3288_v11 = vpop.eup %3287  ;;  %v2151_v40 = vmul.f32 %v3286_v50, %v4729_v37  ;;  %v2152_v29 = vmul.f32 %v3286_v50, %v4733_v35  ;;  %3299 = vrsqrt.f32 %v1961_v25  ;;  %v1817_v30 = vmul.f32 0.00390625, %v1778_v10 }
 0x2be   : > { %v2149_v55 = vmul.f32 %v3288_v11, %v4717_v7  ;;  %v2150_v15 = vmul.f32 %v3288_v11, %v4721_v0  ;;  %v1962_v37 = vadd.f32 1e-06, %v1946_v44 }
 0x2bf   : > { %2183 = vst [vmem:[%s5090_s18 + $0x10] sm:$0xff] %v2151_v40  ;;  %2184 = vst [vmem:[%s5090_s18 + $0x18] sm:$0xff] %v2152_v29  ;;  %v1833_v35 = vadd.f32 1e-06, %v1817_v30  ;;  %v1781_v7 = vpop.xlane.xlu1 %1780 }
 0x2c0   : > { %v3290_v62 = vpop.eup %3289  ;;  %2181 = vst [vmem:[%s5090_s18] sm:$0xff] %v2149_v55  ;;  %2182 = vst [vmem:[%s5090_s18 + $0x8] sm:$0xff] %v2150_v15  ;;  %3301 = vrsqrt.f32 %v1962_v37  ;;  %v1818_v16 = vmul.f32 0.00390625, %v1781_v7  ;;  %v1913_v21 = vpop.xlane.xlu0 %1912 }
 0x2c1   : > { %v3292_v0 = vpop.eup %3291  ;;  %v2377_v8 = vmul.f32 %v3290_v62, %v4983_v61  ;;  %v2378_v9 = vmul.f32 %v3290_v62, %v4989_v59  ;;  %3303 = vrsqrt.f32 %v1833_v35  ;;  %v1947_v4 = vmul.f32 0.00390625, %v1913_v21 }
 0x2c2   : > { %v2375_v58 = vmul.f32 %v3292_v0, %v4961_v18  ;;  %v2376_v33 = vmul.f32 %v3292_v0, %v4967_v56  ;;  %v1834_v31 = vadd.f32 1e-06, %v1818_v16 }
 0x2c3   : > { %v3294_v38 = vpop.eup %3293  ;;  %2409 = vst [vmem:[%s5081_s9 + $0x20] sm:$0xff] %v2377_v8  ;;  %2410 = vst [vmem:[%s5081_s9 + $0x28] sm:$0xff] %v2378_v9  ;;  %v1963_v18 = vadd.f32 1e-06, %v1947_v4  ;;  %v1916_v42 = vpop.xlane.xlu1 %1915 }
 0x2c4   : > { %v3296_v20 = vpop.eup %3295  ;;  %2407 = vst [vmem:[%s5081_s9 + $0x10] sm:$0xff] %v2375_v58  ;;  %2408 = vst [vmem:[%s5081_s9 + $0x18] sm:$0xff] %v2376_v33  ;;  %v2379_v61 = vmul.f32 %v3294_v38, %v5005_v14  ;;  %v2380_v59 = vmul.f32 %v3294_v38, %v5011_v49  ;;  %3305 = vrsqrt.f32 %v1834_v31  ;;  %v1948_v41 = vmul.f32 0.00390625, %v1916_v42  ;;  %v1784_v1 = vpop.xlane.xlu0 %1783 }
 0x2c5   : > { %v2153_v56 = vmul.f32 %v3296_v20, %v4741_v28  ;;  %v2154_v3 = vmul.f32 %v3296_v20, %v4745_v47  ;;  %3307 = vrsqrt.f32 %v1963_v18  ;;  %v1819_v12 = vmul.f32 0.00390625, %v1784_v1  ;;  %v5506_v1 = vld [vmem:[#allocation52_spill] sm:$0xff] }
 0x2c6   : > { %2411 = vst [vmem:[%s5081_s9 + $0x30] sm:$0xff] %v2379_v61  ;;  %2412 = vst [vmem:[%s5081_s9 + $0x38] sm:$0xff] %v2380_v59  ;;  %v3298_v2 = vpop.eup %3297  ;;  %v1964_v14 = vadd.f32 1e-06, %v1948_v41  ;;  %v5505_v41 = vld [vmem:[#allocation51_spill] sm:$0xff] }
 0x2c7   : > { %2185 = vst [vmem:[%s5090_s18 + $0x20] sm:$0xff] %v2153_v56  ;;  %2186 = vst [vmem:[%s5090_s18 + $0x28] sm:$0xff] %v2154_v3  ;;  %v3300_v49 = vpop.eup %3299  ;;  %v2155_v28 = vmul.f32 %v3298_v2, %v4753_v60  ;;  %v2156_v47 = vmul.f32 %v3298_v2, %v4757_v45  ;;  %v1835_v50 = vadd.f32 1e-06, %v1819_v12  ;;  %v1787_v25 = vpop.xlane.xlu1 %1786 }
 0x2c8   : > { %v2381_v17 = vmul.f32 %v3300_v49, %v5023_v19  ;;  %v2382_v11 = vmul.f32 %v3300_v49, %v5029_v43  ;;  %3309 = vrsqrt.f32 %v1964_v14  ;;  %v1820_v40 = vmul.f32 0.00390625, %v1787_v25  ;;  %v1919_v29 = vpop.xlane.xlu0 %1918  ;;  %v5507_v14 = vld [vmem:[#allocation25_spill] sm:$0xff] }
 0x2c9   : > { %2187 = vst [vmem:[%s5090_s18 + $0x30] sm:$0xff] %v2155_v28  ;;  %2188 = vst [vmem:[%s5090_s18 + $0x38] sm:$0xff] %v2156_v47  ;;  %3311 = vrsqrt.f32 %v1835_v50  ;;  %v1949_v44 = vmul.f32 0.00390625, %v1919_v29  ;;  %v5508_v28 = vld [vmem:[#allocation26_spill] sm:$0xff] }
 0x2ca   : > { %v3302_v10 = vpop.eup %3301  ;;  %2413 = vst [vmem:[%s5081_s9 + $0x40] sm:$0xff] %v2381_v17  ;;  %2414 = vst [vmem:[%s5081_s9 + $0x48] sm:$0xff] %v2382_v11  ;;  %v1836_v60 = vadd.f32 1e-06, %v1820_v40 }
 0x2cb   : > { %v3304_v45 = vpop.eup %3303  ;;  %v2383_v19 = vmul.f32 %v3302_v10, %v5039_v53  ;;  %v2384_v43 = vmul.f32 %v3302_v10, %v5045_v34  ;;  %v1965_v55 = vadd.f32 1e-06, %v1949_v44  ;;  %v1922_v15 = vpop.xlane.xlu1 %1921  ;;  %v5509_v44 = vld [vmem:[#allocation27_spill] sm:$0xff] }
 0x2cc   : > { %v2157_v30 = vmul.f32 %v3304_v45, %v4765_v57  ;;  %v2158_v37 = vmul.f32 %v3304_v45, %v4769_v63  ;;  %3313 = vrsqrt.f32 %v1836_v60  ;;  %v1950_v62 = vmul.f32 0.00390625, %v1922_v15  ;;  %v1790_v35 = vpop.xlane.xlu0 %1789  ;;  %v5510_v60 = vld [vmem:[#allocation34_spill] sm:$0xff] }
 0x2cd   : > { %2415 = vst [vmem:[%s5081_s9 + $0x50] sm:$0xff] %v2383_v19  ;;  %2416 = vst [vmem:[%s5081_s9 + $0x58] sm:$0xff] %v2384_v43  ;;  %3315 = vrsqrt.f32 %v1965_v55  ;;  %v1821_v7 = vmul.f32 0.00390625, %v1790_v35  ;;  %v5511_v55 = vld [vmem:[#allocation53_spill] sm:$0xff] }
 0x2ce   : > { %v3306_v0 = vpop.eup %3305  ;;  %2189 = vst [vmem:[%s5090_s18 + $0x40] sm:$0xff] %v2157_v30  ;;  %2190 = vst [vmem:[%s5090_s18 + $0x48] sm:$0xff] %v2158_v37  ;;  %v1966_v53 = vadd.f32 1e-06, %v1950_v62  ;;  %v5512_v30 = vld [vmem:[#allocation54_spill] sm:$0xff] }
 0x2cf   : > { %v3308_v34 = vpop.eup %3307  ;;  %v2159_v57 = vmul.f32 %v3306_v0, %v4777_v27  ;;  %v2160_v63 = vmul.f32 %v3306_v0, %v4781_v23  ;;  %v1837_v8 = vadd.f32 1e-06, %v1821_v7  ;;  %v1793_v9 = vpop.xlane.xlu1 %1792 }
 0x2d0   : > { %v2385_v16 = vmul.f32 %v3308_v34, %v5054_v26  ;;  %v2386_v21 = vmul.f32 %v3308_v34, %v5060_v39  ;;  %3317 = vrsqrt.f32 %v1966_v53  ;;  %v1822_v58 = vmul.f32 0.00390625, %v1793_v9  ;;  %v1925_v33 = vpop.xlane.xlu0 %1924 }
 0x2d1   : > { %2191 = vst [vmem:[%s5090_s18 + $0x50] sm:$0xff] %v2159_v57  ;;  %2192 = vst [vmem:[%s5090_s18 + $0x58] sm:$0xff] %v2160_v63  ;;  %3319 = vrsqrt.f32 %v1837_v8  ;;  %v1951_v4 = vmul.f32 0.00390625, %v1925_v33  ;;  %v5513_v57 = vld [vmem:[#allocation55_spill] sm:$0xff]  ;;  %v5514_v8 = vld [vmem:[#allocation56_spill] sm:$0xff] }
 0x2d2   : > { %v3310_v38 = vpop.eup %3309  ;;  %2417 = vst [vmem:[%s5081_s9 + $0x60] sm:$0xff] %v2385_v16  ;;  %2418 = vst [vmem:[%s5081_s9 + $0x68] sm:$0xff] %v2386_v21  ;;  %v1838_v27 = vadd.f32 1e-06, %v1822_v58  ;;  %v5515_v58 = vld [vmem:[#allocation35_spill] sm:$0xff] }
 0x2d3   : > { %v3312_v23 = vpop.eup %3311  ;;  %v2387_v26 = vmul.f32 %v3310_v38, %v5068_v6  ;;  %v2388_v39 = vmul.f32 %v3310_v38, %v5074_v52  ;;  %v1967_v31 = vadd.f32 1e-06, %v1951_v4  ;;  %v1928_v20 = vpop.xlane.xlu1 %1927  ;;  %v5516_v4 = vld [vmem:[#allocation28_spill] sm:$0xff] }
 0x2d4   : > { %v2161_v61 = vmul.f32 %v3312_v23, %v4789_v22  ;;  %v2162_v59 = vmul.f32 %v3312_v23, %v4793_v48  ;;  %3321 = vrsqrt.f32 %v1838_v27  ;;  %v1952_v18 = vmul.f32 0.00390625, %v1928_v20  ;;  %v1796_v42 = vpop.xlane.xlu0 %1795 }
 0x2d5   : > { %2419 = vst [vmem:[%s5081_s9 + $0x70] sm:$0xff] %v2387_v26  ;;  %2420 = vst [vmem:[%s5081_s9 + $0x78] sm:$0xff] %v2388_v39  ;;  %3323 = vrsqrt.f32 %v1967_v31  ;;  %v1823_v56 = vmul.f32 0.00390625, %v1796_v42 }
 0x2d6   : > { %v3314_v3 = vpop.eup %3313  ;;  %2193 = vst [vmem:[%s5090_s18 + $0x60] sm:$0xff] %v2161_v61  ;;  %2194 = vst [vmem:[%s5090_s18 + $0x68] sm:$0xff] %v2162_v59  ;;  %v1968_v6 = vadd.f32 1e-06, %v1952_v18  ;;  %v5517_v61 = vld [vmem:[#allocation29_spill] sm:$0xff] }
 0x2d7   : > { %v3316_v52 = vpop.eup %3315  ;;  %v2163_v22 = vmul.f32 %v3314_v3, %v5505_v41  ;;  %v2164_v48 = vmul.f32 %v3314_v3, %v5506_v1  ;;  %v1839_v12 = vadd.f32 1e-06, %v1823_v56  ;;  %v1799_v2 = vpop.xlane.xlu1 %1798  ;;  %v5518_v3 = vld [vmem:[#allocation57_spill] sm:$0xff] }
 0x2d8   : > { %v2389_v49 = vmul.f32 %v3316_v52, %v5507_v14  ;;  %v2390_v47 = vmul.f32 %v3316_v52, %v5508_v28  ;;  %3325 = vrsqrt.f32 %v1968_v6  ;;  %v1824_v50 = vmul.f32 0.00390625, %v1799_v2  ;;  %v1931_v25 = vpop.xlane.xlu0 %1930  ;;  %v5519_v52 = vld [vmem:[#allocation58_spill] sm:$0xff]  ;;  %v5520_v14 = vld [vmem:[#allocation59_spill] sm:$0xff]  ;;  %v5521_v28 = vld [vmem:[#allocation60_spill] sm:$0xff] }
 0x2d9   : > { %2195 = vst [vmem:[%s5090_s18 + $0x70] sm:$0xff] %v2163_v22  ;;  %2196 = vst [vmem:[%s5090_s18 + $0x78] sm:$0xff] %v2164_v48  ;;  %3327 = vrsqrt.f32 %v1839_v12  ;;  %v1953_v17 = vmul.f32 0.00390625, %v1931_v25 }
 0x2da   : > { %v3318_v11 = vpop.eup %3317  ;;  %2421 = vst [vmem:[%s5081_s9 + $0x80] sm:$0xff] %v2389_v49  ;;  %2422 = vst [vmem:[%s5081_s9 + $0x88] sm:$0xff] %v2390_v47  ;;  %v1840_v40 = vadd.f32 1e-06, %v1824_v50 }
 0x2db   : > { %v3320_v29 = vpop.eup %3319  ;;  %v2391_v10 = vmul.f32 %v3318_v11, %v5509_v44  ;;  %v2392_v45 = vmul.f32 %v3318_v11, %v5510_v60  ;;  %v1969_v19 = vadd.f32 1e-06, %v1953_v17  ;;  %v1934_v43 = vpop.xlane.xlu1 %1933  ;;  %v5522_v17 = vld [vmem:[#allocation36_spill] sm:$0xff] }
 0x2dc   : > { %v2165_v15 = vmul.f32 %v3320_v29, %v5511_v55  ;;  %v2166_v37 = vmul.f32 %v3320_v29, %v5512_v30  ;;  %3329 = vrsqrt.f32 %v1840_v40  ;;  %v1954_v62 = vmul.f32 0.00390625, %v1934_v43  ;;  %v1802_v35 = vpop.xlane.xlu0 %1801  ;;  %v5524_v55 = vld [vmem:[#allocation62_spill] sm:$0xff] }
 0x2dd   : > { %2423 = vst [vmem:[%s5081_s9 + $0x90] sm:$0xff] %v2391_v10  ;;  %2424 = vst [vmem:[%s5081_s9 + $0x98] sm:$0xff] %v2392_v45  ;;  %3331 = vrsqrt.f32 %v1969_v19  ;;  %v1825_v7 = vmul.f32 0.00390625, %v1802_v35  ;;  %v5523_v19 = vld [vmem:[#allocation61_spill] sm:$0xff] }
 0x2de   : > { %v3322_v0 = vpop.eup %3321  ;;  %2197 = vst [vmem:[%s5090_s18 + $0x80] sm:$0xff] %v2165_v15  ;;  %2198 = vst [vmem:[%s5090_s18 + $0x88] sm:$0xff] %v2166_v37  ;;  %v1970_v53 = vadd.f32 1e-06, %v1954_v62  ;;  %v5526_v62 = vld [vmem:[#allocation64_spill] sm:$0xff] }
 0x2df   : > { %v3324_v34 = vpop.eup %3323  ;;  %v2167_v63 = vmul.f32 %v3322_v0, %v5513_v57  ;;  %v2168_v9 = vmul.f32 %v3322_v0, %v5514_v8  ;;  %v1841_v16 = vadd.f32 1e-06, %v1825_v7  ;;  %v1805_v21 = vpop.xlane.xlu1 %1804  ;;  %v5528_v57 = vld [vmem:[#allocation65_spill] sm:$0xff]  ;;  %v5529_v8 = vld [vmem:[#allocation66_spill] sm:$0xff] }
 0x2e0   : > { %v2393_v33 = vmul.f32 %v3324_v34, %v5515_v58  ;;  %v2394_v38 = vmul.f32 %v3324_v34, %v5516_v4  ;;  %3333 = vrsqrt.f32 %v1970_v53  ;;  %v1826_v27 = vmul.f32 0.00390625, %v1805_v21  ;;  %v1937_v23 = vpop.xlane.xlu0 %1936 }
 0x2e1   : > { %2199 = vst [vmem:[%s5090_s18 + $0x90] sm:$0xff] %v2167_v63  ;;  %2200 = vst [vmem:[%s5090_s18 + $0x98] sm:$0xff] %v2168_v9  ;;  %3335 = vrsqrt.f32 %v1841_v16  ;;  %v1955_v26 = vmul.f32 0.00390625, %v1937_v23 }
 0x2e2   : > { %v3326_v39 = vpop.eup %3325  ;;  %2425 = vst [vmem:[%s5081_s9 + $0xa0] sm:$0xff] %v2393_v33  ;;  %2426 = vst [vmem:[%s5081_s9 + $0xa8] sm:$0xff] %v2394_v38  ;;  %v1842_v31 = vadd.f32 1e-06, %v1826_v27 }
 0x2e3   : > { %v3328_v20 = vpop.eup %3327  ;;  %v2395_v59 = vmul.f32 %v3326_v39, %v5517_v61  ;;  %v2396_v18 = vmul.f32 %v3326_v39, %v5016_v5  ;;  %v1971_v42 = vadd.f32 1e-06, %v1955_v26  ;;  %v1940_v56 = vpop.xlane.xlu1 %1939 }
 0x2e4   : > { %v2169_v6 = vmul.f32 %v3328_v20, %v5518_v3  ;;  %v2170_v41 = vmul.f32 %v3328_v20, %v5519_v52  ;;  %3337 = vrsqrt.f32 %v1842_v31  ;;  %v1956_v22 = vmul.f32 0.00390625, %v1940_v56  ;;  %v1808_v1 = vpop.xlane.xlu0 %1807 }
 0x2e5   : > { %2427 = vst [vmem:[%s5081_s9 + $0xb0] sm:$0xff] %v2395_v59  ;;  %2428 = vst [vmem:[%s5081_s9 + $0xb8] sm:$0xff] %v2396_v18  ;;  %3339 = vrsqrt.f32 %v1971_v42  ;;  %v1827_v48 = vmul.f32 0.00390625, %v1808_v1 }
 0x2e6   : > { %v3330_v12 = vpop.eup %3329  ;;  %2201 = vst [vmem:[%s5090_s18 + $0xa0] sm:$0xff] %v2169_v6  ;;  %2202 = vst [vmem:[%s5090_s18 + $0xa8] sm:$0xff] %v2170_v41  ;;  %v1972_v5 = vadd.f32 1e-06, %v1956_v22 }
 0x2e7   : > { %v3332_v2 = vpop.eup %3331  ;;  %v2171_v49 = vmul.f32 %v3330_v12, %v5520_v14  ;;  %v2172_v47 = vmul.f32 %v3330_v12, %v5521_v28  ;;  %v1843_v50 = vadd.f32 1e-06, %v1827_v48  ;;  %v1811_v25 = vpop.xlane.xlu1 %1810 }
 0x2e8   : > { %v2397_v11 = vmul.f32 %v3332_v2, %v5522_v17  ;;  %v2398_v40 = vmul.f32 %v3332_v2, %v5033_v46  ;;  %3341 = vrsqrt.f32 %v1972_v5  ;;  %v1828_v29 = vmul.f32 0.00390625, %v1811_v25 }
 0x2e9   : > { %2203 = vst [vmem:[%s5090_s18 + $0xb0] sm:$0xff] %v2171_v49  ;;  %2204 = vst [vmem:[%s5090_s18 + $0xb8] sm:$0xff] %v2172_v47  ;;  %3343 = vrsqrt.f32 %v1843_v50 }
 0x2ea   : > { %v3334_v44 = vpop.eup %3333  ;;  %2429 = vst [vmem:[%s5081_s9 + $0xc0] sm:$0xff] %v2397_v11  ;;  %2430 = vst [vmem:[%s5081_s9 + $0xc8] sm:$0xff] %v2398_v40  ;;  %v1844_v10 = vadd.f32 1e-06, %v1828_v29 }
 0x2eb   : > { %v3336_v60 = vpop.eup %3335  ;;  %v2399_v45 = vmul.f32 %v3334_v44, %v5042_v54  ;;  %v2400_v46 = vmul.f32 %v3334_v44, %v5049_v32  ;;  %v5525_v32 = vld [vmem:[#allocation63_spill] sm:$0xff] }
 0x2ec   : > { %v2173_v43 = vmul.f32 %v3336_v60, %v5523_v19  ;;  %v2174_v15 = vmul.f32 %v3336_v60, %v5524_v55  ;;  %3345 = vrsqrt.f32 %v1844_v10 }
 0x2ed   : > { %2431 = vst [vmem:[%s5081_s9 + $0xd0] sm:$0xff] %v2399_v45  ;;  %2432 = vst [vmem:[%s5081_s9 + $0xd8] sm:$0xff] %v2400_v46 }
 0x2ee   : > { %v3338_v30 = vpop.eup %3337  ;;  %2205 = vst [vmem:[%s5090_s18 + $0xc0] sm:$0xff] %v2173_v43  ;;  %2206 = vst [vmem:[%s5090_s18 + $0xc8] sm:$0xff] %v2174_v15 }
 0x2ef   : > { %v3340_v54 = vpop.eup %3339  ;;  %v2175_v37 = vmul.f32 %v3338_v30, %v5525_v32  ;;  %v2176_v35 = vmul.f32 %v3338_v30, %v5526_v62 }
 0x2f0   : > { %v2401_v7 = vmul.f32 %v3340_v54, %v5057_v51  ;;  %v2402_v0 = vmul.f32 %v3340_v54, %v5062_v13 }
 0x2f1   : > { %2207 = vst [vmem:[%s5090_s18 + $0xd0] sm:$0xff] %v2175_v37  ;;  %2208 = vst [vmem:[%s5090_s18 + $0xd8] sm:$0xff] %v2176_v35 }
 0x2f2   : > { %v3342_v53 = vpop.eup %3341  ;;  %2433 = vst [vmem:[%s5081_s9 + $0xe0] sm:$0xff] %v2401_v7  ;;  %2434 = vst [vmem:[%s5081_s9 + $0xe8] sm:$0xff] %v2402_v0 }
 0x2f3   : > { %v3344_v51 = vpop.eup %3343  ;;  %v2403_v13 = vmul.f32 %v3342_v53, %v5071_v36  ;;  %v2404_v34 = vmul.f32 %v3342_v53, %v5076_v24 }
 0x2f4   : > { %v2177_v63 = vmul.f32 %v3344_v51, %v5528_v57  ;;  %v2178_v9 = vmul.f32 %v3344_v51, %v5529_v8 }
 0x2f5   : > { %2435 = vst [vmem:[%s5081_s9 + $0xf0] sm:$0xff] %v2403_v13  ;;  %2436 = vst [vmem:[%s5081_s9 + $0xf8] sm:$0xff] %v2404_v34  ;;  %s3557_s9 = sshll.u32 %s3720_s4, 4  ;;  %s3558_s9 = int_to_ptr.vmem [resolvable:$false] %s3557_s9 }
 0x2f6   : > { %v3346_v36 = vpop.eup %3345  ;;  %2209 = vst [vmem:[%s5090_s18 + $0xe0] sm:$0xff] %v2177_v63  ;;  %2210 = vst [vmem:[%s5090_s18 + $0xe8] sm:$0xff] %v2178_v9  ;;  %s3559_s5 = scalar_lea.vmem %s3558_s9, 8192  ;;  %p3560_p3 = scmp.lt.s32.totalorder %s5212_s17, %s3558_s9 }
 0x2f7   : > { %p3561_p6 = scmp.lt.s32.totalorder %s3559_s5, %s3553_s3 }
 0x2f9   : > { %p3562_p13 = por %p3561_p6, %p3560_p3 }
 0x2fb   : > { %p3563_p11 = pnand %p3562_p13, %p3556_p1 }
 0x2fd   : > { %3566 = shalt.err (!%p3563_p11)
}
 0x2fe   : > { %s3567_s15 = scalar_lea.hbm %s5207_s22, 4096  ;;  %s3571_s4 = scalar_lea.hbm %s5352_s8, 8192 }
 0x2ff   : > { %p3568_p4 = scmp.ne.s32.totalorder %s5207_s22, %s3567_s15  ;;  %p3572_p12 = scmp.lt.u32.totalorder %s5207_s22, %s5352_s8 }
 0x300   : > { %p3573_p0 = scmp.lt.u32.totalorder %s3571_s4, %s3567_s15  ;;  %p3575_p2 = scmp.lt.u32.totalorder %s3567_s15, %s5207_s22 }
 0x301   : > { %p3569_p9 = pnand %p3568_p4, %p5532_p5 }
 0x302   : > { %p3574_p7 = por %p3573_p0, %p3572_p12 }
 0x303   : > { %p3570_p10 = pneg %p3569_p9 }
 0x304   : > { %p3576_p8 = por %p3575_p2, %p3574_p7 }
 0x306   : > { %p3577_p1 = pnand %p3576_p8, %p3570_p10 }
 0x308   : > { %3580 = shalt.err (!%p3577_p1)
}
 0x309   : > { %s3721_s3 = smov 256   ;;  %s3722_s5 = smov 16   ;;  %v5533_v24 = vld [vmem:[#allocation24_spill] sm:$0xff]  ;;  %v5534_v21 = vld [vmem:[#allocation49_spill] sm:$0xff] }
 0x30a   : > { %3171 = dma.vmem_to_hbm [thread:$0]  (%p5532_p5), %s5212_s17, 4096, %s5207_s22, %s5236_s19, %s3721_s3, %s3721_s3, %s3722_s5   ;;  %v2179_v16 = vmul.f32 %v3346_v36, %v5533_v24  ;;  %v2180_v58 = vmul.f32 %v3346_v36, %v5534_v21 }
 0x30b   : > { %s3581_s9 = scalar_lea.vmem %s5221_s25, 4096  ;;  %s3723_s15 = smov [#allocation17]  }
 0x30c   : > { %p3582_p3 = scmp.ne.s32.totalorder %s5221_s25, %s3581_s9  ;;  %s3585_s29 = sshll.u32 %s3723_s15, 4  ;;  %s3586_s29 = int_to_ptr.vmem [resolvable:$false] %s3585_s29 }
 0x30d   : > { %s3587_s28 = scalar_lea.vmem %s3586_s29, 8192  ;;  %p3588_p11 = scmp.lt.s32.totalorder %s5221_s25, %s3586_s29 }
 0x30e   : > { %p3583_p6 = pnand %p3582_p3, %p5532_p5  ;;  %p3589_p4 = scmp.lt.s32.totalorder %s3587_s28, %s3581_s9 }
 0x310   : > { %p3584_p13 = pneg %p3583_p6  ;;  %p3590_p9 = por %p3589_p4, %p3588_p11 }
 0x312   : > { %p3591_p10 = pnand %p3590_p9, %p3584_p13 }
 0x314   : > { %3594 = shalt.err (!%p3591_p10)
}
 0x315   : > { %s3595_s17 = scalar_lea.hbm %s5217_s1, 4096  ;;  %s3599_s26 = scalar_lea.hbm %s5527_s16, 8192 }
 0x316   : > { %p3596_p12 = scmp.ne.s32.totalorder %s5217_s1, %s3595_s17  ;;  %p3600_p2 = scmp.lt.u32.totalorder %s5217_s1, %s5527_s16 }
 0x317   : > { %p3601_p8 = scmp.lt.u32.totalorder %s3599_s26, %s3595_s17  ;;  %p3603_p3 = scmp.lt.u32.totalorder %s3595_s17, %s5217_s1 }
 0x318   : > { %p3597_p0 = pnand %p3596_p12, %p5532_p5 }
 0x319   : > { %p3602_p1 = por %p3601_p8, %p3600_p2 }
 0x31a   : > { %p3598_p7 = pneg %p3597_p0 }
 0x31b   : > { %p3604_p6 = por %p3603_p3, %p3602_p1 }
 0x31d   : > { %p3605_p13 = pnand %p3604_p6, %p3598_p7 }
 0x31f   : > { %3608 = shalt.err (!%p3605_p13)
}
 0x320   : > { %3172 = dma.vmem_to_hbm [thread:$0]  (%p5532_p5), %s5221_s25, 4096, %s5217_s1, %s5236_s19, %s3721_s3, %s3721_s3, %s3722_s5  }
 0x321   : > { %2211 = vst [vmem:[%s5090_s18 + $0xf0] sm:$0xff] %v2179_v16  ;;  %2212 = vst [vmem:[%s5090_s18 + $0xf8] sm:$0xff] %v2180_v58  ;;  %s2470_s9 = scalar_lea.sflag [#allocation4], %s4064_s23  ;;  %s3609_s29 = scalar_lea.vmem %s5230_s12, 4096 }
 0x322   : > { %p3610_p11 = scmp.ne.s32.totalorder %s5230_s12, %s3609_s29  ;;  %s3724_s28 = smov [#allocation14]  }
 0x323   : > { %s3613_s17 = sshll.u32 %s3724_s28, 4  ;;  %s3614_s17 = int_to_ptr.vmem [resolvable:$false] %s3613_s17 }
 0x324   : > { %p3611_p4 = pnand %p3610_p11, %p5532_p5  ;;  %s3615_s22 = scalar_lea.vmem %s3614_s17, 8192 }
 0x325   : > { %p3616_p10 = scmp.lt.s32.totalorder %s5230_s12, %s3614_s17  ;;  %p3617_p12 = scmp.lt.s32.totalorder %s3615_s22, %s3609_s29 }
 0x326   : > { %p3612_p9 = pneg %p3611_p4 }
 0x327   : > { %p3618_p0 = por %p3617_p12, %p3616_p10 }
 0x329   : > { %p3619_p7 = pnand %p3618_p0, %p3612_p9 }
 0x32b   : > { %3622 = shalt.err (!%p3619_p7)
}
 0x32c   : > { %s3623_s18 = scalar_lea.hbm %s5228_s2, 4096  ;;  %s3627_s19 = scalar_lea.hbm %s5530_s0, 8192 }
 0x32d   : > { %p3624_p2 = scmp.ne.s32.totalorder %s5228_s2, %s3623_s18  ;;  %p3628_p3 = scmp.lt.u32.totalorder %s5228_s2, %s5530_s0 }
 0x32e   : > { %p3629_p6 = scmp.lt.u32.totalorder %s3627_s19, %s3623_s18  ;;  %p3631_p11 = scmp.lt.u32.totalorder %s3623_s18, %s5228_s2 }
 0x32f   : > { %p3625_p8 = pnand %p3624_p2, %p5532_p5 }
 0x330   : > { %p3630_p13 = por %p3629_p6, %p3628_p3 }
 0x331   : > { %p3626_p1 = pneg %p3625_p8 }
 0x332   : > { %p3632_p4 = por %p3631_p11, %p3630_p13 }
 0x334   : > { %p3633_p9 = pnand %p3632_p4, %p3626_p1 }
 0x336   : > { %3636 = shalt.err (!%p3633_p9)
}
 0x337   : > { %3170 = dma.vmem_to_hbm [thread:$0]  (%p5532_p5), %s5230_s12, 4096, %s5228_s2, %s2470_s9, %s3721_s3, %s3721_s3, %s3722_s5  }
 0x338 PF: > { %s2549_s7 = sand.u32 1, %s3687_s30   ;;  %p5535_p10 = scmp.ne.s32.totalorder %s5411_s24, 0 }
 0x339   : > { %p5536_p12 = scmp.ge.s32.totalorder %s3707_s14, 2  ;;  %s2550_s15 = scalar_lea.sflag [#allocation4], %s2549_s7 }
 0x33b   : > { %p3200_p0 = pnand %p5536_p12, %p5535_p10 }
 0x33d   : > { %3678 = dma.done.wait (!%p3200_p0), %s2550_s15, 4096  }
 0x33e   : > { %3680 = vsyncadd (!%p3200_p0), %s2550_s15, 4294963200  ;;  %s5537_s20 = sadd.s32 4294967294, %s3707_s14  }
 0x33f   : > { %s2558_s29 = sand.u32 1, %s5537_s20  }
 0x340   : > { %s2559_s28 = scalar_lea.sflag [#allocation16], %s2558_s29 }
 0x341   : > { %3682 = dma.done.wait (!%p3200_p0), %s2559_s28, 8192  }
 0x342   : > { %3684 = vsyncadd (!%p3200_p0), %s2559_s28, 4294959104  ;;  %s32_s14 = sadd.s32 1, %s3707_s14   ;;  %s5538_s30 = smov %s3691_s10 }
 0x343   : > { %p29_p5 = scmp.ge.s32.totalorder %s32_s14, 4   ;;  %s5539_s10 = smov %s3695_s11 }
 0x344   : > { %s5540_s11 = smov %s4008_s21  ;;  %s5541_s12 = smov %s3703_s13 }
 0x345   : > { %s5542_s13 = smov %s5544_s27  ;;  %31 = sbr.rel (!%p29_p5) target bundleno = 20 (0x14), region = 153 }
 0x34c   :  { %2573 = vsyncpa [#allocation3], 1 }
 0x34d   :  { %2575 = vsyncpa [#allocation3 + $0x1], 1 }
 0x34e   :  { %2576 = vsyncpa [#allocation6], 1 }
 0x34f   :  { %2577 = vsyncpa [#allocation9], 1 }
 0x350   :  { %2578 = vsyncpa [#allocation12], 1 }
 0x351   :  { %2579 = vsyncpa [#allocation4], 1 }
 0x352   :  { %2581 = vsyncpa [#allocation4 + $0x1], 1 }
 0x353   :  { %2582 = vsyncpa [#allocation16], 1 }
 0x354   :  { %2584 = vsyncpa [#allocation16 + $0x1], 1 }

</bundles_post_ra>
